<compile_context>
chip_gen: v7x
topology: tpu7x:2x2x1
jax: 0.10.0
libtpu: 0.0.40
codegen_flags: <defaults>
</compile_context>

<pallas_src>
import functools

import numpy as np
import jax
import jax.numpy as jnp
from jax import lax
from jax.experimental import pallas as pl
from jax.experimental.pallas import tpu as pltpu

HIDDEN = 1024
CONV_FILTERS = 16
CONV_KERNEL = 3
CONV_STRIDES = (2, 1, 1)
LN_EPS = 1e-5

_VMEM_LIMIT = 16 * 1024 * 1024   # resident need is ~10 MiB; was 32 MiB


def _head_axis_mode():
    """Returns (encode_per_step, dimension_semantics) per TPU generation."""
    try:
        kind = jax.devices()[0].device_kind.lower()
    except Exception:  # pragma: no cover - defensive
        kind = ""
    if "v7" in kind or "tpu7" in kind:
        # 2 TCs/chip: make head steps independent and split them across cores.
        return True, (pltpu.CORE_PARALLEL,)
    # Single-TC chips: encoder once, z carried in scratch across head steps.
    return False, (pltpu.ARBITRARY,)


# ----------------------------------------------------------------------------
# Fused kernel: encoder (folded-conv GEMM chain -> fc -> LayerNorm -> tanh)
# plus one Q head per grid step.
# ----------------------------------------------------------------------------
def _critic_kernel(x_ref, a_ref,
                   ew0q_ref, ew0s_ref, ew0b_ref,
                   ew1q_ref, ew1s_ref, ew1b_ref,
                   ew2_ref, ew2b_ref,
                   fcw_ref, fcb_ref, lng_ref, lnb_ref,
                   w1z_ref, w1a_ref, b1_ref,
                   w2q_ref, w2s_ref, b2_ref,
                   w3t_ref, b3_ref,
                   q_ref, z_sc, *, eps, encode_per_step):
    def _encode():
        x = x_ref[...].astype(jnp.bfloat16)                    # (B, C*H*W)
        # int8 folded-conv weights: int8->bf16 is exact; per-output-column
        # scale is applied to the tiny GEMM result (dequant ~1 op / vreg).
        h = (jnp.dot(x, ew0q_ref[...].astype(jnp.bfloat16),
                     preferred_element_type=jnp.float32)
             * ew0s_ref[...] + ew0b_ref[...])
        h = jnp.maximum(h, 0.0)
        h = (jnp.dot(h.astype(jnp.bfloat16), ew1q_ref[...].astype(jnp.bfloat16),
                     preferred_element_type=jnp.float32)
             * ew1s_ref[...] + ew1b_ref[...])
        h = jnp.maximum(h, 0.0)
        h = (jnp.dot(h.astype(jnp.bfloat16), ew2_ref[...],
                     preferred_element_type=jnp.float32) + ew2b_ref[...])
        h = jnp.maximum(h, 0.0)                                 # (B, n_flatten)
        z = jnp.dot(h, fcw_ref[...],
                    preferred_element_type=jnp.float32) + fcb_ref[...]
        mean = jnp.mean(z, axis=-1, keepdims=True)
        var = jnp.mean(jnp.square(z - mean), axis=-1, keepdims=True)
        z = (z - mean) * lax.rsqrt(var + eps)
        z_sc[...] = jnp.tanh(z * lng_ref[...] + lnb_ref[...])

    if encode_per_step:
        _encode()                                     # independent steps (v7x)
    else:
        pl.when(pl.program_id(0) == 0)(_encode)       # once; z cached in VMEM

    # ---- Q head for this grid step:  concat([z, a]) @ W1 == z@W1z + a@W1a ----
    z = z_sc[...].astype(jnp.bfloat16)
    a = a_ref[...].astype(jnp.bfloat16)
    h1 = (jnp.dot(z, w1z_ref[0], preferred_element_type=jnp.float32)
          + jnp.dot(a, w1a_ref[0], preferred_element_type=jnp.float32)
          + b1_ref[0])
    h1 = jnp.maximum(h1, 0.0)
    w2 = w2q_ref[0].astype(jnp.bfloat16)              # int8 -> bf16 (exact)
    h2 = (jnp.dot(h1.astype(jnp.bfloat16), w2,
                  preferred_element_type=jnp.float32) * w2s_ref[0] + b2_ref[0])
    h2 = jnp.maximum(h2, 0.0)
    # Lane-dense w3 row: VPU/XLU reduction instead of an N=1 MXU matvec.
    w3_row = w3t_ref[0].astype(jnp.float32)           # (1, HIDDEN)
    q = jnp.sum(h2 * w3_row, axis=-1, keepdims=True) + b3_ref[0]   # (B, 1)
    q_ref[0] = q.astype(q_ref.dtype)


# ----------------------------------------------------------------------------
# Wrapper
# ----------------------------------------------------------------------------
def _shared_spec(a):
    nd = a.ndim
    return pl.BlockSpec(tuple(a.shape), lambda h: (0,) * nd)


def _head_spec(a):
    nd = a.ndim
    return pl.BlockSpec((1,) + tuple(a.shape[1:]),
                        lambda h: (h,) + (0,) * (nd - 1))


def _critic_forward(pp, state, action):
    B = state.shape[0]
    # Layout guard: NCHW flatten order is baked into the folded conv weights.
    assert state.ndim == 4 and int(np.prod(state.shape[1:])) == pp["ew0_q"].shape[0], (
        "state must be NCHW and match the layout folded into the conv weights")
    x_flat = state.reshape(B, -1)
    latent = pp["fc_w"].shape[1]

    encode_per_step, dim_sem = _head_axis_mode()

    shared = (x_flat, action,
              pp["ew0_q"], pp["ew0_s"], pp["ew0_b"],
              pp["ew1_q"], pp["ew1_s"], pp["ew1_b"],
              pp["ew2"], pp["ew2_b"],
              pp["fc_w"], pp["fc_b"], pp["ln_g"], pp["ln_b"])
    per_head = (pp["w1z"], pp["w1a"], pp["b1"],
                pp["w2_q"], pp["w2_s"], pp["b2"],
                pp["w3t"], pp["b3"])
    in_specs = ([_shared_spec(a) for a in shared]
                + [_head_spec(a) for a in per_head])

    out = pl.pallas_call(
        functools.partial(_critic_kernel, eps=LN_EPS,
                          encode_per_step=encode_per_step),
        out_shape=jax.ShapeDtypeStruct((2, B, 1), jnp.float32),
        grid=(2,),
        in_specs=in_specs,
        out_specs=pl.BlockSpec((1, B, 1), lambda h: (h, 0, 0)),
        scratch_shapes=[pltpu.VMEM((B, latent), jnp.float32)],
        compiler_params=pltpu.CompilerParams(
            dimension_semantics=dim_sem, vmem_limit_bytes=_VMEM_LIMIT),
    )(*shared, *per_head)
    return out[0], out[1]


critic_forward = jax.jit(_critic_forward)


# ----------------------------------------------------------------------------
# One-time param preparation: fold im2col into the conv weights (host-side
# numpy), int8-compress the large folds and w2 (per-output-column scales),
# pre-split W1 into z/action parts, lay w3 out lane-dense.
# ----------------------------------------------------------------------------
def _expand_conv(w, b, in_hw, stride):
    """Fold a VALID 2D conv into a dense matrix over the NCHW-flattened map."""
    w = np.asarray(w, np.float32)
    b = np.asarray(b, np.float32)
    F, C, k, _ = w.shape
    H, W = in_hw
    oh = (H - k) // stride + 1
    ow = (W - k) // stride + 1
    full = np.zeros((C, H, W, F, oh, ow), np.float32)
    for i in range(k):
        for j in range(k):
            wij = w[:, :, i, j].T                       # (C, F)
            for yo in range(oh):
                for xo in range(ow):
                    full[:, stride * yo + i, stride * xo + j, :, yo, xo] = wij
    w_full = full.reshape(C * H * W, F * oh * ow)
    b_full = np.repeat(b, oh * ow).reshape(1, F * oh * ow)
    return w_full, b_full, (oh, ow)


def _quantize_cols(w):
    """Symmetric per-output-column int8 quantization: (q int8, scale (1,N) f32)."""
    w = np.asarray(w, np.float32)
    s = np.maximum(np.abs(w).max(axis=0), 1e-12) / 127.0
    q = np.clip(np.rint(w / s), -127, 127).astype(np.int8)
    return jnp.asarray(q), jnp.asarray(s.reshape(1, -1), dtype=jnp.float32)


def prepare_pallas_params(params, spatial):
    pp = {}
    hw = (spatial, spatial)
    folds = []
    for i, stride in enumerate(CONV_STRIDES):
        w_full, b_full, hw = _expand_conv(
            params[f"conv{i}_w"], params[f"conv{i}_b"], hw, stride)
        folds.append((w_full, b_full))
    n_flatten = CONV_FILTERS * hw[0] * hw[1]
    assert params["fc_w"].shape[0] == n_flatten, "conv config / fc_w mismatch"

    # conv0/conv1 folds are mostly zero fill -> int8 halves their HBM bytes.
    pp["ew0_q"], pp["ew0_s"] = _quantize_cols(folds[0][0])
    pp["ew0_b"] = jnp.asarray(folds[0][1])
    pp["ew1_q"], pp["ew1_s"] = _quantize_cols(folds[1][0])
    pp["ew1_b"] = jnp.asarray(folds[1][1])
    pp["ew2"] = jnp.asarray(folds[2][0]).astype(jnp.bfloat16)     # small
    pp["ew2_b"] = jnp.asarray(folds[2][1])

    latent = params["fc_w"].shape[1]
    pp["fc_w"] = params["fc_w"]                                   # small, f32
    pp["fc_b"] = params["fc_b"].reshape(1, latent)
    pp["ln_g"] = params["ln_g"].reshape(1, latent)
    pp["ln_b"] = params["ln_b"].reshape(1, latent)

    w1 = params["w1"]                                             # (2, L+na, H)
    pp["w1z"] = w1[:, :latent, :].astype(jnp.bfloat16)
    pp["w1a"] = w1[:, latent:, :].astype(jnp.bfloat16)
    pp["b1"] = params["b1"]                                       # (2, 1, H)
    w2q, w2s = [], []
    for hd in range(2):
        q, s = _quantize_cols(params["w2"][hd])
        w2q.append(q)
        w2s.append(s)
    pp["w2_q"] = jnp.stack(w2q)                                   # (2, H, H) i8
    pp["w2_s"] = jnp.stack(w2s)                                   # (2, 1, H)
    pp["b2"] = params["b2"]                                       # (2, 1, H)
    pp["w3t"] = params["w3"].transpose(0, 2, 1).astype(jnp.bfloat16)  # (2,1,H)
    pp["b3"] = params["b3"]                                       # (2, 1, 1)
    return pp


# ----------------------------------------------------------------------------
# Pure-JAX f32 reference (faithful to the PyTorch module) and synthetic init
# ----------------------------------------------------------------------------
def reference_forward(params, state, action):
    h = state
    for i, stride in enumerate(CONV_STRIDES):
        w = params[f"conv{i}_w"]
        b = params[f"conv{i}_b"]
        h = lax.conv_general_dilated(
            h, w, (stride, stride), "VALID",
            dimension_numbers=("NCHW", "OIHW", "NCHW"))
        h = jax.nn.relu(h + b.reshape(1, -1, 1, 1))
    flat = h.reshape(h.shape[0], -1)
    z = flat @ params["fc_w"] + params["fc_b"]
    mean = jnp.mean(z, axis=-1, keepdims=True)
    var = jnp.mean(jnp.square(z - mean), axis=-1, keepdims=True)
    z = (z - mean) / jnp.sqrt(var + LN_EPS) * params["ln_g"] + params["ln_b"]
    z = jnp.tanh(z)

    x = jnp.concatenate([z, action], axis=1)
    qs = []
    for hd in range(2):
        h1 = jax.nn.relu(x @ params["w1"][hd] + params["b1"][hd][0])
        h2 = jax.nn.relu(h1 @ params["w2"][hd] + params["b2"][hd][0])
        qs.append(h2 @ params["w3"][hd] + params["b3"][hd][0])
    return qs[0], qs[1]


def init_params(key, in_channels, spatial, latent, num_actions):
    # TODO(synk): exact PyTorch weight_init scheme not reproduced; deterministic
    # synthetic init is used (forward-pass semantics are what matter here).
    keys = jax.random.split(key, 16)
    params = {}
    c = in_channels
    h = spatial
    for i, stride in enumerate(CONV_STRIDES):
        params[f"conv{i}_w"] = 0.1 * jax.random.normal(
            keys[i], (CONV_FILTERS, c, CONV_KERNEL, CONV_KERNEL), jnp.float32)
        params[f"conv{i}_b"] = 0.01 * jax.random.normal(
            keys[i + 3], (CONV_FILTERS,), jnp.float32)
        c = CONV_FILTERS
        h = (h - CONV_KERNEL) // stride + 1
    n_flatten = CONV_FILTERS * h * h
    params["fc_w"] = 0.05 * jax.random.normal(keys[6], (n_flatten, latent), jnp.float32)
    params["fc_b"] = 0.01 * jax.random.normal(keys[7], (latent,), jnp.float32)
    params["ln_g"] = jnp.ones((latent,), jnp.float32)
    params["ln_b"] = jnp.zeros((latent,), jnp.float32)

    in_dim = latent + num_actions
    params["w1"] = 0.05 * jax.random.normal(keys[8], (2, in_dim, HIDDEN), jnp.float32)
    params["b1"] = 0.01 * jax.random.normal(keys[9], (2, 1, HIDDEN), jnp.float32)
    params["w2"] = 0.05 * jax.random.normal(keys[10], (2, HIDDEN, HIDDEN), jnp.float32)
    params["b2"] = 0.01 * jax.random.normal(keys[11], (2, 1, HIDDEN), jnp.float32)
    params["w3"] = 0.05 * jax.random.normal(keys[12], (2, HIDDEN, 1), jnp.float32)
    params["b3"] = 0.01 * jax.random.normal(keys[13], (2, 1, 1), jnp.float32)
    return params


if __name__ == "__main__":
    key = jax.random.PRNGKey(0)
    k_state, k_action, k_params = jax.random.split(key, 3)

    B, C, S = 2, 3, 16
    latent, num_actions = 32, 4

    state = jax.random.normal(k_state, (B, C, S, S), jnp.float32)
    action = jax.random.normal(k_action, (B, num_actions), jnp.float32)
    params = init_params(k_params, C, S, latent, num_actions)
    pallas_params = prepare_pallas_params(params, S)   # one-time prep, outside jit

    q1, q2 = critic_forward(pallas_params, state, action)
    jax.block_until_ready((q1, q2))
    assert q1.shape == (B, 1) and q2.shape == (B, 1)

    # Compare against the faithful f32 reference; bf16 activations plus int8
    # per-column weight compression warrant a slightly looser tolerance.
    rq1, rq2 = reference_forward(params, state, action)
    assert jnp.allclose(q1, rq1, atol=3e-2, rtol=3e-2), (q1, rq1)
    assert jnp.allclose(q2, rq2, atol=3e-2, rtol=3e-2), (q2, rq2)

    print("KERNEL_OK")
</pallas_src>

<mosaic_0001>
module attributes {stable_mosaic.version = 11 : i64} {
  func.func @_critic_kernel(%arg0: i32, %arg1: memref<2x768xf32, #tpu.memory_space<vmem>>, %arg2: memref<2x4xf32, #tpu.memory_space<vmem>>, %arg3: memref<768x784xi8, #tpu.memory_space<vmem>>, %arg4: memref<1x784xf32, #tpu.memory_space<vmem>>, %arg5: memref<1x784xf32, #tpu.memory_space<vmem>>, %arg6: memref<784x400xi8, #tpu.memory_space<vmem>>, %arg7: memref<1x400xf32, #tpu.memory_space<vmem>>, %arg8: memref<1x400xf32, #tpu.memory_space<vmem>>, %arg9: memref<400x144xbf16, #tpu.memory_space<vmem>>, %arg10: memref<1x144xf32, #tpu.memory_space<vmem>>, %arg11: memref<144x32xf32, #tpu.memory_space<vmem>>, %arg12: memref<1x32xf32, #tpu.memory_space<vmem>>, %arg13: memref<1x32xf32, #tpu.memory_space<vmem>>, %arg14: memref<1x32xf32, #tpu.memory_space<vmem>>, %arg15: memref<1x32x1024xbf16, #tpu.memory_space<vmem>>, %arg16: memref<1x4x1024xbf16, #tpu.memory_space<vmem>>, %arg17: memref<1x1x1024xf32, #tpu.memory_space<vmem>>, %arg18: memref<1x1024x1024xi8, #tpu.memory_space<vmem>>, %arg19: memref<1x1x1024xf32, #tpu.memory_space<vmem>>, %arg20: memref<1x1x1024xf32, #tpu.memory_space<vmem>>, %arg21: memref<1x1x1024xbf16, #tpu.memory_space<vmem>>, %arg22: memref<1x1x1xf32, #tpu.memory_space<vmem>>, %arg23: memref<1x2x1xf32, #tpu.memory_space<vmem>>, %arg24: memref<2x32xf32, #tpu.memory_space<vmem>>) attributes {dimension_semantics = [#tpu.dimension_semantics<arbitrary>], iteration_bounds = array<i64: 2>, scalar_prefetch = 0 : i64, scratch_operands = 1 : i64, tpu.core_type = #tpu.core_type<tc>, window_params = [{pipeline_mode = #tpu.pipeline_mode<synchronous>, transform_indices = @transform_0, window_bounds = array<i64: 2, 768>}, {pipeline_mode = #tpu.pipeline_mode<synchronous>, transform_indices = @transform_1, window_bounds = array<i64: 2, 4>}, {pipeline_mode = #tpu.pipeline_mode<synchronous>, transform_indices = @transform_2, window_bounds = array<i64: 768, 784>}, {pipeline_mode = #tpu.pipeline_mode<synchronous>, transform_indices = @transform_3, window_bounds = array<i64: 1, 784>}, {pipeline_mode = #tpu.pipeline_mode<synchronous>, transform_indices = @transform_4, window_bounds = array<i64: 1, 784>}, {pipeline_mode = #tpu.pipeline_mode<synchronous>, transform_indices = @transform_5, window_bounds = array<i64: 784, 400>}, {pipeline_mode = #tpu.pipeline_mode<synchronous>, transform_indices = @transform_6, window_bounds = array<i64: 1, 400>}, {pipeline_mode = #tpu.pipeline_mode<synchronous>, transform_indices = @transform_7, window_bounds = array<i64: 1, 400>}, {pipeline_mode = #tpu.pipeline_mode<synchronous>, transform_indices = @transform_8, window_bounds = array<i64: 400, 144>}, {pipeline_mode = #tpu.pipeline_mode<synchronous>, transform_indices = @transform_9, window_bounds = array<i64: 1, 144>}, {pipeline_mode = #tpu.pipeline_mode<synchronous>, transform_indices = @transform_10, window_bounds = array<i64: 144, 32>}, {pipeline_mode = #tpu.pipeline_mode<synchronous>, transform_indices = @transform_11, window_bounds = array<i64: 1, 32>}, {pipeline_mode = #tpu.pipeline_mode<synchronous>, transform_indices = @transform_12, window_bounds = array<i64: 1, 32>}, {pipeline_mode = #tpu.pipeline_mode<synchronous>, transform_indices = @transform_13, window_bounds = array<i64: 1, 32>}, {transform_indices = @transform_14, window_bounds = array<i64: 1, 32, 1024>}, {transform_indices = @transform_15, window_bounds = array<i64: 1, 4, 1024>}, {transform_indices = @transform_16, window_bounds = array<i64: 1, 1, 1024>}, {transform_indices = @transform_17, window_bounds = array<i64: 1, 1024, 1024>}, {transform_indices = @transform_18, window_bounds = array<i64: 1, 1, 1024>}, {transform_indices = @transform_19, window_bounds = array<i64: 1, 1, 1024>}, {transform_indices = @transform_20, window_bounds = array<i64: 1, 1, 1024>}, {transform_indices = @transform_21, window_bounds = array<i64: 1, 1, 1>}, {transform_indices = @transform_22, window_bounds = array<i64: 1, 2, 1>}]} {
    %c0_i32 = arith.constant 0 : i32
    %0 = arith.cmpi eq, %arg0, %c0_i32 : i32
    %1 = arith.extui %0 : i1 to i32
    %c0_i32_0 = arith.constant 0 : i32
    %2 = arith.cmpi ne, %1, %c0_i32_0 : i32
    scf.if %2 {
      %c0_36 = arith.constant 0 : index
      %c0_37 = arith.constant 0 : index
      %49 = vector.load %arg1[%c0_36, %c0_37] : memref<2x768xf32, #tpu.memory_space<vmem>>, vector<2x768xf32>
      %50 = arith.truncf %49 : vector<2x768xf32> to vector<2x768xbf16>
      %c0_38 = arith.constant 0 : index
      %c0_39 = arith.constant 0 : index
      %51 = vector.load %arg3[%c0_38, %c0_39] : memref<768x784xi8, #tpu.memory_space<vmem>>, vector<768x784xi8>
      %52 = arith.sitofp %51 : vector<768x784xi8> to vector<768x784xbf16>
      %cst_40 = arith.constant dense<0.000000e+00> : vector<2x784xf32>
      %53 = tpu.matmul %50, %52, %cst_40 {dimension_numbers = #tpu.dot_dimension_numbers<[1], [0], [0], [1], [0, 0, 1, 1], [], []>} : vector<2x768xbf16>, vector<768x784xbf16>, vector<2x784xf32> -> vector<2x784xf32>
      %c0_41 = arith.constant 0 : index
      %c0_42 = arith.constant 0 : index
      %54 = vector.load %arg4[%c0_41, %c0_42] : memref<1x784xf32, #tpu.memory_space<vmem>>, vector<1x784xf32>
      %55 = vector.broadcast %54 : vector<1x784xf32> to vector<2x784xf32>
      %56 = arith.mulf %53, %55 : vector<2x784xf32>
      %c0_43 = arith.constant 0 : index
      %c0_44 = arith.constant 0 : index
      %57 = vector.load %arg5[%c0_43, %c0_44] : memref<1x784xf32, #tpu.memory_space<vmem>>, vector<1x784xf32>
      %58 = vector.broadcast %57 : vector<1x784xf32> to vector<2x784xf32>
      %59 = arith.addf %56, %58 : vector<2x784xf32>
      %cst_45 = arith.constant 0.000000e+00 : f32
      %60 = vector.broadcast %cst_45 : f32 to vector<2x784xf32>
      %61 = arith.maximumf %59, %60 : vector<2x784xf32>
      %62 = arith.truncf %61 : vector<2x784xf32> to vector<2x784xbf16>
      %c0_46 = arith.constant 0 : index
      %c0_47 = arith.constant 0 : index
      %63 = vector.load %arg6[%c0_46, %c0_47] : memref<784x400xi8, #tpu.memory_space<vmem>>, vector<784x400xi8>
      %64 = arith.sitofp %63 : vector<784x400xi8> to vector<784x400xbf16>
      %cst_48 = arith.constant dense<0.000000e+00> : vector<2x400xf32>
      %65 = tpu.matmul %62, %64, %cst_48 {dimension_numbers = #tpu.dot_dimension_numbers<[1], [0], [0], [1], [0, 0, 1, 1], [], []>} : vector<2x784xbf16>, vector<784x400xbf16>, vector<2x400xf32> -> vector<2x400xf32>
      %c0_49 = arith.constant 0 : index
      %c0_50 = arith.constant 0 : index
      %66 = vector.load %arg7[%c0_49, %c0_50] : memref<1x400xf32, #tpu.memory_space<vmem>>, vector<1x400xf32>
      %67 = vector.broadcast %66 : vector<1x400xf32> to vector<2x400xf32>
      %68 = arith.mulf %65, %67 : vector<2x400xf32>
      %c0_51 = arith.constant 0 : index
      %c0_52 = arith.constant 0 : index
      %69 = vector.load %arg8[%c0_51, %c0_52] : memref<1x400xf32, #tpu.memory_space<vmem>>, vector<1x400xf32>
      %70 = vector.broadcast %69 : vector<1x400xf32> to vector<2x400xf32>
      %71 = arith.addf %68, %70 : vector<2x400xf32>
      %cst_53 = arith.constant 0.000000e+00 : f32
      %72 = vector.broadcast %cst_53 : f32 to vector<2x400xf32>
      %73 = arith.maximumf %71, %72 : vector<2x400xf32>
      %74 = arith.truncf %73 : vector<2x400xf32> to vector<2x400xbf16>
      %c0_54 = arith.constant 0 : index
      %c0_55 = arith.constant 0 : index
      %75 = vector.load %arg9[%c0_54, %c0_55] : memref<400x144xbf16, #tpu.memory_space<vmem>>, vector<400x144xbf16>
      %cst_56 = arith.constant dense<0.000000e+00> : vector<2x144xf32>
      %76 = tpu.matmul %74, %75, %cst_56 {dimension_numbers = #tpu.dot_dimension_numbers<[1], [0], [0], [1], [0, 0, 1, 1], [], []>} : vector<2x400xbf16>, vector<400x144xbf16>, vector<2x144xf32> -> vector<2x144xf32>
      %c0_57 = arith.constant 0 : index
      %c0_58 = arith.constant 0 : index
      %77 = vector.load %arg10[%c0_57, %c0_58] : memref<1x144xf32, #tpu.memory_space<vmem>>, vector<1x144xf32>
      %78 = vector.broadcast %77 : vector<1x144xf32> to vector<2x144xf32>
      %79 = arith.addf %76, %78 : vector<2x144xf32>
      %cst_59 = arith.constant 0.000000e+00 : f32
      %80 = vector.broadcast %cst_59 : f32 to vector<2x144xf32>
      %81 = arith.maximumf %79, %80 : vector<2x144xf32>
      %c0_60 = arith.constant 0 : index
      %c0_61 = arith.constant 0 : index
      %82 = vector.load %arg11[%c0_60, %c0_61] : memref<144x32xf32, #tpu.memory_space<vmem>>, vector<144x32xf32>
      %cst_62 = arith.constant dense<0.000000e+00> : vector<2x32xf32>
      %83 = tpu.matmul %81, %82, %cst_62 {dimension_numbers = #tpu.dot_dimension_numbers<[1], [0], [0], [1], [0, 0, 1, 1], [], []>} : vector<2x144xf32>, vector<144x32xf32>, vector<2x32xf32> -> vector<2x32xf32>
      %c0_63 = arith.constant 0 : index
      %c0_64 = arith.constant 0 : index
      %84 = vector.load %arg12[%c0_63, %c0_64] : memref<1x32xf32, #tpu.memory_space<vmem>>, vector<1x32xf32>
      %85 = vector.broadcast %84 : vector<1x32xf32> to vector<2x32xf32>
      %86 = arith.addf %83, %85 : vector<2x32xf32>
      %cst_65 = arith.constant dense<0.000000e+00> : vector<2xf32>
      %87 = vector.multi_reduction <add>, %86, %cst_65 [1] : vector<2x32xf32> to vector<2xf32>
      %88 = vector.shape_cast %87 : vector<2xf32> to vector<2x1xf32>
      %cst_66 = arith.constant 3.200000e+01 : f32
      %89 = vector.broadcast %cst_66 : f32 to vector<2x1xf32>
      %90 = arith.divf %88, %89 : vector<2x1xf32>
      %91 = vector.broadcast %90 : vector<2x1xf32> to vector<2x32xf32>
      %92 = arith.subf %86, %91 : vector<2x32xf32>
      %93 = arith.mulf %92, %92 : vector<2x32xf32>
      %cst_67 = arith.constant dense<0.000000e+00> : vector<2xf32>
      %94 = vector.multi_reduction <add>, %93, %cst_67 [1] : vector<2x32xf32> to vector<2xf32>
      %95 = vector.shape_cast %94 : vector<2xf32> to vector<2x1xf32>
      %cst_68 = arith.constant 3.200000e+01 : f32
      %96 = vector.broadcast %cst_68 : f32 to vector<2x1xf32>
      %97 = arith.divf %95, %96 : vector<2x1xf32>
      %98 = vector.broadcast %90 : vector<2x1xf32> to vector<2x32xf32>
      %99 = arith.subf %86, %98 : vector<2x32xf32>
      %cst_69 = arith.constant 9.99999974E-6 : f32
      %100 = vector.broadcast %cst_69 : f32 to vector<2x1xf32>
      %101 = arith.addf %97, %100 : vector<2x1xf32>
      %102 = math.rsqrt %101 : vector<2x1xf32>
      %103 = vector.broadcast %102 : vector<2x1xf32> to vector<2x32xf32>
      %104 = arith.mulf %99, %103 : vector<2x32xf32>
      %c0_70 = arith.constant 0 : index
      %c0_71 = arith.constant 0 : index
      %105 = vector.load %arg13[%c0_70, %c0_71] : memref<1x32xf32, #tpu.memory_space<vmem>>, vector<1x32xf32>
      %106 = vector.broadcast %105 : vector<1x32xf32> to vector<2x32xf32>
      %107 = arith.mulf %104, %106 : vector<2x32xf32>
      %c0_72 = arith.constant 0 : index
      %c0_73 = arith.constant 0 : index
      %108 = vector.load %arg14[%c0_72, %c0_73] : memref<1x32xf32, #tpu.memory_space<vmem>>, vector<1x32xf32>
      %109 = vector.broadcast %108 : vector<1x32xf32> to vector<2x32xf32>
      %110 = arith.addf %107, %109 : vector<2x32xf32>
      %111 = math.tanh %110 : vector<2x32xf32>
      %c0_74 = arith.constant 0 : index
      %c0_75 = arith.constant 0 : index
      %112 = vector.load %arg24[%c0_74, %c0_75] : memref<2x32xf32, #tpu.memory_space<vmem>>, vector<2x32xf32>
      tpu.vector_store %arg24[%c0_74, %c0_75], %111 {strides = array<i32>} : memref<2x32xf32, #tpu.memory_space<vmem>>, vector<2x32xf32>,
    } else {
    }
    %c0 = arith.constant 0 : index
    %c0_1 = arith.constant 0 : index
    %3 = vector.load %arg24[%c0, %c0_1] : memref<2x32xf32, #tpu.memory_space<vmem>>, vector<2x32xf32>
    %4 = arith.truncf %3 : vector<2x32xf32> to vector<2x32xbf16>
    %c0_2 = arith.constant 0 : index
    %c0_3 = arith.constant 0 : index
    %5 = vector.load %arg2[%c0_2, %c0_3] : memref<2x4xf32, #tpu.memory_space<vmem>>, vector<2x4xf32>
    %6 = arith.truncf %5 : vector<2x4xf32> to vector<2x4xbf16>
    %c0_4 = arith.constant 0 : index
    %c0_5 = arith.constant 0 : index
    %c0_6 = arith.constant 0 : index
    %7 = vector.load %arg15[%c0_4, %c0_5, %c0_6] : memref<1x32x1024xbf16, #tpu.memory_space<vmem>>, vector<1x32x1024xbf16>
    %8 = vector.shape_cast %7 : vector<1x32x1024xbf16> to vector<32x1024xbf16>
    %cst = arith.constant dense<0.000000e+00> : vector<2x1024xf32>
    %9 = tpu.matmul %4, %8, %cst {dimension_numbers = #tpu.dot_dimension_numbers<[1], [0], [0], [1], [0, 0, 1, 1], [], []>} : vector<2x32xbf16>, vector<32x1024xbf16>, vector<2x1024xf32> -> vector<2x1024xf32>
    %c0_7 = arith.constant 0 : index
    %c0_8 = arith.constant 0 : index
    %c0_9 = arith.constant 0 : index
    %10 = vector.load %arg16[%c0_7, %c0_8, %c0_9] : memref<1x4x1024xbf16, #tpu.memory_space<vmem>>, vector<1x4x1024xbf16>
    %11 = vector.shape_cast %10 : vector<1x4x1024xbf16> to vector<4x1024xbf16>
    %cst_10 = arith.constant dense<0.000000e+00> : vector<2x1024xf32>
    %12 = tpu.matmul %6, %11, %cst_10 {dimension_numbers = #tpu.dot_dimension_numbers<[1], [0], [0], [1], [0, 0, 1, 1], [], []>} : vector<2x4xbf16>, vector<4x1024xbf16>, vector<2x1024xf32> -> vector<2x1024xf32>
    %13 = arith.addf %9, %12 : vector<2x1024xf32>
    %c0_11 = arith.constant 0 : index
    %c0_12 = arith.constant 0 : index
    %c0_13 = arith.constant 0 : index
    %14 = vector.load %arg17[%c0_11, %c0_12, %c0_13] : memref<1x1x1024xf32, #tpu.memory_space<vmem>>, vector<1x1x1024xf32>
    %15 = vector.shape_cast %14 : vector<1x1x1024xf32> to vector<1x1024xf32>
    %16 = vector.broadcast %15 : vector<1x1024xf32> to vector<2x1024xf32>
    %17 = arith.addf %13, %16 : vector<2x1024xf32>
    %cst_14 = arith.constant 0.000000e+00 : f32
    %18 = vector.broadcast %cst_14 : f32 to vector<2x1024xf32>
    %19 = arith.maximumf %17, %18 : vector<2x1024xf32>
    %c0_15 = arith.constant 0 : index
    %c0_16 = arith.constant 0 : index
    %c0_17 = arith.constant 0 : index
    %20 = vector.load %arg18[%c0_15, %c0_16, %c0_17] : memref<1x1024x1024xi8, #tpu.memory_space<vmem>>, vector<1x1024x1024xi8>
    %21 = vector.shape_cast %20 : vector<1x1024x1024xi8> to vector<1024x1024xi8>
    %22 = arith.sitofp %21 : vector<1024x1024xi8> to vector<1024x1024xbf16>
    %23 = arith.truncf %19 : vector<2x1024xf32> to vector<2x1024xbf16>
    %cst_18 = arith.constant dense<0.000000e+00> : vector<2x1024xf32>
    %24 = tpu.matmul %23, %22, %cst_18 {dimension_numbers = #tpu.dot_dimension_numbers<[1], [0], [0], [1], [0, 0, 1, 1], [], []>} : vector<2x1024xbf16>, vector<1024x1024xbf16>, vector<2x1024xf32> -> vector<2x1024xf32>
    %c0_19 = arith.constant 0 : index
    %c0_20 = arith.constant 0 : index
    %c0_21 = arith.constant 0 : index
    %25 = vector.load %arg19[%c0_19, %c0_20, %c0_21] : memref<1x1x1024xf32, #tpu.memory_space<vmem>>, vector<1x1x1024xf32>
    %26 = vector.shape_cast %25 : vector<1x1x1024xf32> to vector<1x1024xf32>
    %27 = vector.broadcast %26 : vector<1x1024xf32> to vector<2x1024xf32>
    %28 = arith.mulf %24, %27 : vector<2x1024xf32>
    %c0_22 = arith.constant 0 : index
    %c0_23 = arith.constant 0 : index
    %c0_24 = arith.constant 0 : index
    %29 = vector.load %arg20[%c0_22, %c0_23, %c0_24] : memref<1x1x1024xf32, #tpu.memory_space<vmem>>, vector<1x1x1024xf32>
    %30 = vector.shape_cast %29 : vector<1x1x1024xf32> to vector<1x1024xf32>
    %31 = vector.broadcast %30 : vector<1x1024xf32> to vector<2x1024xf32>
    %32 = arith.addf %28, %31 : vector<2x1024xf32>
    %cst_25 = arith.constant 0.000000e+00 : f32
    %33 = vector.broadcast %cst_25 : f32 to vector<2x1024xf32>
    %34 = arith.maximumf %32, %33 : vector<2x1024xf32>
    %c0_26 = arith.constant 0 : index
    %c0_27 = arith.constant 0 : index
    %c0_28 = arith.constant 0 : index
    %35 = vector.load %arg21[%c0_26, %c0_27, %c0_28] : memref<1x1x1024xbf16, #tpu.memory_space<vmem>>, vector<1x1x1024xbf16>
    %36 = vector.shape_cast %35 : vector<1x1x1024xbf16> to vector<1x1024xbf16>
    %37 = arith.extf %36 : vector<1x1024xbf16> to vector<1x1024xf32>
    %38 = vector.broadcast %37 : vector<1x1024xf32> to vector<2x1024xf32>
    %39 = arith.mulf %34, %38 : vector<2x1024xf32>
    %cst_29 = arith.constant dense<0.000000e+00> : vector<2xf32>
    %40 = vector.multi_reduction <add>, %39, %cst_29 [1] : vector<2x1024xf32> to vector<2xf32>
    %41 = vector.shape_cast %40 : vector<2xf32> to vector<2x1xf32>
    %c0_30 = arith.constant 0 : index
    %c0_31 = arith.constant 0 : index
    %c0_32 = arith.constant 0 : index
    %42 = vector.load %arg22[%c0_30, %c0_31, %c0_32] : memref<1x1x1xf32, #tpu.memory_space<vmem>>, vector<1x1x1xf32>
    %43 = vector.shape_cast %42 : vector<1x1x1xf32> to vector<1x1xf32>
    %44 = vector.broadcast %43 : vector<1x1xf32> to vector<2x1xf32>
    %45 = arith.addf %41, %44 : vector<2x1xf32>
    %c0_33 = arith.constant 0 : index
    %c0_34 = arith.constant 0 : index
    %c0_35 = arith.constant 0 : index
    %46 = vector.load %arg23[%c0_33, %c0_34, %c0_35] : memref<1x2x1xf32, #tpu.memory_space<vmem>>, vector<1x2x1xf32>
    %47 = vector.shape_cast %46 : vector<1x2x1xf32> to vector<2x1xf32>
    %48 = vector.shape_cast %45 : vector<2x1xf32> to vector<1x2x1xf32>
    tpu.vector_store %arg23[%c0_33, %c0_34, %c0_35], %48 {strides = array<i32>} : memref<1x2x1xf32, #tpu.memory_space<vmem>>, vector<1x2x1xf32>,
    return
  }
  func.func @transform_0(%arg0: i32) -> (i32, i32) {
    %c0_i32 = arith.constant 0 : i32
    %c0_i32_0 = arith.constant 0 : i32
    %c0_i32_1 = arith.constant 0 : i32
    return %c0_i32, %c0_i32_0 : i32, i32
  }
  func.func @transform_1(%arg0: i32) -> (i32, i32) {
    %c0_i32 = arith.constant 0 : i32
    %c0_i32_0 = arith.constant 0 : i32
    %c0_i32_1 = arith.constant 0 : i32
    return %c0_i32, %c0_i32_0 : i32, i32
  }
  func.func @transform_2(%arg0: i32) -> (i32, i32) {
    %c0_i32 = arith.constant 0 : i32
    %c0_i32_0 = arith.constant 0 : i32
    %c0_i32_1 = arith.constant 0 : i32
    return %c0_i32, %c0_i32_0 : i32, i32
  }
  func.func @transform_3(%arg0: i32) -> (i32, i32) {
    %c0_i32 = arith.constant 0 : i32
    %c0_i32_0 = arith.constant 0 : i32
    %c0_i32_1 = arith.constant 0 : i32
    return %c0_i32, %c0_i32_0 : i32, i32
  }
  func.func @transform_4(%arg0: i32) -> (i32, i32) {
    %c0_i32 = arith.constant 0 : i32
    %c0_i32_0 = arith.constant 0 : i32
    %c0_i32_1 = arith.constant 0 : i32
    return %c0_i32, %c0_i32_0 : i32, i32
  }
  func.func @transform_5(%arg0: i32) -> (i32, i32) {
    %c0_i32 = arith.constant 0 : i32
    %c0_i32_0 = arith.constant 0 : i32
    %c0_i32_1 = arith.constant 0 : i32
    return %c0_i32, %c0_i32_0 : i32, i32
  }
  func.func @transform_6(%arg0: i32) -> (i32, i32) {
    %c0_i32 = arith.constant 0 : i32
    %c0_i32_0 = arith.constant 0 : i32
    %c0_i32_1 = arith.constant 0 : i32
    return %c0_i32, %c0_i32_0 : i32, i32
  }
  func.func @transform_7(%arg0: i32) -> (i32, i32) {
    %c0_i32 = arith.constant 0 : i32
    %c0_i32_0 = arith.constant 0 : i32
    %c0_i32_1 = arith.constant 0 : i32
    return %c0_i32, %c0_i32_0 : i32, i32
  }
  func.func @transform_8(%arg0: i32) -> (i32, i32) {
    %c0_i32 = arith.constant 0 : i32
    %c0_i32_0 = arith.constant 0 : i32
    %c0_i32_1 = arith.constant 0 : i32
    return %c0_i32, %c0_i32_0 : i32, i32
  }
  func.func @transform_9(%arg0: i32) -> (i32, i32) {
    %c0_i32 = arith.constant 0 : i32
    %c0_i32_0 = arith.constant 0 : i32
    %c0_i32_1 = arith.constant 0 : i32
    return %c0_i32, %c0_i32_0 : i32, i32
  }
  func.func @transform_10(%arg0: i32) -> (i32, i32) {
    %c0_i32 = arith.constant 0 : i32
    %c0_i32_0 = arith.constant 0 : i32
    %c0_i32_1 = arith.constant 0 : i32
    return %c0_i32, %c0_i32_0 : i32, i32
  }
  func.func @transform_11(%arg0: i32) -> (i32, i32) {
    %c0_i32 = arith.constant 0 : i32
    %c0_i32_0 = arith.constant 0 : i32
    %c0_i32_1 = arith.constant 0 : i32
    return %c0_i32, %c0_i32_0 : i32, i32
  }
  func.func @transform_12(%arg0: i32) -> (i32, i32) {
    %c0_i32 = arith.constant 0 : i32
    %c0_i32_0 = arith.constant 0 : i32
    %c0_i32_1 = arith.constant 0 : i32
    return %c0_i32, %c0_i32_0 : i32, i32
  }
  func.func @transform_13(%arg0: i32) -> (i32, i32) {
    %c0_i32 = arith.constant 0 : i32
    %c0_i32_0 = arith.constant 0 : i32
    %c0_i32_1 = arith.constant 0 : i32
    return %c0_i32, %c0_i32_0 : i32, i32
  }
  func.func @transform_14(%arg0: i32) -> (i32, i32, i32) {
    %c0_i32 = arith.constant 0 : i32
    %c0_i32_0 = arith.constant 0 : i32
    %c0_i32_1 = arith.constant 0 : i32
    return %arg0, %c0_i32, %c0_i32_0 : i32, i32, i32
  }
  func.func @transform_15(%arg0: i32) -> (i32, i32, i32) {
    %c0_i32 = arith.constant 0 : i32
    %c0_i32_0 = arith.constant 0 : i32
    %c0_i32_1 = arith.constant 0 : i32
    return %arg0, %c0_i32, %c0_i32_0 : i32, i32, i32
  }
  func.func @transform_16(%arg0: i32) -> (i32, i32, i32) {
    %c0_i32 = arith.constant 0 : i32
    %c0_i32_0 = arith.constant 0 : i32
    %c0_i32_1 = arith.constant 0 : i32
    return %arg0, %c0_i32, %c0_i32_0 : i32, i32, i32
  }
  func.func @transform_17(%arg0: i32) -> (i32, i32, i32) {
    %c0_i32 = arith.constant 0 : i32
    %c0_i32_0 = arith.constant 0 : i32
    %c0_i32_1 = arith.constant 0 : i32
    return %arg0, %c0_i32, %c0_i32_0 : i32, i32, i32
  }
  func.func @transform_18(%arg0: i32) -> (i32, i32, i32) {
    %c0_i32 = arith.constant 0 : i32
    %c0_i32_0 = arith.constant 0 : i32
    %c0_i32_1 = arith.constant 0 : i32
    return %arg0, %c0_i32, %c0_i32_0 : i32, i32, i32
  }
  func.func @transform_19(%arg0: i32) -> (i32, i32, i32) {
    %c0_i32 = arith.constant 0 : i32
    %c0_i32_0 = arith.constant 0 : i32
    %c0_i32_1 = arith.constant 0 : i32
    return %arg0, %c0_i32, %c0_i32_0 : i32, i32, i32
  }
  func.func @transform_20(%arg0: i32) -> (i32, i32, i32) {
    %c0_i32 = arith.constant 0 : i32
    %c0_i32_0 = arith.constant 0 : i32
    %c0_i32_1 = arith.constant 0 : i32
    return %arg0, %c0_i32, %c0_i32_0 : i32, i32, i32
  }
  func.func @transform_21(%arg0: i32) -> (i32, i32, i32) {
    %c0_i32 = arith.constant 0 : i32
    %c0_i32_0 = arith.constant 0 : i32
    %c0_i32_1 = arith.constant 0 : i32
    return %arg0, %c0_i32, %c0_i32_0 : i32, i32, i32
  }
  func.func @transform_22(%arg0: i32) -> (i32, i32, i32) {
    %c0_i32 = arith.constant 0 : i32
    %c0_i32_0 = arith.constant 0 : i32
    %c0_i32_1 = arith.constant 0 : i32
    return %arg0, %c0_i32, %c0_i32_0 : i32, i32, i32
  }
}

</mosaic_0001>

<bundles_post_ra>
// kernel: _critic_forward.1
= control target key start
LH: loop header
LB: loop body
LE: loop exit
PB: predicated region body
PF: predicated region fallthrough
CT: control target
= control target key end

     0   :  { %s9514_s0 = inlined_call_operand.vmem [shape: f32[2,768], index: 0, kind: input, shape index: {}]   ;;  %s9515_s1 = inlined_call_operand.vmem [shape: f32[2,4], index: 1, kind: input, shape index: {}]   ;;  %s9516_s2 = inlined_call_operand.vmem [shape: s8[768,784], index: 2, kind: input, shape index: {}]   ;;  %s9517_s3 = inlined_call_operand.vmem [shape: f32[1,784], index: 3, kind: input, shape index: {}]   ;;  %s9518_s4 = inlined_call_operand.vmem [shape: f32[1,784], index: 4, kind: input, shape index: {}]   ;;  %s9519_s5 = inlined_call_operand.vmem [shape: s8[784,400], index: 5, kind: input, shape index: {}]   ;;  %s9520_s6 = inlined_call_operand.vmem [shape: f32[1,400], index: 6, kind: input, shape index: {}]   ;;  %s9521_s7 = inlined_call_operand.vmem [shape: f32[1,400], index: 7, kind: input, shape index: {}]   ;;  %s9522_s8 = inlined_call_operand.vmem [shape: bf16[400,144], index: 8, kind: input, shape index: {}]   ;;  %s9523_s9 = inlined_call_operand.vmem [shape: f32[1,144], index: 9, kind: input, shape index: {}]   ;;  %s9524_s10 = inlined_call_operand.vmem [shape: f32[144,32], index: 10, kind: input, shape index: {}]   ;;  %s9525_s11 = inlined_call_operand.vmem [shape: f32[1,32], index: 11, kind: input, shape index: {}]   ;;  %s9526_s12 = inlined_call_operand.vmem [shape: f32[1,32], index: 12, kind: input, shape index: {}]   ;;  %s9527_s13 = inlined_call_operand.vmem [shape: f32[1,32], index: 13, kind: input, shape index: {}]   ;;  %s9528_s14 = inlined_call_operand.vmem [shape: bf16[2,32,1024], index: 14, kind: input, shape index: {}]   ;;  %s9529_s15 = inlined_call_operand.vmem [shape: bf16[2,4,1024], index: 15, kind: input, shape index: {}]   ;;  %s9530_s16 = inlined_call_operand.vmem [shape: f32[2,1,1024], index: 16, kind: input, shape index: {}]   ;;  %s9531_s17 = inlined_call_operand.vmem [shape: s8[2,1024,1024], index: 17, kind: input, shape index: {}]   ;;  %s9532_s18 = inlined_call_operand.vmem [shape: f32[2,1,1024], index: 18, kind: input, shape index: {}]   ;;  %s9533_s19 = inlined_call_operand.vmem [shape: f32[2,1,1024], index: 19, kind: input, shape index: {}]   ;;  %s9534_s20 = inlined_call_operand.vmem [shape: bf16[2,1,1024], index: 20, kind: input, shape index: {}]   ;;  %s9535_s21 = inlined_call_operand.vmem [shape: f32[2,1,1], index: 21, kind: input, shape index: {}]   ;;  %s9536_s22 = inlined_call_operand.vmem [shape: f32[2,2,1], index: 22, kind: output, shape index: {}]  }
   0x1   :  { %9547 = sst [smem:[#allocation13_spill]] %s9514_s0 }
   0x2   :  { %9548 = sst [smem:[#allocation14_spill]] %s9515_s1 }
   0x3   :  { %9549 = sst [smem:[#allocation15_spill]] %s9516_s2 }
   0x4   :  { %9550 = sst [smem:[#allocation16_spill]] %s9517_s3  ;;  %s7207_s3 = smov 0  }
   0x5   :  { %9551 = sst [smem:[#allocation17_spill]] %s9518_s4 }
   0x6   :  { %9552 = sst [smem:[#allocation18_spill]] %s9519_s5 }
   0x7   :  { %9553 = sst [smem:[#allocation19_spill]] %s9520_s6 }
   0x8   :  { %9554 = sst [smem:[#allocation20_spill]] %s9525_s11 }
   0x9   :  { %9555 = sst [smem:[#allocation21_spill]] %s9526_s12 }
   0xa   :  { %9556 = sst [smem:[#allocation22_spill]] %s9527_s13 }
   0xb   :  { %9557 = sst [smem:[#allocation23_spill]] %s9528_s14 }
   0xc   :  { %9558 = sst [smem:[#allocation24_spill]] %s9529_s15 }
   0xd LB: > { %9559 = sst [smem:[#allocation3_spill]] %s7085_s3  ;;  %s6484_s28 = sadd.s32 4294967295, %s7085_s3   ;;  %s7085_s3 = sphi %s7207_s3, %s32_s3  }
   0xe   : > { %p6488_p0 = scmp.ge.s32.totalorder %s7085_s3, 1  ;;  %p676_p1 = scmp.lt.s32.totalorder %s7085_s3, 3 }
  0x10   : > { %p677_p2 = pnand %p6488_p0, %p676_p1 }
  0x12   : > { %680 = sbr.rel (%p677_p2) target bundleno = 2758 (0xac6), region = 108 }
  0x19   : > { %p766_p3 = scmp.lt.s32.totalorder %s6484_s28, 1  ;;  %s9560_s14 = sld [smem:[#allocation23_spill]] }
  0x1a   : > { %s9562_s15 = sld [smem:[#allocation24_spill]]  ;;  %p6500_p4 = scmp.ne.s32.totalorder %s6484_s28, 0 }
  0x1b   : > { %s7215_s29 = scalar_select %p766_p3, %s6484_s28, 1 }
  0x1d   : > { %s6786_s30 = sshll.u32 %s7215_s29, 7  ;;  %s6787_s4 = sshll.u32 %s7215_s29, 4 }
  0x1e   : > { %s7230_s25 = sshll.u32 %s7215_s29, 3  ;;  %s6788_s26 = sshll.u32 %s7215_s29, 11 }
  0x1f   : > { %s7222_s1 = scalar_lea.vmem %s9560_s14, %s6786_s30  ;;  %s7240_s30 = scalar_lea.vmem %s9531_s17, %s6788_s26 }
  0x20   : > { %9561 = sst [smem:[#allocation4_spill]] %s7222_s1  ;;  %s7227_s6 = scalar_lea.vmem %s9562_s15, %s6787_s4 }
  0x21   : > { %9563 = sst [smem:[#allocation5_spill]] %s7227_s6  ;;  %s796_s12 = scalar_lea.vmem %s9534_s20, %s7230_s25 }
  0x22   : > { %s6499_s3 = sshll.u32 %s7215_s29, 1  ;;  %808 = sbr.rel (%p6500_p4) target bundleno = 1683 (0x693), region = 112 }
  0x23   : > { %s7262_s0 = scalar_lea.vmem %s9536_s22, %s6499_s3 }
  0x29   : > { %s9564_s14 = sld [smem:[#allocation15_spill]]  ;;  %v817_v30 = vlaneseq  ;;  %v7087_v35 = vmov 1983009808   ;;  %s9565_s11 = sld [smem:[#allocation13_spill]]  ;;  %vm3219_vm0 = vcmask 130048   ;;  %vm4108_vm1 = vcmask 254976  }
  0x2a   : > { %v815_v36 = vunpack.c.l.s4 %v7087_v35  ;;  %s9566_s1 = sld [smem:[#allocation18_spill]]  ;;  %s9576_s6 = sld [smem:[#allocation16_spill]] }
  0x2b   : > { %v7300_v37 = vshrl.u32 %v817_v30, 7  ;;  %s9577_s2 = sld [smem:[#allocation17_spill]]  ;;  %s9585_s26 = sld [smem:[#allocation19_spill]] }
  0x2c   : > { %v816_v40 = vunpack.c.0.s8 %v815_v36  ;;  %s9586_s13 = sld [smem:[#allocation20_spill]]  ;;  %s9587_s5 = sld [smem:[#allocation21_spill]] }
  0x2d   : > { %s9588_s3 = sld [smem:[#allocation22_spill]] }
  0x2e   : > { %v7320_v48 = vsub.s32 %v816_v40, %v7300_v37 }
  0x2f   : > { %v851_v0 = vld [vmem:[%s9564_s14 + $0x8] sm:$0xff]  ;;  %v853_v1 = vld [vmem:[%s9564_s14 + $0x18] sm:$0xff]  ;;  %v850_v2 = vld [vmem:[%s9564_s14] sm:$0xff] }
  0x30   : > { %v1019_v3 = vunpack.c.l.s8.bf16 %v851_v0  ;;  %v1026_v4 = vunpack.c.h.s8.bf16 %v851_v0  ;;  %v1021_v5 = vunpack.c.l.s8.bf16 %v853_v1  ;;  %v1028_v6 = vunpack.c.h.s8.bf16 %v853_v1  ;;  %v852_v7 = vld [vmem:[%s9564_s14 + $0x10] sm:$0xff]  ;;  %v858_v10 = vld [vmem:[%s9564_s14 + $0x40] sm:$0xff]  ;;  %v857_v16 = vld [vmem:[%s9564_s14 + $0x38] sm:$0xff] }
  0x31   : > { %v1018_v8 = vunpack.c.l.s8.bf16 %v850_v2  ;;  %v1020_v9 = vunpack.c.l.s8.bf16 %v852_v7  ;;  %v860_v11 = vld [vmem:[%s9564_s14 + $0x50] sm:$0xff]  ;;  %v1025_v12 = vunpack.c.h.s8.bf16 %v850_v2  ;;  %v1027_v13 = vunpack.c.h.s8.bf16 %v852_v7  ;;  %v859_v17 = vld [vmem:[%s9564_s14 + $0x48] sm:$0xff]  ;;  %v865_v22 = vld [vmem:[%s9564_s14 + $0x78] sm:$0xff] }
  0x32   : > { %1354 = vmatprep.subr.bf16.mxu0 %v1019_v3  ;;  %1477 = vmatprep.subr.bf16.mxu1 %v1021_v5  ;;  %v1033_v14 = vunpack.c.l.s8.bf16 %v858_v10  ;;  %v1035_v15 = vunpack.c.l.s8.bf16 %v860_v11  ;;  %v1032_v18 = vunpack.c.l.s8.bf16 %v857_v16  ;;  %v1034_v19 = vunpack.c.l.s8.bf16 %v859_v17  ;;  %v867_v23 = vld [vmem:[%s9564_s14 + $0x88] sm:$0xff]  ;;  %v864_v28 = vld [vmem:[%s9564_s14 + $0x70] sm:$0xff]  ;;  %v866_v29 = vld [vmem:[%s9564_s14 + $0x80] sm:$0xff] }
  0x33   : > { %1355 = vmatpush1.bf16.msra.mxu0 %v1018_v8  ;;  %1478 = vmatpush1.bf16.msra.mxu1 %v1020_v9  ;;  %v1040_v20 = vunpack.c.h.s8.bf16 %v858_v10  ;;  %v1042_v21 = vunpack.c.h.s8.bf16 %v860_v11  ;;  %v1039_v24 = vunpack.c.h.s8.bf16 %v857_v16  ;;  %v1041_v25 = vunpack.c.h.s8.bf16 %v859_v17  ;;  %v872_v38 = vld [vmem:[%s9564_s14 + $0xb0] sm:$0xff]  ;;  %v874_v39 = vld [vmem:[%s9564_s14 + $0xc0] sm:$0xff]  ;;  %v871_v46 = vld [vmem:[%s9564_s14 + $0xa8] sm:$0xff] }
  0x34   : > { %1356 = vmatprep.subr.bf16.mxu0 %v1026_v4  ;;  %1479 = vmatprep.subr.bf16.mxu1 %v1028_v6  ;;  %v1047_v26 = vunpack.c.l.s8.bf16 %v865_v22  ;;  %v1049_v27 = vunpack.c.l.s8.bf16 %v867_v23  ;;  %v1046_v31 = vunpack.c.l.s8.bf16 %v864_v28  ;;  %v1048_v32 = vunpack.c.l.s8.bf16 %v866_v29  ;;  %v7311_v43 = vld [vmem:[%s9565_s11] sm:$0xff]  ;;  %v873_v47 = vld [vmem:[%s9564_s14 + $0xb8] sm:$0xff]  ;;  %v879_v55 = vld [vmem:[%s9564_s14 + $0xe8] sm:$0xff] }
  0x35   : > { %v1054_v33 = vunpack.c.h.s8.bf16 %v865_v22  ;;  %v1056_v34 = vunpack.c.h.s8.bf16 %v867_v23  ;;  %v1053_v41 = vunpack.c.h.s8.bf16 %v864_v28  ;;  %v1055_v42 = vunpack.c.h.s8.bf16 %v866_v29  ;;  %v881_v56 = vld [vmem:[%s9564_s14 + $0xf8] sm:$0xff]  ;;  %v878_v57 = vld [vmem:[%s9564_s14 + $0xe0] sm:$0xff]  ;;  %v880_v58 = vld [vmem:[%s9564_s14 + $0xf0] sm:$0xff] }
  0x36   : > { %v1061_v44 = vunpack.c.l.s8.bf16 %v872_v38  ;;  %v1063_v45 = vunpack.c.l.s8.bf16 %v874_v39  ;;  %v7324_v49 = vrot.slane %v7311_v43, %v7320_v48  ;;  %v1060_v50 = vunpack.c.l.s8.bf16 %v871_v46  ;;  %v886_v4 = vld [vmem:[%s9564_s14 + $0x120] sm:$0xff]  ;;  %v888_v5 = vld [vmem:[%s9564_s14 + $0x130] sm:$0xff]  ;;  %v885_v6 = vld [vmem:[%s9564_s14 + $0x118] sm:$0xff] }
  0x37   : > { %1357 = vmatpush1.bf16.msra.mxu0 %v1025_v12  ;;  %1480 = vmatpush1.bf16.msra.mxu1 %v1027_v13  ;;  %v1062_v51 = vunpack.c.l.s8.bf16 %v873_v47  ;;  %v1068_v52 = vunpack.c.h.s8.bf16 %v872_v38  ;;  %v1070_v53 = vunpack.c.h.s8.bf16 %v874_v39  ;;  %v1067_v60 = vunpack.c.h.s8.bf16 %v871_v46  ;;  %v887_v7 = vld [vmem:[%s9564_s14 + $0x128] sm:$0xff]  ;;  %v893_v16 = vld [vmem:[%s9564_s14 + $0x158] sm:$0xff]  ;;  %v900_v28 = vld [vmem:[%s9564_s14 + $0x190] sm:$0xff] }
  0x38   : > { %1358 = vmatprep.subr.bf16.mxu0 %v1033_v14  ;;  %1481 = vmatprep.subr.bf16.mxu1 %v1035_v15  ;;  %v828_v54 = vcombine.high %v7324_v49, %v7324_v49  ;;  %v1069_v61 = vunpack.c.h.s8.bf16 %v873_v47  ;;  %v1075_v62 = vunpack.c.l.s8.bf16 %v879_v55  ;;  %v1077_v63 = vunpack.c.l.s8.bf16 %v881_v56  ;;  %v895_v17 = vld [vmem:[%s9564_s14 + $0x168] sm:$0xff]  ;;  %v902_v29 = vld [vmem:[%s9564_s14 + $0x1a0] sm:$0xff]  ;;  %v901_v35 = vld [vmem:[%s9564_s14 + $0x198] sm:$0xff] }
  0x39   : > { %v1074_v0 = vunpack.c.l.s8.bf16 %v878_v57  ;;  %v1076_v1 = vunpack.c.l.s8.bf16 %v880_v58  ;;  %v1082_v2 = vunpack.c.h.s8.bf16 %v879_v55  ;;  %v1084_v3 = vunpack.c.h.s8.bf16 %v881_v56 }
  0x3a   : > { %v7340_v59 = vpack.c.bf16 %v828_v54, %v828_v54  ;;  %v1081_v8 = vunpack.c.h.s8.bf16 %v878_v57  ;;  %v1083_v9 = vunpack.c.h.s8.bf16 %v880_v58  ;;  %v1089_v10 = vunpack.c.l.s8.bf16 %v886_v4  ;;  %v914_v58 = vld [vmem:[%s9564_s14 + $0x200] sm:$0xff] }
  0x3b   : > { %1359 = vmatpush1.bf16.msra.mxu0 %v1032_v18  ;;  %1482 = vmatpush1.bf16.msra.mxu1 %v1034_v19  ;;  %v1091_v11 = vunpack.c.l.s8.bf16 %v888_v5  ;;  %v1088_v12 = vunpack.c.l.s8.bf16 %v885_v6  ;;  %v1090_v13 = vunpack.c.l.s8.bf16 %v887_v7  ;;  %v1096_v14 = vunpack.c.h.s8.bf16 %v886_v4  ;;  %v892_v18 = vld [vmem:[%s9564_s14 + $0x150] sm:$0xff]  ;;  %v894_v19 = vld [vmem:[%s9564_s14 + $0x160] sm:$0xff] }
  0x3c   : > { %1360 = vmatprep.subr.bf16.mxu0 %v1040_v20  ;;  %1483 = vmatprep.subr.bf16.mxu1 %v1042_v21  ;;  %v1098_v15 = vunpack.c.h.s8.bf16 %v888_v5  ;;  %v1095_v20 = vunpack.c.h.s8.bf16 %v885_v6  ;;  %v1097_v21 = vunpack.c.h.s8.bf16 %v887_v7  ;;  %v1103_v22 = vunpack.c.l.s8.bf16 %v893_v16  ;;  %v921_v7 = vld [vmem:[%s9564_s14 + $0x238] sm:$0xff] }
  0x3d   : > { %1386 = vmatprep.mubr.bf16.mxu0 %v7340_v59  ;;  %1509 = vmatprep.mubr.bf16.mxu1 %v7340_v59  ;;  %v1105_v23 = vunpack.c.l.s8.bf16 %v895_v17  ;;  %v1109_v30 = vunpack.c.h.s8.bf16 %v892_v18  ;;  %v813_v36 = vcombine.high %v7311_v43, %v7311_v43  ;;  %v1118_v39 = vunpack.c.l.s8.bf16 %v901_v35 }
  0x3e   : > { %v1124_v40 = vunpack.c.h.s8.bf16 %v900_v28  ;;  %v1125_v46 = vunpack.c.h.s8.bf16 %v901_v35  ;;  %v1152_v5 = vunpack.c.h.s8.bf16 %v914_v58 }
  0x3f   : > { %1361 = vmatpush1.bf16.msra.mxu0 %v1039_v24  ;;  %1484 = vmatpush1.bf16.msra.mxu1 %v1041_v25  ;;  %v1102_v24 = vunpack.c.l.s8.bf16 %v892_v18  ;;  %v1104_v25 = vunpack.c.l.s8.bf16 %v894_v19 }
  0x40   : > { %1362 = vmatprep.subr.bf16.mxu0 %v1047_v26  ;;  %1485 = vmatprep.subr.bf16.mxu1 %v1049_v27  ;;  %v1110_v26 = vunpack.c.h.s8.bf16 %v893_v16  ;;  %v1112_v27 = vunpack.c.h.s8.bf16 %v895_v17  ;;  %v1166_v17 = vunpack.c.h.s8.bf16 %v921_v7 }
  0x43   : > { %1363 = vmatpush1.bf16.msra.mxu0 %v1046_v31  ;;  %1486 = vmatpush1.bf16.msra.mxu1 %v1048_v32  ;;  %v1111_v31 = vunpack.c.h.s8.bf16 %v894_v19  ;;  %v1117_v32 = vunpack.c.l.s8.bf16 %v900_v28  ;;  %v928_v19 = vld [vmem:[%s9564_s14 + $0x270] sm:$0xff] }
  0x44   : > { %1364 = vmatprep.subr.bf16.mxu0 %v1054_v33  ;;  %1487 = vmatprep.subr.bf16.mxu1 %v1056_v34  ;;  %v1119_v33 = vunpack.c.l.s8.bf16 %v902_v29  ;;  %v899_v34 = vld [vmem:[%s9564_s14 + $0x188] sm:$0xff] }
  0x45   : > { %v1116_v38 = vunpack.c.l.s8.bf16 %v899_v34  ;;  %v1123_v43 = vunpack.c.h.s8.bf16 %v899_v34 }
  0x47   : > { %1365 = vmatpush1.bf16.msra.mxu0 %v1053_v41  ;;  %1488 = vmatpush1.bf16.msra.mxu1 %v1055_v42  ;;  %v1126_v41 = vunpack.c.h.s8.bf16 %v902_v29  ;;  %v907_v42 = vld [vmem:[%s9564_s14 + $0x1c8] sm:$0xff]  ;;  %v1180_v29 = vunpack.c.h.s8.bf16 %v928_v19 }
  0x48   : > { %1366 = vmatprep.subr.bf16.mxu0 %v1061_v44  ;;  %1489 = vmatprep.subr.bf16.mxu1 %v1063_v45  ;;  %v909_v44 = vld [vmem:[%s9564_s14 + $0x1d8] sm:$0xff]  ;;  %v7389_v45 = vrot.slane %v813_v36, %v7320_v48  ;;  %v1131_v47 = vunpack.c.l.s8.bf16 %v907_v42  ;;  %v1138_v56 = vunpack.c.h.s8.bf16 %v907_v42 }
  0x49   : > { %v1140_v57 = vunpack.c.h.s8.bf16 %v909_v44 }
  0x4a   : > { %v829_v48 = vcombine.high %v7389_v45, %v7389_v45 }
  0x4b   : > { %1367 = vmatpush1.bf16.msra.mxu0 %v1060_v50  ;;  %1490 = vmatpush1.bf16.msra.mxu1 %v1062_v51  ;;  %v1133_v50 = vunpack.c.l.s8.bf16 %v909_v44  ;;  %v906_v51 = vld [vmem:[%s9564_s14 + $0x1c0] sm:$0xff] }
  0x4c   : > { %1368 = vmatprep.subr.bf16.mxu0 %v1068_v52  ;;  %1491 = vmatprep.subr.bf16.mxu1 %v1070_v53  ;;  %v908_v52 = vld [vmem:[%s9564_s14 + $0x1d0] sm:$0xff]  ;;  %v7401_v53 = vpack.c.bf16 %v7324_v49, %v7324_v49  ;;  %v1130_v54 = vunpack.c.l.s8.bf16 %v906_v51  ;;  %v1137_v49 = vunpack.c.h.s8.bf16 %v906_v51 }
  0x4d   : > { %v1132_v55 = vunpack.c.l.s8.bf16 %v908_v52 }
  0x4f   : > { %1369 = vmatpush1.bf16.msra.mxu0 %v1067_v60  ;;  %1492 = vmatpush1.bf16.msra.mxu1 %v1069_v61  ;;  %v916_v60 = vld [vmem:[%s9564_s14 + $0x210] sm:$0xff]  ;;  %v7409_v61 = vpack.c.bf16 %v829_v48, %v829_v48  ;;  %v941_v48 = vld [vmem:[%s9564_s14 + $0x2d8] sm:$0xff] }
  0x50   : > { %1370 = vmatprep.subr.bf16.mxu0 %v1075_v62  ;;  %1493 = vmatprep.subr.bf16.mxu1 %v1077_v63  ;;  %v1139_v62 = vunpack.c.h.s8.bf16 %v908_v52  ;;  %v1145_v63 = vunpack.c.l.s8.bf16 %v914_v58  ;;  %v1154_v6 = vunpack.c.h.s8.bf16 %v916_v60 }
  0x53   : > { %1371 = vmatpush1.bf16.msra.mxu0 %v1074_v0  ;;  %1494 = vmatpush1.bf16.msra.mxu1 %v1076_v1  ;;  %v1147_v0 = vunpack.c.l.s8.bf16 %v916_v60  ;;  %v913_v1 = vld [vmem:[%s9564_s14 + $0x1f8] sm:$0xff] }
  0x54   : > { %1372 = vmatprep.subr.bf16.mxu0 %v1082_v2  ;;  %1495 = vmatprep.subr.bf16.mxu1 %v1084_v3  ;;  %v915_v2 = vld [vmem:[%s9564_s14 + $0x208] sm:$0xff]  ;;  %v1144_v3 = vunpack.c.l.s8.bf16 %v913_v1  ;;  %v949_v60 = vld [vmem:[%s9564_s14 + $0x318] sm:$0xff] }
  0x55   : > { %v1146_v4 = vunpack.c.l.s8.bf16 %v915_v2 }
  0x57   : > { %1373 = vmatpush1.bf16.msra.mxu0 %v1081_v8  ;;  %1496 = vmatpush1.bf16.msra.mxu1 %v1083_v9  ;;  %v923_v8 = vld [vmem:[%s9564_s14 + $0x248] sm:$0xff]  ;;  %v1151_v9 = vunpack.c.h.s8.bf16 %v913_v1 }
  0x58   : > { %1374 = vmatprep.subr.bf16.mxu0 %v1089_v10  ;;  %1497 = vmatprep.subr.bf16.mxu1 %v1091_v11  ;;  %v1153_v10 = vunpack.c.h.s8.bf16 %v915_v2  ;;  %v1159_v11 = vunpack.c.l.s8.bf16 %v921_v7  ;;  %v1168_v18 = vunpack.c.h.s8.bf16 %v923_v8  ;;  %v948_v2 = vld [vmem:[%s9564_s14 + $0x310] sm:$0xff] }
  0x5b   : > { %1375 = vmatpush1.bf16.msra.mxu0 %v1088_v12  ;;  %1498 = vmatpush1.bf16.msra.mxu1 %v1090_v13  ;;  %v1161_v12 = vunpack.c.l.s8.bf16 %v923_v8  ;;  %v920_v13 = vld [vmem:[%s9564_s14 + $0x230] sm:$0xff] }
  0x5c   : > { %1376 = vmatprep.subr.bf16.mxu0 %v1096_v14  ;;  %1499 = vmatprep.subr.bf16.mxu1 %v1098_v15  ;;  %v922_v14 = vld [vmem:[%s9564_s14 + $0x240] sm:$0xff]  ;;  %v1158_v15 = vunpack.c.l.s8.bf16 %v920_v13  ;;  %v956_v8 = vld [vmem:[%s9564_s14 + $0x350] sm:$0xff] }
  0x5d   : > { %v1160_v16 = vunpack.c.l.s8.bf16 %v922_v14 }
  0x5f   : > { %1377 = vmatpush1.bf16.msra.mxu0 %v1095_v20  ;;  %1500 = vmatpush1.bf16.msra.mxu1 %v1097_v21  ;;  %v930_v20 = vld [vmem:[%s9564_s14 + $0x280] sm:$0xff]  ;;  %v1165_v21 = vunpack.c.h.s8.bf16 %v920_v13 }
  0x60   : > { %1378 = vmatprep.subr.bf16.mxu0 %v1103_v22  ;;  %1501 = vmatprep.subr.bf16.mxu1 %v1105_v23  ;;  %v1167_v22 = vunpack.c.h.s8.bf16 %v922_v14  ;;  %v1173_v23 = vunpack.c.l.s8.bf16 %v928_v19  ;;  %v955_v14 = vld [vmem:[%s9564_s14 + $0x348] sm:$0xff] }
  0x63   : > { %1379 = vmatpush1.bf16.msra.mxu0 %v1102_v24  ;;  %1502 = vmatpush1.bf16.msra.mxu1 %v1104_v25  ;;  %v1175_v24 = vunpack.c.l.s8.bf16 %v930_v20  ;;  %v927_v25 = vld [vmem:[%s9564_s14 + $0x268] sm:$0xff] }
  0x64   : > { %1380 = vmatprep.subr.bf16.mxu0 %v1110_v26  ;;  %1503 = vmatprep.subr.bf16.mxu1 %v1112_v27  ;;  %v929_v26 = vld [vmem:[%s9564_s14 + $0x278] sm:$0xff]  ;;  %v1172_v27 = vunpack.c.l.s8.bf16 %v927_v25 }
  0x65   : > { %v1174_v28 = vunpack.c.l.s8.bf16 %v929_v26  ;;  %v1181_v34 = vunpack.c.h.s8.bf16 %v929_v26 }
  0x67   : > { %1381 = vmatpush1.bf16.msra.mxu0 %v1109_v30  ;;  %1504 = vmatpush1.bf16.msra.mxu1 %v1111_v31  ;;  %v1182_v30 = vunpack.c.h.s8.bf16 %v930_v20  ;;  %v935_v31 = vld [vmem:[%s9564_s14 + $0x2a8] sm:$0xff] }
  0x68   : > { %1382 = vmatprep.subr.bf16.mxu0 %v1117_v32  ;;  %1505 = vmatprep.subr.bf16.mxu1 %v1119_v33  ;;  %v937_v32 = vld [vmem:[%s9564_s14 + $0x2b8] sm:$0xff]  ;;  %v1179_v33 = vunpack.c.h.s8.bf16 %v927_v25  ;;  %v1187_v35 = vunpack.c.l.s8.bf16 %v935_v31  ;;  %v1194_v42 = vunpack.c.h.s8.bf16 %v935_v31  ;;  %v963_v20 = vld [vmem:[%s9564_s14 + $0x388] sm:$0xff] }
  0x69   : > { %v1189_v36 = vunpack.c.l.s8.bf16 %v937_v32  ;;  %v1196_v44 = vunpack.c.h.s8.bf16 %v937_v32  ;;  %v1243_v25 = vunpack.c.l.s8.bf16 %v963_v20 }
  0x6b   : > { %1383 = vmatpush1.bf16.msra.mxu0 %v1116_v38  ;;  %1506 = vmatpush1.bf16.msra.mxu1 %v1118_v39  ;;  %v934_v38 = vld [vmem:[%s9564_s14 + $0x2a0] sm:$0xff]  ;;  %v936_v39 = vld [vmem:[%s9564_s14 + $0x2b0] sm:$0xff] }
  0x6c   : > { %1384 = vmatprep.subr.bf16.mxu0 %v1124_v40  ;;  %1507 = vmatprep.subr.bf16.mxu1 %v1126_v41  ;;  %v1186_v40 = vunpack.c.l.s8.bf16 %v934_v38  ;;  %v1188_v41 = vunpack.c.l.s8.bf16 %v936_v39 }
  0x6f   : > { %1385 = vmatpush1.bf16.msra.mxu0 %v1123_v43  ;;  %1508 = vmatpush1.bf16.msra.mxu1 %v1125_v46  ;;  %v942_v43 = vld [vmem:[%s9564_s14 + $0x2e0] sm:$0xff]  ;;  %v944_v46 = vld [vmem:[%s9564_s14 + $0x2f0] sm:$0xff] }
  0x70   : > { %1395 = vmatprep.subr.bf16.mxu0 %v1131_v47  ;;  %1518 = vmatprep.subr.bf16.mxu1 %v1133_v50  ;;  %v1193_v47 = vunpack.c.h.s8.bf16 %v934_v38  ;;  %v1195_v50 = vunpack.c.h.s8.bf16 %v936_v39  ;;  %v1201_v51 = vunpack.c.l.s8.bf16 %v942_v43  ;;  %v1203_v52 = vunpack.c.l.s8.bf16 %v944_v46 }
  0x71   : > { %v1210_v58 = vunpack.c.h.s8.bf16 %v944_v46 }
  0x72   : > { %1387 = vmatmul.mubr.bf16.vlgmr.msra.gmra.mrb[0].mxu0 %v7401_v53  ;;  %1510 = vmatmul.mubr.bf16.vlgmr.msra.gmra.mrb[0].mxu1 %v7401_v53 }
  0x73   : > { %1396 = vmatpush1.bf16.msra.mxu0 %v1130_v54  ;;  %1519 = vmatpush1.bf16.msra.mxu1 %v1132_v55  ;;  %v943_v54 = vld [vmem:[%s9564_s14 + $0x2e8] sm:$0xff]  ;;  %v1200_v55 = vunpack.c.l.s8.bf16 %v941_v48 }
  0x74   : > { %1397 = vmatprep.subr.bf16.mxu0 %v1138_v56  ;;  %1520 = vmatprep.subr.bf16.mxu1 %v1140_v57  ;;  %v1202_v56 = vunpack.c.l.s8.bf16 %v943_v54  ;;  %v1208_v57 = vunpack.c.h.s8.bf16 %v942_v43 }
  0x75   : > { %1427 = vmatprep.mubr.bf16.mxu0 %v7409_v61  ;;  %1550 = vmatprep.mubr.bf16.mxu1 %v7409_v61 }
  0x77   : > { %1398 = vmatpush1.bf16.msra.mxu0 %v1137_v49  ;;  %1521 = vmatpush1.bf16.msra.mxu1 %v1139_v62  ;;  %v951_v49 = vld [vmem:[%s9564_s14 + $0x328] sm:$0xff]  ;;  %v1207_v62 = vunpack.c.h.s8.bf16 %v941_v48 }
  0x78   : > { %1399 = vmatprep.subr.bf16.mxu0 %v1145_v63  ;;  %1522 = vmatprep.subr.bf16.mxu1 %v1147_v0  ;;  %v1209_v63 = vunpack.c.h.s8.bf16 %v943_v54  ;;  %v1215_v0 = vunpack.c.l.s8.bf16 %v949_v60  ;;  %v1217_v1 = vunpack.c.l.s8.bf16 %v951_v49  ;;  %v1224_v7 = vunpack.c.h.s8.bf16 %v951_v49 }
  0x7b   : > { %1400 = vmatpush1.bf16.msra.mxu0 %v1144_v3  ;;  %1523 = vmatpush1.bf16.msra.mxu1 %v1146_v4  ;;  %v950_v3 = vld [vmem:[%s9564_s14 + $0x320] sm:$0xff]  ;;  %v1214_v4 = vunpack.c.l.s8.bf16 %v948_v2 }
  0x7c   : > { %1401 = vmatprep.subr.bf16.mxu0 %v1152_v5  ;;  %1524 = vmatprep.subr.bf16.mxu1 %v1154_v6  ;;  %v1216_v5 = vunpack.c.l.s8.bf16 %v950_v3  ;;  %v1222_v6 = vunpack.c.h.s8.bf16 %v949_v60 }
  0x7f   : > { %1402 = vmatpush1.bf16.msra.mxu0 %v1151_v9  ;;  %1525 = vmatpush1.bf16.msra.mxu1 %v1153_v10  ;;  %v958_v9 = vld [vmem:[%s9564_s14 + $0x360] sm:$0xff]  ;;  %v1221_v10 = vunpack.c.h.s8.bf16 %v948_v2 }
  0x80   : > { %1403 = vmatprep.subr.bf16.mxu0 %v1159_v11  ;;  %1526 = vmatprep.subr.bf16.mxu1 %v1161_v12  ;;  %v1223_v11 = vunpack.c.h.s8.bf16 %v950_v3  ;;  %v1229_v12 = vunpack.c.l.s8.bf16 %v956_v8  ;;  %v1231_v13 = vunpack.c.l.s8.bf16 %v958_v9  ;;  %v1238_v19 = vunpack.c.h.s8.bf16 %v958_v9 }
  0x83   : > { %1404 = vmatpush1.bf16.msra.mxu0 %v1158_v15  ;;  %1527 = vmatpush1.bf16.msra.mxu1 %v1160_v16  ;;  %v957_v15 = vld [vmem:[%s9564_s14 + $0x358] sm:$0xff]  ;;  %v1228_v16 = vunpack.c.l.s8.bf16 %v955_v14 }
  0x84   : > { %1405 = vmatprep.subr.bf16.mxu0 %v1166_v17  ;;  %1528 = vmatprep.subr.bf16.mxu1 %v1168_v18  ;;  %v1230_v17 = vunpack.c.l.s8.bf16 %v957_v15  ;;  %v1236_v18 = vunpack.c.h.s8.bf16 %v956_v8 }
  0x87   : > { %1406 = vmatpush1.bf16.msra.mxu0 %v1165_v21  ;;  %1529 = vmatpush1.bf16.msra.mxu1 %v1167_v22  ;;  %v965_v21 = vld [vmem:[%s9564_s14 + $0x398] sm:$0xff]  ;;  %v7502_v22 = vld.sshfl [vmem:[%s9565_s11 + $0x8] sm:$0x33 pattern:$0x76325410] }
  0x88   : > { %1407 = vmatprep.subr.bf16.mxu0 %v1173_v23  ;;  %1530 = vmatprep.subr.bf16.mxu1 %v1175_v24  ;;  %v1235_v23 = vunpack.c.h.s8.bf16 %v955_v14  ;;  %v1237_v24 = vunpack.c.h.s8.bf16 %v957_v15  ;;  %v1245_v26 = vunpack.c.l.s8.bf16 %v965_v21 }
  0x8b   : > { %1408 = vmatpush1.bf16.msra.mxu0 %v1172_v27  ;;  %1531 = vmatpush1.bf16.msra.mxu1 %v1174_v28  ;;  %v962_v27 = vld [vmem:[%s9564_s14 + $0x380] sm:$0xff]  ;;  %v964_v28 = vld [vmem:[%s9564_s14 + $0x390] sm:$0xff] }
  0x8c   : > { %1409 = vmatprep.subr.bf16.mxu0 %v1180_v29  ;;  %1532 = vmatprep.subr.bf16.mxu1 %v1182_v30  ;;  %v837_v29 = vcombine.high %v7502_v22, %v7502_v22  ;;  %v7514_v30 = vpack.c.bf16 %v7389_v45, %v7389_v45  ;;  %v1242_v31 = vunpack.c.l.s8.bf16 %v962_v27  ;;  %v1244_v32 = vunpack.c.l.s8.bf16 %v964_v28 }
  0x8d   : > { %v1249_v45 = vunpack.c.h.s8.bf16 %v962_v27  ;;  %v1251_v39 = vunpack.c.h.s8.bf16 %v964_v28 }
  0x8e   : > { %v7522_v38 = vpack.c.bf16 %v837_v29, %v837_v29 }
  0x8f   : > { %1410 = vmatpush1.bf16.msra.mxu0 %v1179_v33  ;;  %1533 = vmatpush1.bf16.msra.mxu1 %v1181_v34  ;;  %v1250_v33 = vunpack.c.h.s8.bf16 %v963_v20  ;;  %v1252_v34 = vunpack.c.h.s8.bf16 %v965_v21 }
  0x90   : > { %1411 = vmatprep.subr.bf16.mxu0 %v1187_v35  ;;  %1534 = vmatprep.subr.bf16.mxu1 %v1189_v36  ;;  %v970_v35 = vld [vmem:[%s9564_s14 + $0x3c0] sm:$0xff]  ;;  %v972_v36 = vld [vmem:[%s9564_s14 + $0x3d0] sm:$0xff] }
  0x93   : > { %1412 = vmatpush1.bf16.msra.mxu0 %v1186_v40  ;;  %1535 = vmatpush1.bf16.msra.mxu1 %v1188_v41  ;;  %v1257_v40 = vunpack.c.l.s8.bf16 %v970_v35  ;;  %v1259_v41 = vunpack.c.l.s8.bf16 %v972_v36 }
  0x94   : > { %1413 = vmatprep.subr.bf16.mxu0 %v1194_v42  ;;  %1536 = vmatprep.subr.bf16.mxu1 %v1196_v44  ;;  %v969_v42 = vld [vmem:[%s9564_s14 + $0x3b8] sm:$0xff]  ;;  %v971_v44 = vld [vmem:[%s9564_s14 + $0x3c8] sm:$0xff] }
  0x95   : > { %v1256_v43 = vunpack.c.l.s8.bf16 %v969_v42  ;;  %v1258_v46 = vunpack.c.l.s8.bf16 %v971_v44  ;;  %v1263_v48 = vunpack.c.h.s8.bf16 %v969_v42  ;;  %v1265_v54 = vunpack.c.h.s8.bf16 %v971_v44 }
  0x97   : > { %1414 = vmatpush1.bf16.msra.mxu0 %v1193_v47  ;;  %1537 = vmatpush1.bf16.msra.mxu1 %v1195_v50  ;;  %v1264_v47 = vunpack.c.h.s8.bf16 %v970_v35  ;;  %v1266_v50 = vunpack.c.h.s8.bf16 %v972_v36 }
  0x98   : > { %1415 = vmatprep.subr.bf16.mxu0 %v1201_v51  ;;  %1538 = vmatprep.subr.bf16.mxu1 %v1203_v52  ;;  %v977_v51 = vld [vmem:[%s9564_s14 + $0x3f8] sm:$0xff]  ;;  %v979_v52 = vld [vmem:[%s9564_s14 + $0x408] sm:$0xff] }
  0x9b   : > { %1416 = vmatpush1.bf16.msra.mxu0 %v1200_v55  ;;  %1539 = vmatpush1.bf16.msra.mxu1 %v1202_v56  ;;  %v1271_v55 = vunpack.c.l.s8.bf16 %v977_v51  ;;  %v1273_v56 = vunpack.c.l.s8.bf16 %v979_v52 }
  0x9c   : > { %1417 = vmatprep.subr.bf16.mxu0 %v1208_v57  ;;  %1540 = vmatprep.subr.bf16.mxu1 %v1210_v58  ;;  %v976_v57 = vld [vmem:[%s9564_s14 + $0x3f0] sm:$0xff]  ;;  %v978_v58 = vld [vmem:[%s9564_s14 + $0x400] sm:$0xff] }
  0x9d   : > { %v1270_v60 = vunpack.c.l.s8.bf16 %v976_v57  ;;  %v1272_v49 = vunpack.c.l.s8.bf16 %v978_v58  ;;  %v1277_v2 = vunpack.c.h.s8.bf16 %v976_v57  ;;  %v1279_v3 = vunpack.c.h.s8.bf16 %v978_v58 }
  0x9f   : > { %1418 = vmatpush1.bf16.msra.mxu0 %v1207_v62  ;;  %1541 = vmatpush1.bf16.msra.mxu1 %v1209_v63  ;;  %v1278_v62 = vunpack.c.h.s8.bf16 %v977_v51  ;;  %v1280_v63 = vunpack.c.h.s8.bf16 %v979_v52 }
  0xa0   : > { %1419 = vmatprep.subr.bf16.mxu0 %v1215_v0  ;;  %1542 = vmatprep.subr.bf16.mxu1 %v1217_v1  ;;  %v984_v0 = vld [vmem:[%s9564_s14 + $0x430] sm:$0xff]  ;;  %v986_v1 = vld [vmem:[%s9564_s14 + $0x440] sm:$0xff] }
  0xa3   : > { %1420 = vmatpush1.bf16.msra.mxu0 %v1214_v4  ;;  %1543 = vmatpush1.bf16.msra.mxu1 %v1216_v5  ;;  %v1285_v4 = vunpack.c.l.s8.bf16 %v984_v0  ;;  %v1287_v5 = vunpack.c.l.s8.bf16 %v986_v1 }
  0xa4   : > { %1421 = vmatprep.subr.bf16.mxu0 %v1222_v6  ;;  %1544 = vmatprep.subr.bf16.mxu1 %v1224_v7  ;;  %v983_v6 = vld [vmem:[%s9564_s14 + $0x428] sm:$0xff]  ;;  %v985_v7 = vld [vmem:[%s9564_s14 + $0x438] sm:$0xff] }
  0xa5   : > { %v1284_v8 = vunpack.c.l.s8.bf16 %v983_v6  ;;  %v1286_v9 = vunpack.c.l.s8.bf16 %v985_v7  ;;  %v1291_v14 = vunpack.c.h.s8.bf16 %v983_v6  ;;  %v1293_v15 = vunpack.c.h.s8.bf16 %v985_v7 }
  0xa7   : > { %1422 = vmatpush1.bf16.msra.mxu0 %v1221_v10  ;;  %1545 = vmatpush1.bf16.msra.mxu1 %v1223_v11  ;;  %v1292_v10 = vunpack.c.h.s8.bf16 %v984_v0  ;;  %v1294_v11 = vunpack.c.h.s8.bf16 %v986_v1 }
  0xa8   : > { %1423 = vmatprep.subr.bf16.mxu0 %v1229_v12  ;;  %1546 = vmatprep.subr.bf16.mxu1 %v1231_v13  ;;  %v991_v12 = vld [vmem:[%s9564_s14 + $0x468] sm:$0xff]  ;;  %v993_v13 = vld [vmem:[%s9564_s14 + $0x478] sm:$0xff] }
  0xab   : > { %1424 = vmatpush1.bf16.msra.mxu0 %v1228_v16  ;;  %1547 = vmatpush1.bf16.msra.mxu1 %v1230_v17  ;;  %v1299_v16 = vunpack.c.l.s8.bf16 %v991_v12  ;;  %v1301_v17 = vunpack.c.l.s8.bf16 %v993_v13 }
  0xac   : > { %1425 = vmatprep.subr.bf16.mxu0 %v1236_v18  ;;  %1548 = vmatprep.subr.bf16.mxu1 %v1238_v19  ;;  %v990_v18 = vld [vmem:[%s9564_s14 + $0x460] sm:$0xff]  ;;  %v992_v19 = vld [vmem:[%s9564_s14 + $0x470] sm:$0xff] }
  0xad   : > { %v1298_v20 = vunpack.c.l.s8.bf16 %v990_v18  ;;  %v1300_v21 = vunpack.c.l.s8.bf16 %v992_v19  ;;  %v1305_v27 = vunpack.c.h.s8.bf16 %v990_v18  ;;  %v1307_v28 = vunpack.c.h.s8.bf16 %v992_v19 }
  0xaf   : > { %1426 = vmatpush1.bf16.msra.mxu0 %v1235_v23  ;;  %1549 = vmatpush1.bf16.msra.mxu1 %v1237_v24  ;;  %v1306_v23 = vunpack.c.h.s8.bf16 %v991_v12  ;;  %v1308_v24 = vunpack.c.h.s8.bf16 %v993_v13 }
  0xb0   : > { %1436 = vmatprep.subr.bf16.mxu0 %v1243_v25  ;;  %1559 = vmatprep.subr.bf16.mxu1 %v1245_v26  ;;  %v998_v25 = vld [vmem:[%s9564_s14 + $0x4a0] sm:$0xff]  ;;  %v1000_v26 = vld [vmem:[%s9564_s14 + $0x4b0] sm:$0xff] }
  0xb1   : > { %v1313_v29 = vunpack.c.l.s8.bf16 %v998_v25  ;;  %v1320_v36 = vunpack.c.h.s8.bf16 %v998_v25 }
  0xb2   : > { %1428 = vmatmul.mubr.bf16.vlgmr.msra.gmra.mrb[0].mxu0 %v7514_v30  ;;  %1551 = vmatmul.mubr.bf16.vlgmr.msra.gmra.mrb[0].mxu1 %v7514_v30 }
  0xb3   : > { %1437 = vmatpush1.bf16.msra.mxu0 %v1242_v31  ;;  %1560 = vmatpush1.bf16.msra.mxu1 %v1244_v32  ;;  %v1315_v31 = vunpack.c.l.s8.bf16 %v1000_v26  ;;  %v997_v32 = vld [vmem:[%s9564_s14 + $0x498] sm:$0xff] }
  0xb4   : > { %1438 = vmatprep.subr.bf16.mxu0 %v1250_v33  ;;  %1561 = vmatprep.subr.bf16.mxu1 %v1252_v34  ;;  %v999_v33 = vld [vmem:[%s9564_s14 + $0x4a8] sm:$0xff]  ;;  %v1312_v34 = vunpack.c.l.s8.bf16 %v997_v32 }
  0xb5   : > { %1468 = vmatprep.mubr.bf16.mxu0 %v7522_v38  ;;  %1591 = vmatprep.mubr.bf16.mxu1 %v7522_v38  ;;  %v1314_v35 = vunpack.c.l.s8.bf16 %v999_v33  ;;  %v1321_v42 = vunpack.c.h.s8.bf16 %v999_v33  ;;  %v868_v33 = vld [vmem:[%s9564_s14 + $0x90] sm:$0xff] }
  0xb7   : > { %1439 = vmatpush1.bf16.msra.mxu0 %v1249_v45  ;;  %1562 = vmatpush1.bf16.msra.mxu1 %v1251_v39  ;;  %v1322_v45 = vunpack.c.h.s8.bf16 %v1000_v26  ;;  %v1005_v39 = vld [vmem:[%s9564_s14 + $0x4d8] sm:$0xff] }
  0xb8   : > { %1440 = vmatprep.subr.bf16.mxu0 %v1257_v40  ;;  %1563 = vmatprep.subr.bf16.mxu1 %v1259_v41  ;;  %v1007_v40 = vld [vmem:[%s9564_s14 + $0x4e8] sm:$0xff]  ;;  %v1319_v41 = vunpack.c.h.s8.bf16 %v997_v32  ;;  %v1327_v44 = vunpack.c.l.s8.bf16 %v1005_v39  ;;  %v1334_v52 = vunpack.c.h.s8.bf16 %v1005_v39 }
  0xbb   : > { %1441 = vmatpush1.bf16.msra.mxu0 %v1256_v43  ;;  %1564 = vmatpush1.bf16.msra.mxu1 %v1258_v46  ;;  %v1329_v43 = vunpack.c.l.s8.bf16 %v1007_v40  ;;  %v1004_v46 = vld [vmem:[%s9564_s14 + $0x4d0] sm:$0xff] }
  0xbc   : > { %1442 = vmatprep.subr.bf16.mxu0 %v1264_v47  ;;  %1565 = vmatprep.subr.bf16.mxu1 %v1266_v50  ;;  %v1006_v47 = vld [vmem:[%s9564_s14 + $0x4e0] sm:$0xff]  ;;  %v1326_v50 = vunpack.c.l.s8.bf16 %v1004_v46 }
  0xbd   : > { %v1328_v51 = vunpack.c.l.s8.bf16 %v1006_v47  ;;  %v1335_v57 = vunpack.c.h.s8.bf16 %v1006_v47  ;;  %v875_v47 = vld [vmem:[%s9564_s14 + $0xc8] sm:$0xff] }
  0xbf   : > { %1443 = vmatpush1.bf16.msra.mxu0 %v1263_v48  ;;  %1566 = vmatpush1.bf16.msra.mxu1 %v1265_v54  ;;  %v1336_v48 = vunpack.c.h.s8.bf16 %v1007_v40  ;;  %v1012_v54 = vld [vmem:[%s9564_s14 + $0x510] sm:$0xff] }
  0xc0   : > { %1444 = vmatprep.subr.bf16.mxu0 %v1271_v55  ;;  %1567 = vmatprep.subr.bf16.mxu1 %v1273_v56  ;;  %v1014_v55 = vld [vmem:[%s9564_s14 + $0x520] sm:$0xff]  ;;  %v1333_v56 = vunpack.c.h.s8.bf16 %v1004_v46  ;;  %v1341_v58 = vunpack.c.l.s8.bf16 %v1012_v54  ;;  %v1348_v1 = vunpack.c.h.s8.bf16 %v1012_v54 }
  0xc3   : > { %1445 = vmatpush1.bf16.msra.mxu0 %v1270_v60  ;;  %1568 = vmatpush1.bf16.msra.mxu1 %v1272_v49  ;;  %v1343_v60 = vunpack.c.l.s8.bf16 %v1014_v55  ;;  %v1011_v49 = vld [vmem:[%s9564_s14 + $0x508] sm:$0xff] }
  0xc4   : > { %1446 = vmatprep.subr.bf16.mxu0 %v1278_v62  ;;  %1569 = vmatprep.subr.bf16.mxu1 %v1280_v63  ;;  %v1013_v62 = vld [vmem:[%s9564_s14 + $0x518] sm:$0xff]  ;;  %v1340_v63 = vunpack.c.l.s8.bf16 %v1011_v49 }
  0xc5   : > { %v1342_v0 = vunpack.c.l.s8.bf16 %v1013_v62  ;;  %v1349_v6 = vunpack.c.h.s8.bf16 %v1013_v62  ;;  %v882_v62 = vld [vmem:[%s9564_s14 + $0x100] sm:$0xff] }
  0xc7   : > { %1447 = vmatpush1.bf16.msra.mxu0 %v1277_v2  ;;  %1570 = vmatpush1.bf16.msra.mxu1 %v1279_v3  ;;  %v1350_v2 = vunpack.c.h.s8.bf16 %v1014_v55  ;;  %v855_v3 = vld [vmem:[%s9564_s14 + $0x28] sm:$0xff] }
  0xc8   : > { %1448 = vmatprep.subr.bf16.mxu0 %v1285_v4  ;;  %1571 = vmatprep.subr.bf16.mxu1 %v1287_v5  ;;  %v884_v4 = vld [vmem:[%s9564_s14 + $0x110] sm:$0xff]  ;;  %v1347_v5 = vunpack.c.h.s8.bf16 %v1011_v49  ;;  %v1023_v7 = vunpack.c.l.s8.bf16 %v855_v3 }
  0xcb   : > { %1449 = vmatpush1.bf16.msra.mxu0 %v1284_v8  ;;  %1572 = vmatpush1.bf16.msra.mxu1 %v1286_v9  ;;  %v854_v8 = vld [vmem:[%s9564_s14 + $0x20] sm:$0xff]  ;;  %v1080_v9 = vunpack.c.l.s8.bf16 %v884_v4 }
  0xcc   : > { %1450 = vmatprep.subr.bf16.mxu0 %v1292_v10  ;;  %1573 = vmatprep.subr.bf16.mxu1 %v1294_v11  ;;  %v856_v10 = vld [vmem:[%s9564_s14 + $0x30] sm:$0xff]  ;;  %v7620_v11 = vpack.c.bf16 %v7502_v22, %v7502_v22  ;;  %v1022_v12 = vunpack.c.l.s8.bf16 %v854_v8  ;;  %v1029_v22 = vunpack.c.h.s8.bf16 %v854_v8 }
  0xcd   : > { %v1024_v13 = vunpack.c.l.s8.bf16 %v856_v10  ;;  %v1031_v18 = vunpack.c.h.s8.bf16 %v856_v10  ;;  %v889_v10 = vld [vmem:[%s9564_s14 + $0x138] sm:$0xff] }
  0xcf   : > { %1451 = vmatpush1.bf16.msra.mxu0 %v1291_v14  ;;  %1574 = vmatpush1.bf16.msra.mxu1 %v1293_v15  ;;  %v1030_v14 = vunpack.c.h.s8.bf16 %v855_v3  ;;  %v1087_v15 = vunpack.c.h.s8.bf16 %v884_v4 }
  0xd0   : > { %1452 = vmatprep.subr.bf16.mxu0 %v1299_v16  ;;  %1575 = vmatprep.subr.bf16.mxu1 %v1301_v17  ;;  %v862_v16 = vld [vmem:[%s9564_s14 + $0x60] sm:$0xff]  ;;  %v891_v17 = vld [vmem:[%s9564_s14 + $0x148] sm:$0xff] }
  0xd1   : > { %v1037_v19 = vunpack.c.l.s8.bf16 %v862_v16  ;;  %v1044_v26 = vunpack.c.h.s8.bf16 %v862_v16 }
  0xd3   : > { %1453 = vmatpush1.bf16.msra.mxu0 %v1298_v20  ;;  %1576 = vmatpush1.bf16.msra.mxu1 %v1300_v21  ;;  %v861_v20 = vld [vmem:[%s9564_s14 + $0x58] sm:$0xff]  ;;  %v1094_v21 = vunpack.c.l.s8.bf16 %v891_v17 }
  0xd4   : > { %1454 = vmatprep.subr.bf16.mxu0 %v1306_v23  ;;  %1577 = vmatprep.subr.bf16.mxu1 %v1308_v24  ;;  %v863_v23 = vld [vmem:[%s9564_s14 + $0x68] sm:$0xff]  ;;  %v1036_v24 = vunpack.c.l.s8.bf16 %v861_v20 }
  0xd5   : > { %v1038_v25 = vunpack.c.l.s8.bf16 %v863_v23 }
  0xd7   : > { %1455 = vmatpush1.bf16.msra.mxu0 %v1305_v27  ;;  %1578 = vmatpush1.bf16.msra.mxu1 %v1307_v28  ;;  %v1101_v27 = vunpack.c.h.s8.bf16 %v891_v17  ;;  %v869_v28 = vld [vmem:[%s9564_s14 + $0x98] sm:$0xff] }
  0xd8   : > { %1456 = vmatprep.subr.bf16.mxu0 %v1313_v29  ;;  %1579 = vmatprep.subr.bf16.mxu1 %v1315_v31  ;;  %v898_v29 = vld [vmem:[%s9564_s14 + $0x180] sm:$0xff]  ;;  %v1043_v31 = vunpack.c.h.s8.bf16 %v861_v20  ;;  %v1051_v32 = vunpack.c.l.s8.bf16 %v869_v28  ;;  %v1058_v39 = vunpack.c.h.s8.bf16 %v869_v28 }
  0xd9   : > { %v1115_v40 = vunpack.c.h.s8.bf16 %v898_v29 }
  0xdb   : > { %1457 = vmatpush1.bf16.msra.mxu0 %v1312_v34  ;;  %1580 = vmatpush1.bf16.msra.mxu1 %v1314_v35  ;;  %v1108_v34 = vunpack.c.l.s8.bf16 %v898_v29  ;;  %v870_v35 = vld [vmem:[%s9564_s14 + $0xa0] sm:$0xff] }
  0xdc   : > { %1458 = vmatprep.subr.bf16.mxu0 %v1320_v36  ;;  %1581 = vmatprep.subr.bf16.mxu1 %v1322_v45  ;;  %v1050_v36 = vunpack.c.l.s8.bf16 %v868_v33  ;;  %v1052_v45 = vunpack.c.l.s8.bf16 %v870_v35 }
  0xdf   : > { %1459 = vmatpush1.bf16.msra.mxu0 %v1319_v41  ;;  %1582 = vmatpush1.bf16.msra.mxu1 %v1321_v42  ;;  %v876_v41 = vld [vmem:[%s9564_s14 + $0xd0] sm:$0xff]  ;;  %v905_v42 = vld [vmem:[%s9564_s14 + $0x1b8] sm:$0xff] }
  0xe0   : > { %1460 = vmatprep.subr.bf16.mxu0 %v1327_v44  ;;  %1583 = vmatprep.subr.bf16.mxu1 %v1329_v43  ;;  %v1057_v44 = vunpack.c.h.s8.bf16 %v868_v33  ;;  %v1059_v43 = vunpack.c.h.s8.bf16 %v870_v35  ;;  %v1065_v46 = vunpack.c.l.s8.bf16 %v876_v41  ;;  %v1072_v54 = vunpack.c.h.s8.bf16 %v876_v41  ;;  %v903_v35 = vld [vmem:[%s9564_s14 + $0x1a8] sm:$0xff] }
  0xe1   : > { %v1129_v55 = vunpack.c.h.s8.bf16 %v905_v42 }
  0xe3   : > { %1461 = vmatpush1.bf16.msra.mxu0 %v1326_v50  ;;  %1584 = vmatpush1.bf16.msra.mxu1 %v1328_v51  ;;  %v1122_v50 = vunpack.c.l.s8.bf16 %v905_v42  ;;  %v877_v51 = vld [vmem:[%s9564_s14 + $0xd8] sm:$0xff] }
  0xe4   : > { %1462 = vmatprep.subr.bf16.mxu0 %v1334_v52  ;;  %1585 = vmatprep.subr.bf16.mxu1 %v1336_v48  ;;  %v1064_v52 = vunpack.c.l.s8.bf16 %v875_v47  ;;  %v1066_v48 = vunpack.c.l.s8.bf16 %v877_v51 }
  0xe7   : > { %1463 = vmatpush1.bf16.msra.mxu0 %v1333_v56  ;;  %1586 = vmatpush1.bf16.msra.mxu1 %v1335_v57  ;;  %v883_v56 = vld [vmem:[%s9564_s14 + $0x108] sm:$0xff]  ;;  %v940_v57 = vld [vmem:[%s9564_s14 + $0x2d0] sm:$0xff] }
  0xe8   : > { %1464 = vmatprep.subr.bf16.mxu0 %v1341_v58  ;;  %1587 = vmatprep.subr.bf16.mxu1 %v1343_v60  ;;  %v1071_v58 = vunpack.c.h.s8.bf16 %v875_v47  ;;  %v1073_v60 = vunpack.c.h.s8.bf16 %v877_v51  ;;  %v1079_v49 = vunpack.c.l.s8.bf16 %v883_v56  ;;  %v1086_v3 = vunpack.c.h.s8.bf16 %v883_v56  ;;  %v910_v51 = vld [vmem:[%s9564_s14 + $0x1e0] sm:$0xff] }
  0xe9   : > { %v1199_v4 = vunpack.c.h.s8.bf16 %v940_v57 }
  0xeb   : > { %1465 = vmatpush1.bf16.msra.mxu0 %v1340_v63  ;;  %1588 = vmatpush1.bf16.msra.mxu1 %v1342_v0  ;;  %v1192_v63 = vunpack.c.l.s8.bf16 %v940_v57  ;;  %v912_v0 = vld [vmem:[%s9564_s14 + $0x1f0] sm:$0xff] }
  0xec   : > { %1466 = vmatprep.subr.bf16.mxu0 %v1348_v1  ;;  %1589 = vmatprep.subr.bf16.mxu1 %v1350_v2  ;;  %v1078_v1 = vunpack.c.l.s8.bf16 %v882_v62  ;;  %v1136_v2 = vunpack.c.l.s8.bf16 %v912_v0  ;;  %v1143_v8 = vunpack.c.h.s8.bf16 %v912_v0 }
  0xef   : > { %1467 = vmatpush1.bf16.msra.mxu0 %v1347_v5  ;;  %1590 = vmatpush1.bf16.msra.mxu1 %v1349_v6  ;;  %v890_v5 = vld [vmem:[%s9564_s14 + $0x140] sm:$0xff]  ;;  %v947_v6 = vld [vmem:[%s9564_s14 + $0x308] sm:$0xff] }
  0xf0   : > { %1600 = vmatprep.subr.bf16.mxu0 %v1023_v7  ;;  %6789 = vmatprep.subr.bf16.mxu1 %v1080_v9  ;;  %v1085_v7 = vunpack.c.h.s8.bf16 %v882_v62  ;;  %v1093_v9 = vunpack.c.l.s8.bf16 %v890_v5  ;;  %v1100_v16 = vunpack.c.h.s8.bf16 %v890_v5  ;;  %v1213_v17 = vunpack.c.h.s8.bf16 %v947_v6  ;;  %v918_v62 = vld [vmem:[%s9564_s14 + $0x220] sm:$0xff] }
  0xf2   : > { %1469 = vmatmul.mubr.bf16.vlgmr.msra.gmra.mrb[0].mxu0 %v7620_v11  ;;  %1592 = vmatmul.mubr.bf16.vlgmr.msra.gmra.mrb[0].mxu1 %v7620_v11 }
  0xf3   : > { %1601 = vmatpush1.bf16.msra.mxu0 %v1022_v12  ;;  %6790 = vmatpush3.bf16.msra.mxu1 %v1024_v13  ;;  %v1206_v12 = vunpack.c.l.s8.bf16 %v947_v6  ;;  %v919_v13 = vld [vmem:[%s9564_s14 + $0x228] sm:$0xff] }
  0xf4   : > { %1602 = vmatprep.subr.bf16.mxu0 %v1030_v14  ;;  %6791 = vmatprep.subr.bf16.mxu1 %v1087_v15  ;;  %v1092_v14 = vunpack.c.l.s8.bf16 %v889_v10  ;;  %v1150_v15 = vunpack.c.l.s8.bf16 %v919_v13  ;;  %v1157_v20 = vunpack.c.h.s8.bf16 %v919_v13 }
  0xf5   : > { %1632 = vmatprep.mubr.bf16.mxu0 %v7340_v59  ;;  %1755 = vmatprep.mubr.bf16.mxu1 %v7340_v59  ;;  %v1045_v59 = vunpack.c.h.s8.bf16 %v863_v23  ;;  %v896_v23 = vld [vmem:[%s9564_s14 + $0x170] sm:$0xff] }
  0xf7   : > { %1603 = vmatpush1.bf16.msra.mxu0 %v1029_v22  ;;  %6792 = vmatpush3.bf16.msra.mxu1 %v1031_v18  ;;  %v897_v22 = vld [vmem:[%s9564_s14 + $0x178] sm:$0xff]  ;;  %v954_v18 = vld [vmem:[%s9564_s14 + $0x340] sm:$0xff] }
  0xf8   : > { %1604 = vmatprep.subr.bf16.mxu0 %v1037_v19  ;;  %6793 = vmatprep.subr.bf16.mxu1 %v1094_v21  ;;  %v1099_v19 = vunpack.c.h.s8.bf16 %v889_v10  ;;  %v1107_v21 = vunpack.c.l.s8.bf16 %v897_v22  ;;  %v1114_v28 = vunpack.c.h.s8.bf16 %v897_v22  ;;  %v1227_v29 = vunpack.c.h.s8.bf16 %v954_v18  ;;  %v917_v10 = vld [vmem:[%s9564_s14 + $0x218] sm:$0xff] }
  0xfb   : > { %1605 = vmatpush1.bf16.msra.mxu0 %v1036_v24  ;;  %6794 = vmatpush3.bf16.msra.mxu1 %v1038_v25  ;;  %v1220_v24 = vunpack.c.l.s8.bf16 %v954_v18  ;;  %v926_v25 = vld [vmem:[%s9564_s14 + $0x260] sm:$0xff]  ;;  %v1148_v18 = vunpack.c.l.s8.bf16 %v917_v10 }
  0xfc   : > { %1606 = vmatprep.subr.bf16.mxu0 %v1044_v26  ;;  %6795 = vmatprep.subr.bf16.mxu1 %v1101_v27  ;;  %v1106_v26 = vunpack.c.l.s8.bf16 %v896_v23  ;;  %v1164_v27 = vunpack.c.l.s8.bf16 %v926_v25  ;;  %v1171_v33 = vunpack.c.h.s8.bf16 %v926_v25  ;;  %v1010_v25 = vld [vmem:[%s9564_s14 + $0x500] sm:$0xff] }
  0xff   : > { %1607 = vmatpush1.bf16.msra.mxu0 %v1043_v31  ;;  %6796 = vmatpush3.bf16.msra.mxu1 %v1045_v59  ;;  %v904_v31 = vld [vmem:[%s9564_s14 + $0x1b0] sm:$0xff]  ;;  %v961_v59 = vld [vmem:[%s9564_s14 + $0x378] sm:$0xff] }
 0x100   : > { %1608 = vmatprep.subr.bf16.mxu0 %v1051_v32  ;;  %6797 = vmatprep.subr.bf16.mxu1 %v1108_v34  ;;  %v1113_v32 = vunpack.c.h.s8.bf16 %v896_v23  ;;  %v1121_v34 = vunpack.c.l.s8.bf16 %v904_v31  ;;  %v1128_v41 = vunpack.c.h.s8.bf16 %v904_v31  ;;  %v1241_v42 = vunpack.c.h.s8.bf16 %v961_v59 }
 0x101   : > { %v1155_v31 = vunpack.c.h.s8.bf16 %v917_v10  ;;  %v7868_v10 = vld [vmem:[%s9566_s1 + $0x68] sm:$0xff] }
 0x103   : > { %1609 = vmatpush1.bf16.msra.mxu0 %v1050_v36  ;;  %6798 = vmatpush3.bf16.msra.mxu1 %v1052_v45  ;;  %v1234_v36 = vunpack.c.l.s8.bf16 %v961_v59  ;;  %v933_v45 = vld [vmem:[%s9564_s14 + $0x298] sm:$0xff] }
 0x104   : > { %1610 = vmatprep.subr.bf16.mxu0 %v1058_v39  ;;  %6799 = vmatprep.subr.bf16.mxu1 %v1115_v40  ;;  %v1120_v39 = vunpack.c.l.s8.bf16 %v903_v35  ;;  %v1178_v40 = vunpack.c.l.s8.bf16 %v933_v45  ;;  %v1185_v47 = vunpack.c.h.s8.bf16 %v933_v45 }
 0x107   : > { %1611 = vmatpush1.bf16.msra.mxu0 %v1057_v44  ;;  %6800 = vmatpush3.bf16.msra.mxu1 %v1059_v43  ;;  %v911_v44 = vld [vmem:[%s9564_s14 + $0x1e8] sm:$0xff]  ;;  %v996_v43 = vld [vmem:[%s9564_s14 + $0x490] sm:$0xff] }
 0x108   : > { %1612 = vmatprep.subr.bf16.mxu0 %v1065_v46  ;;  %6801 = vmatprep.subr.bf16.mxu1 %v1122_v50  ;;  %v1127_v46 = vunpack.c.h.s8.bf16 %v903_v35  ;;  %v1135_v50 = vunpack.c.l.s8.bf16 %v911_v44  ;;  %v982_v35 = vld [vmem:[%s9564_s14 + $0x420] sm:$0xff] }
 0x10b   : > { %1613 = vmatpush1.bf16.msra.mxu0 %v1064_v52  ;;  %6802 = vmatpush3.bf16.msra.mxu1 %v1066_v48  ;;  %v1304_v52 = vunpack.c.l.s8.bf16 %v996_v43  ;;  %v968_v48 = vld [vmem:[%s9564_s14 + $0x3b0] sm:$0xff] }
 0x10c   : > { %1614 = vmatprep.subr.bf16.mxu0 %v1072_v54  ;;  %6803 = vmatprep.subr.bf16.mxu1 %v1129_v55  ;;  %v7727_v54 = vld [vmem:[%s9566_s1] sm:$0xff]  ;;  %v7732_v55 = vld [vmem:[%s9566_s1 + $0x8] sm:$0xff] }
 0x10d   : > { %v2044_v56 = vunpack.c.h.s8.bf16 %v7727_v54  ;;  %v2046_v57 = vunpack.c.h.s8.bf16 %v7732_v55 }
 0x10f   : > { %1615 = vmatpush1.bf16.msra.mxu0 %v1071_v58  ;;  %6804 = vmatpush3.bf16.msra.mxu1 %v1073_v60  ;;  %v1134_v58 = vunpack.c.l.s8.bf16 %v910_v51  ;;  %v1248_v60 = vunpack.c.l.s8.bf16 %v968_v48  ;;  %v7739_v0 = vcombine.high %v2044_v56, %v2046_v57 }
 0x110   : > { %1616 = vmatprep.subr.bf16.mxu0 %v1079_v49  ;;  %6811 = vmatprep.subr.bf16.mxu1 %v1192_v63  ;;  %v1142_v49 = vunpack.c.h.s8.bf16 %v911_v44  ;;  %v1311_v63 = vunpack.c.h.s8.bf16 %v996_v43  ;;  %v1276_v43 = vunpack.c.l.s8.bf16 %v982_v35 }
 0x112   : > { %1756 = vmatmul.mubr.bf16.vlgmr.msra.gmra.mrb[4].mxu1 %v7401_v53 }
 0x113   : > { %1617 = vmatpush1.bf16.msra.mxu0 %v1078_v1  ;;  %6812 = vmatpush3.bf16.msra.mxu1 %v1136_v2  ;;  %v1003_v1 = vld [vmem:[%s9564_s14 + $0x4c8] sm:$0xff]  ;;  %v7747_v2 = vld [vmem:[%s9566_s1 + $0x10] sm:$0xff] }
 0x114   : > { %1618 = vmatprep.subr.bf16.mxu0 %v1086_v3  ;;  %6813 = vmatprep.subr.bf16.mxu1 %v1199_v4  ;;  %v7752_v3 = vld [vmem:[%s9566_s1 + $0x18] sm:$0xff]  ;;  %v7754_v4 = vcombine.low %v2044_v56, %v2046_v57  ;;  %v2048_v5 = vunpack.c.h.s8.bf16 %v7747_v2  ;;  %v7841_v56 = vld [vmem:[%s9566_s1 + $0x50] sm:$0xff] }
 0x115   : > { %1795 = vmatprep.mubr.bf16.mxu1 %v7409_v61  ;;  %v2050_v6 = vunpack.c.h.s8.bf16 %v7752_v3  ;;  %v7846_v57 = vld [vmem:[%s9566_s1 + $0x58] sm:$0xff] }
 0x117   : > { %1619 = vmatpush1.bf16.msra.mxu0 %v1085_v7  ;;  %6814 = vmatpush3.bf16.msra.mxu1 %v1143_v8  ;;  %v1141_v7 = vunpack.c.h.s8.bf16 %v910_v51  ;;  %v1255_v8 = vunpack.c.h.s8.bf16 %v968_v48  ;;  %v7766_v13 = vcombine.high %v2048_v5, %v2050_v6  ;;  %v1017_v48 = vld [vmem:[%s9564_s14 + $0x538] sm:$0xff] }
 0x118   : > { %1620 = vmatprep.subr.bf16.mxu0 %v1093_v9  ;;  %6815 = vmatprep.subr.bf16.mxu1 %v1206_v12  ;;  %v1149_v9 = vunpack.c.l.s8.bf16 %v918_v62  ;;  %v1318_v12 = vunpack.c.l.s8.bf16 %v1003_v1 }
 0x11b   : > { %1621 = vmatpush1.bf16.msra.mxu0 %v1092_v14  ;;  %6816 = vmatpush3.bf16.msra.mxu1 %v1150_v15  ;;  %v7768_v14 = vcombine.low %v2048_v5, %v2050_v6  ;;  %v7775_v15 = vld [vmem:[%s9566_s1 + $0x20] sm:$0xff]  ;;  %v1346_v5 = vunpack.c.l.s8.bf16 %v1017_v48  ;;  %v989_v6 = vld [vmem:[%s9564_s14 + $0x458] sm:$0xff] }
 0x11c   : > { %1622 = vmatprep.subr.bf16.mxu0 %v1100_v16  ;;  %6817 = vmatprep.subr.bf16.mxu1 %v1213_v17  ;;  %v7780_v16 = vld [vmem:[%s9566_s1 + $0x28] sm:$0xff]  ;;  %v2052_v17 = vunpack.c.h.s8.bf16 %v7775_v15 }
 0x11d   : > { %v2054_v22 = vunpack.c.h.s8.bf16 %v7780_v16 }
 0x11f   : > { %1623 = vmatpush1.bf16.msra.mxu0 %v1099_v19  ;;  %6818 = vmatpush3.bf16.msra.mxu1 %v1157_v20  ;;  %v1156_v19 = vunpack.c.h.s8.bf16 %v918_v62  ;;  %v925_v20 = vld [vmem:[%s9564_s14 + $0x258] sm:$0xff]  ;;  %v7787_v23 = vcombine.high %v2052_v17, %v2054_v22  ;;  %v2066_v62 = vunpack.c.h.s8.bf16 %v7846_v57 }
 0x120   : > { %1624 = vmatprep.subr.bf16.mxu0 %v1107_v21  ;;  %6819 = vmatprep.subr.bf16.mxu1 %v1220_v24  ;;  %v1325_v21 = vunpack.c.h.s8.bf16 %v1003_v1  ;;  %v7789_v24 = vcombine.low %v2052_v17, %v2054_v22  ;;  %v931_v1 = vld [vmem:[%s9564_s14 + $0x288] sm:$0xff]  ;;  %v2070_v22 = vunpack.c.h.s8.bf16 %v7868_v10 }
 0x123   : > { %1625 = vmatpush1.bf16.msra.mxu0 %v1106_v26  ;;  %6820 = vmatpush3.bf16.msra.mxu1 %v1164_v27  ;;  %v7797_v26 = vld [vmem:[%s9566_s1 + $0x30] sm:$0xff]  ;;  %v7802_v27 = vld [vmem:[%s9566_s1 + $0x38] sm:$0xff] }
 0x124   : > { %1626 = vmatprep.subr.bf16.mxu0 %v1114_v28  ;;  %6821 = vmatprep.subr.bf16.mxu1 %v1227_v29  ;;  %v2056_v28 = vunpack.c.h.s8.bf16 %v7797_v26  ;;  %v2058_v29 = vunpack.c.h.s8.bf16 %v7802_v27 }
 0x126   : > { %v7814_v45 = vcombine.low %v2056_v28, %v2058_v29 }
 0x127   : > { %1627 = vmatpush1.bf16.msra.mxu0 %v1113_v32  ;;  %6822 = vmatpush3.bf16.msra.mxu1 %v1171_v33  ;;  %v1163_v32 = vunpack.c.l.s8.bf16 %v925_v20  ;;  %v924_v33 = vld [vmem:[%s9564_s14 + $0x250] sm:$0xff] }
 0x128   : > { %1628 = vmatprep.subr.bf16.mxu0 %v1121_v34  ;;  %6823 = vmatprep.subr.bf16.mxu1 %v1234_v36  ;;  %v1332_v34 = vunpack.c.l.s8.bf16 %v1010_v25  ;;  %v7812_v36 = vcombine.high %v2056_v28, %v2058_v29  ;;  %v1162_v44 = vunpack.c.l.s8.bf16 %v924_v33  ;;  %v7885_v28 = vld [vmem:[%s9566_s1 + $0x78] sm:$0xff] }
 0x12b   : > { %1629 = vmatpush1.bf16.msra.mxu0 %v1120_v39  ;;  %6824 = vmatpush3.bf16.msra.mxu1 %v1178_v40  ;;  %v7819_v39 = vld [vmem:[%s9566_s1 + $0x40] sm:$0xff]  ;;  %v7824_v40 = vld [vmem:[%s9566_s1 + $0x48] sm:$0xff] }
 0x12c   : > { %1630 = vmatprep.subr.bf16.mxu0 %v1128_v41  ;;  %6825 = vmatprep.subr.bf16.mxu1 %v1241_v42  ;;  %v2060_v41 = vunpack.c.h.s8.bf16 %v7819_v39  ;;  %v2062_v42 = vunpack.c.h.s8.bf16 %v7824_v40 }
 0x12e   : > { %v7830_v51 = vcombine.low %v2060_v41, %v2062_v42 }
 0x12f   : > { %1631 = vmatpush1.bf16.msra.mxu0 %v1127_v46  ;;  %6826 = vmatpush3.bf16.msra.mxu1 %v1185_v47  ;;  %v1170_v46 = vunpack.c.h.s8.bf16 %v925_v20  ;;  %v1339_v47 = vunpack.c.h.s8.bf16 %v1010_v25  ;;  %v2043_v20 = vunpack.c.l.s8.bf16 %v7727_v54  ;;  %v7880_v25 = vld [vmem:[%s9566_s1 + $0x70] sm:$0xff]  ;;  %v2074_v54 = vunpack.c.h.s8.bf16 %v7885_v28 }
 0x130   : > { %1641 = vmatprep.subr.bf16.mxu0 %v1135_v50  ;;  %6833 = vmatprep.subr.bf16.mxu1 %v1304_v52  ;;  %v7828_v50 = vcombine.high %v2060_v41, %v2062_v42  ;;  %v932_v52 = vld [vmem:[%s9564_s14 + $0x290] sm:$0xff]  ;;  %v1297_v41 = vunpack.c.h.s8.bf16 %v989_v6 }
 0x132   : > { %1633 = vmatmul.mubr.bf16.vlgmr.msra.gmra.mrb[4].mxu0 %v7401_v53  ;;  %1796 = vmatmul.mubr.bf16.vlgmr.msra.gmra.mrb[8].mxu1 %v7514_v30  ;;  %v975_v53 = vld [vmem:[%s9564_s14 + $0x3e8] sm:$0xff] }
 0x133   : > { %1642 = vmatpush1.bf16.msra.mxu0 %v1134_v58  ;;  %6834 = vmatpush3.bf16.msra.mxu1 %v1248_v60  ;;  %v1269_v59 = vunpack.c.h.s8.bf16 %v975_v53  ;;  %v2064_v58 = vunpack.c.h.s8.bf16 %v7841_v56  ;;  %v1169_v60 = vunpack.c.h.s8.bf16 %v924_v33  ;;  %v7901_v33 = vld [vmem:[%s9566_s1 + $0x108] sm:$0xff] }
 0x134   : > { %1643 = vmatprep.subr.bf16.mxu0 %v1142_v49  ;;  %6835 = vmatprep.subr.bf16.mxu1 %v1311_v63  ;;  %v1283_v49 = vunpack.c.h.s8.bf16 %v982_v35  ;;  %v1177_v63 = vunpack.c.l.s8.bf16 %v932_v52  ;;  %v938_v35 = vld [vmem:[%s9564_s14 + $0x2c0] sm:$0xff] }
 0x135   : > { %1673 = vmatprep.mubr.bf16.mxu0 %v7409_v61  ;;  %1835 = vmatprep.mubr.bf16.mxu1 %v7522_v38  ;;  %v1262_v61 = vunpack.c.l.s8.bf16 %v975_v53  ;;  %v1290_v53 = vunpack.c.l.s8.bf16 %v989_v6  ;;  %v2051_v6 = vunpack.c.l.s8.bf16 %v7775_v15 }
 0x137   : > { %1644 = vmatpush1.bf16.msra.mxu0 %v1141_v7  ;;  %6836 = vmatpush3.bf16.msra.mxu1 %v1255_v8  ;;  %v7856_v7 = vcombine.high %v2064_v58, %v2066_v62  ;;  %v7858_v8 = vcombine.low %v2064_v58, %v2066_v62  ;;  %v1190_v58 = vunpack.c.l.s8.bf16 %v938_v35 }
 0x138   : > { %1645 = vmatprep.subr.bf16.mxu0 %v1149_v9  ;;  %6837 = vmatprep.subr.bf16.mxu1 %v1318_v12  ;;  %v7863_v9 = vld [vmem:[%s9566_s1 + $0x60] sm:$0xff]  ;;  %v1176_v12 = vunpack.c.l.s8.bf16 %v931_v1 }
 0x139   : > { %v2068_v17 = vunpack.c.h.s8.bf16 %v7863_v9 }
 0x13b   : > { %1646 = vmatpush1.bf16.msra.mxu0 %v1148_v18  ;;  %6838 = vmatpush3.bf16.msra.mxu1 %v1262_v61  ;;  %v1184_v18 = vunpack.c.h.s8.bf16 %v932_v52  ;;  %v939_v61 = vld [vmem:[%s9564_s14 + $0x2c8] sm:$0xff]  ;;  %v7887_v29 = vcombine.high %v2068_v17, %v2070_v22 }
 0x13c   : > { %1647 = vmatprep.subr.bf16.mxu0 %v1156_v19  ;;  %6839 = vmatprep.subr.bf16.mxu1 %v1325_v21  ;;  %v1353_v19 = vunpack.c.h.s8.bf16 %v1017_v48  ;;  %v2045_v21 = vunpack.c.l.s8.bf16 %v7732_v55  ;;  %v7896_v55 = vld [vmem:[%s9566_s1 + $0x100] sm:$0xff] }
 0x13d   : > { %v9545_v42 = vunpack.c.l.s8.bf16 %v7896_v55 }
 0x13f   : > { %1648 = vmatpush1.bf16.msra.mxu0 %v1155_v31  ;;  %6840 = vmatpush3.bf16.msra.mxu1 %v1269_v59  ;;  %v7889_v31 = vcombine.low %v2068_v17, %v2070_v22  ;;  %v1183_v59 = vunpack.c.h.s8.bf16 %v931_v1  ;;  %v1198_v1 = vunpack.c.h.s8.bf16 %v939_v61  ;;  %v7943_v22 = vld [vmem:[%s9566_s1 + $0x90] sm:$0xff] }
 0x140   : > { %1649 = vmatprep.subr.bf16.mxu0 %v1163_v32  ;;  %6841 = vmatprep.subr.bf16.mxu1 %v1332_v34  ;;  %v2072_v32 = vunpack.c.h.s8.bf16 %v7880_v25  ;;  %v1191_v34 = vunpack.c.l.s8.bf16 %v939_v61 }
 0x142   : > { %v7910_v52 = vcombine.high %v2072_v32, %v2074_v54  ;;  %v7912_v48 = vcombine.low %v2072_v32, %v2074_v54  ;;  %v2055_v54 = vunpack.c.l.s8.bf16 %v7797_v26 }
 0x143   : > { %1650 = vmatpush1.bf16.msra.mxu0 %v1162_v44  ;;  %6842 = vmatpush3.bf16.msra.mxu1 %v1276_v43  ;;  %v9546_v44 = vunpack.c.l.s8.bf16 %v7901_v33  ;;  %v6503_v43 = vcombine.high %v2043_v20, %v2045_v21 }
 0x144   : > { %1651 = vmatprep.subr.bf16.mxu0 %v1170_v46  ;;  %6843 = vmatprep.subr.bf16.mxu1 %v1339_v47  ;;  %v2047_v46 = vunpack.c.l.s8.bf16 %v7747_v2  ;;  %v2049_v47 = vunpack.c.l.s8.bf16 %v7752_v3  ;;  %v6502_v2 = vcombine.low %v2043_v20, %v2045_v21 }
 0x145   : > { %v7928_v3 = vcombine.low %v9545_v42, %v9546_v44  ;;  %v2063_v42 = vunpack.c.l.s8.bf16 %v7841_v56  ;;  %v2067_v44 = vunpack.c.l.s8.bf16 %v7863_v9 }
 0x146   : > { %v6506_v61 = vcombine.low %v2047_v46, %v2049_v47 }
 0x147   : > { %1652 = vmatpush1.bf16.msra.mxu0 %v1169_v60  ;;  %6844 = vmatpush3.bf16.msra.mxu1 %v1283_v49  ;;  %v7917_v60 = vld [vmem:[%s9566_s1 + $0x80] sm:$0xff]  ;;  %v7922_v49 = vld [vmem:[%s9566_s1 + $0x88] sm:$0xff] }
 0x148   : > { %1653 = vmatprep.subr.bf16.mxu0 %v1177_v63  ;;  %6845 = vmatprep.subr.bf16.mxu1 %v1346_v5  ;;  %v2076_v62 = vunpack.c.h.s8.bf16 %v7917_v60  ;;  %v2078_v63 = vunpack.c.h.s8.bf16 %v7922_v49  ;;  %v6507_v5 = vcombine.high %v2047_v46, %v2049_v47 }
 0x14a   : > { %v7937_v17 = vcombine.high %v2076_v62, %v2078_v63  ;;  %v7950_v15 = vcombine.low %v2076_v62, %v2078_v63  ;;  %v2059_v63 = vunpack.c.l.s8.bf16 %v7819_v39 }
 0x14b   : > { %1654 = vmatpush1.bf16.msra.mxu0 %v1176_v12  ;;  %6846 = vmatpush3.bf16.msra.mxu1 %v1290_v53  ;;  %v2053_v12 = vunpack.c.l.s8.bf16 %v7780_v16  ;;  %v946_v53 = vld [vmem:[%s9564_s14 + $0x300] sm:$0xff]  ;;  %v1197_v16 = vunpack.c.h.s8.bf16 %v938_v35 }
 0x14c   : > { %1655 = vmatprep.subr.bf16.mxu0 %v1184_v18  ;;  %6847 = vmatprep.subr.bf16.mxu1 %v1353_v19  ;;  %v7948_v18 = vld [vmem:[%s9566_s1 + $0x98] sm:$0xff]  ;;  %v2080_v19 = vunpack.c.h.s8.bf16 %v7943_v22  ;;  %v1205_v21 = vunpack.c.l.s8.bf16 %v946_v53  ;;  %v7964_v35 = vld [vmem:[%s9566_s1 + $0xa0] sm:$0xff] }
 0x14d   : > { %v2082_v20 = vunpack.c.h.s8.bf16 %v7948_v18  ;;  %v6511_v32 = vcombine.high %v2051_v6, %v2053_v12  ;;  %v6510_v26 = vcombine.low %v2051_v6, %v2053_v12  ;;  %v7985_v6 = vld [vmem:[%s9566_s1 + $0xb0] sm:$0xff]  ;;  %v7990_v12 = vld [vmem:[%s9566_s1 + $0xb8] sm:$0xff] }
 0x14f   : > { %1656 = vmatpush1.bf16.msra.mxu0 %v1183_v59  ;;  %6848 = vmatpush3.bf16.msra.mxu1 %v1297_v41  ;;  %v945_v59 = vld [vmem:[%s9564_s14 + $0x2f8] sm:$0xff]  ;;  %v7959_v41 = vcombine.high %v2080_v19, %v2082_v20  ;;  %v7971_v46 = vcombine.low %v2080_v19, %v2082_v20  ;;  %v2090_v19 = vunpack.c.h.s8.bf16 %v7990_v12 }
 0x150   : > { %1657 = vmatprep.subr.bf16.mxu0 %v1191_v34  ;;  %3223 = vmatprep.subr.bf16.mxu1 %v6503_v43  ;;  %v2057_v34 = vunpack.c.l.s8.bf16 %v7802_v27  ;;  %v7969_v43 = vld [vmem:[%s9566_s1 + $0xa8] sm:$0xff]  ;;  %v1204_v47 = vunpack.c.l.s8.bf16 %v945_v59  ;;  %v2084_v27 = vunpack.c.h.s8.bf16 %v7964_v35  ;;  %v1211_v39 = vunpack.c.h.s8.bf16 %v945_v59  ;;  %v8006_v59 = vld [vmem:[%s9566_s1 + $0xc0] sm:$0xff] }
 0x152   : > { %1836 = vmatmul.mubr.bf16.vlgmr.msra.gmra.mrb[12].mxu1 %v7620_v11  ;;  %v6515_v62 = vcombine.high %v2055_v54, %v2057_v34 }
 0x153   : > { %1658 = vmatpush1.bf16.msra.mxu0 %v1190_v58  ;;  %3224 = vmatpush1.bf16.msra.mxu1 %v6502_v2  ;;  %v2086_v58 = vunpack.c.h.s8.bf16 %v7969_v43  ;;  %v1212_v2 = vunpack.c.h.s8.bf16 %v946_v53 }
 0x154   : > { %1659 = vmatprep.subr.bf16.mxu0 %v1198_v1  ;;  %3225 = vmatprep.subr.bf16.mxu1 %v6507_v5  ;;  %v2061_v1 = vunpack.c.l.s8.bf16 %v7824_v40  ;;  %v953_v5 = vld [vmem:[%s9564_s14 + $0x338] sm:$0xff]  ;;  %v6514_v40 = vcombine.low %v2055_v54, %v2057_v34  ;;  %v8011_v54 = vld [vmem:[%s9566_s1 + $0xc8] sm:$0xff] }
 0x155   : > { %v7992_v53 = vcombine.low %v2084_v27, %v2086_v58  ;;  %v1219_v20 = vunpack.c.l.s8.bf16 %v953_v5 }
 0x156   : > { %v6518_v56 = vcombine.low %v2059_v63, %v2061_v1 }
 0x157   : > { %1660 = vmatpush1.bf16.msra.mxu0 %v1197_v16  ;;  %3226 = vmatpush1.bf16.msra.mxu1 %v6506_v61  ;;  %v7980_v16 = vcombine.high %v2084_v27, %v2086_v58  ;;  %v2088_v61 = vunpack.c.h.s8.bf16 %v7985_v6  ;;  %v2065_v27 = vunpack.c.l.s8.bf16 %v7846_v57  ;;  %v2092_v57 = vunpack.c.h.s8.bf16 %v8006_v59 }
 0x158   : > { %1661 = vmatprep.subr.bf16.mxu0 %v1205_v21  ;;  %3227 = vmatprep.subr.bf16.mxu1 %v6511_v32  ;;  %v952_v21 = vld [vmem:[%s9564_s14 + $0x330] sm:$0xff]  ;;  %v6519_v32 = vcombine.high %v2059_v63, %v2061_v1  ;;  %v2094_v58 = vunpack.c.h.s8.bf16 %v8011_v54  ;;  %v8032_v1 = vld [vmem:[%s9566_s1 + $0xd8] sm:$0xff] }
 0x159   : > { %v8013_v34 = vcombine.low %v2088_v61, %v2090_v19  ;;  %v8027_v63 = vld [vmem:[%s9566_s1 + $0xd0] sm:$0xff]  ;;  %v1225_v9 = vunpack.c.h.s8.bf16 %v952_v21 }
 0x15b   : > { %1662 = vmatpush1.bf16.msra.mxu0 %v1204_v47  ;;  %3228 = vmatpush1.bf16.msra.mxu1 %v6510_v26  ;;  %v8001_v47 = vcombine.high %v2088_v61, %v2090_v19  ;;  %9568 = vst [vmem:[#allocation7_spill] sm:$0xff] %v8013_v34  ;;  %v1218_v26 = vunpack.c.l.s8.bf16 %v952_v21  ;;  %v960_v61 = vld [vmem:[%s9564_s14 + $0x370] sm:$0xff]  ;;  %v2098_v19 = vunpack.c.h.s8.bf16 %v8032_v1  ;;  %v2071_v34 = vunpack.c.l.s8.bf16 %v7880_v25  ;;  %v8053_v21 = vld [vmem:[%s9566_s1 + $0xe8] sm:$0xff] }
 0x15c   : > { %1663 = vmatprep.subr.bf16.mxu0 %v1212_v2  ;;  %3229 = vmatprep.subr.bf16.mxu1 %v6515_v62  ;;  %v1226_v2 = vunpack.c.h.s8.bf16 %v953_v5  ;;  %v6523_v62 = vcombine.high %v2063_v42, %v2065_v27  ;;  %v8034_v5 = vcombine.low %v2092_v57, %v2094_v58 }
 0x15d   : > { %9567 = vst [vmem:[#allocation6_spill] sm:$0xff] %v8001_v47  ;;  %v2069_v47 = vunpack.c.l.s8.bf16 %v7868_v10  ;;  %v6522_v10 = vcombine.low %v2063_v42, %v2065_v27  ;;  %v8048_v42 = vld [vmem:[%s9566_s1 + $0xe0] sm:$0xff] }
 0x15e   : > { %9570 = vst [vmem:[#allocation9_spill] sm:$0xff] %v8034_v5  ;;  %v2077_v5 = vunpack.c.l.s8.bf16 %v7922_v49 }
 0x15f   : > { %1664 = vmatpush1.bf16.msra.mxu0 %v1211_v39  ;;  %3230 = vmatpush1.bf16.msra.mxu1 %v6514_v40  ;;  %v8022_v39 = vcombine.high %v2092_v57, %v2094_v58  ;;  %v2096_v40 = vunpack.c.h.s8.bf16 %v8027_v63  ;;  %v2073_v57 = vunpack.c.l.s8.bf16 %v7885_v28  ;;  %v6526_v25 = vcombine.low %v2067_v44, %v2069_v47 }
 0x160   : > { %1665 = vmatprep.subr.bf16.mxu0 %v1219_v20  ;;  %3231 = vmatprep.subr.bf16.mxu1 %v6519_v32  ;;  %v1233_v20 = vunpack.c.l.s8.bf16 %v960_v61  ;;  %v959_v32 = vld [vmem:[%s9564_s14 + $0x368] sm:$0xff]  ;;  %v2100_v28 = vunpack.c.h.s8.bf16 %v8048_v42  ;;  %v2102_v58 = vunpack.c.h.s8.bf16 %v8053_v21 }
 0x161   : > { %9569 = vst [vmem:[#allocation8_spill] sm:$0xff] %v8022_v39  ;;  %v6527_v39 = vcombine.high %v2067_v44, %v2069_v47  ;;  %v8055_v27 = vcombine.low %v2096_v40, %v2098_v19  ;;  %v8069_v44 = vld [vmem:[%s9566_s1 + $0xf0] sm:$0xff]  ;;  %v8074_v47 = vld [vmem:[%s9566_s1 + $0xf8] sm:$0xff]  ;;  %v6530_v49 = vcombine.low %v2071_v34, %v2073_v57 }
 0x163   : > { %1666 = vmatpush1.bf16.msra.mxu0 %v1218_v26  ;;  %3232 = vmatpush1.bf16.msra.mxu1 %v6518_v56  ;;  %v8043_v26 = vcombine.high %v2096_v40, %v2098_v19  ;;  %9572 = vst [vmem:[#allocation11_spill] sm:$0xff] %v8055_v27  ;;  %v1232_v56 = vunpack.c.l.s8.bf16 %v959_v32  ;;  %v967_v40 = vld [vmem:[%s9564_s14 + $0x3a8] sm:$0xff]  ;;  %v2079_v27 = vunpack.c.l.s8.bf16 %v7943_v22  ;;  %v2085_v22 = vunpack.c.l.s8.bf16 %v7969_v43 }
 0x164   : > { %1667 = vmatprep.subr.bf16.mxu0 %v1226_v2  ;;  %3233 = vmatprep.subr.bf16.mxu1 %v6523_v62  ;;  %v1240_v2 = vunpack.c.h.s8.bf16 %v960_v61  ;;  %v6531_v62 = vcombine.high %v2071_v34, %v2073_v57  ;;  %v8076_v61 = vcombine.low %v2100_v28, %v2102_v58  ;;  %v1247_v19 = vunpack.c.l.s8.bf16 %v967_v40 }
 0x165   : > { %9571 = vst [vmem:[#allocation10_spill] sm:$0xff] %v8043_v26  ;;  %v2075_v26 = vunpack.c.l.s8.bf16 %v7917_v60  ;;  %v1239_v60 = vunpack.c.h.s8.bf16 %v959_v32 }
 0x167   : > { %1668 = vmatpush1.bf16.msra.mxu0 %v1225_v9  ;;  %3234 = vmatpush1.bf16.msra.mxu1 %v6522_v10  ;;  %v8064_v9 = vcombine.high %v2100_v28, %v2102_v58  ;;  %v2106_v10 = vunpack.c.h.s8.bf16 %v8074_v47  ;;  %v2081_v28 = vunpack.c.l.s8.bf16 %v7948_v18  ;;  %v6534_v57 = vcombine.low %v2075_v26, %v2077_v5  ;;  %v974_v18 = vld [vmem:[%s9564_s14 + $0x3e0] sm:$0xff] }
 0x168   : > { %1669 = vmatprep.subr.bf16.mxu0 %v1233_v20  ;;  %3235 = vmatprep.subr.bf16.mxu1 %v6527_v39  ;;  %v2104_v39 = vunpack.c.h.s8.bf16 %v8069_v44  ;;  %v966_v20 = vld [vmem:[%s9564_s14 + $0x3a0] sm:$0xff]  ;;  %v2110_v58 = vunpack.c.h.s8.bf16 %v7901_v33 }
 0x169   : > { %9573 = vst [vmem:[#allocation12_spill] sm:$0xff] %v8064_v9  ;;  %v6535_v9 = vcombine.high %v2075_v26, %v2077_v5  ;;  %v1246_v34 = vunpack.c.l.s8.bf16 %v966_v20  ;;  %v1253_v26 = vunpack.c.h.s8.bf16 %v966_v20 }
 0x16a   : > { %v8087_v32 = vcombine.low %v2104_v39, %v2106_v10 }
 0x16b   : > { %1670 = vmatpush1.bf16.msra.mxu0 %v1232_v56  ;;  %3236 = vmatpush1.bf16.msra.mxu1 %v6526_v25  ;;  %v8085_v56 = vcombine.high %v2104_v39, %v2106_v10  ;;  %v2108_v25 = vunpack.c.h.s8.bf16 %v7896_v55  ;;  %v6539_v39 = vcombine.high %v2079_v27, %v2081_v28  ;;  %v2089_v10 = vunpack.c.l.s8.bf16 %v7990_v12 }
 0x16c   : > { %1671 = vmatprep.subr.bf16.mxu0 %v1240_v2  ;;  %3237 = vmatprep.subr.bf16.mxu1 %v6531_v62  ;;  %v1254_v2 = vunpack.c.h.s8.bf16 %v967_v40  ;;  %v2083_v62 = vunpack.c.l.s8.bf16 %v7964_v35  ;;  %v6538_v40 = vcombine.low %v2079_v27, %v2081_v28  ;;  %v973_v35 = vld [vmem:[%s9564_s14 + $0x3d8] sm:$0xff]  ;;  %v1268_v27 = vunpack.c.h.s8.bf16 %v974_v18 }
 0x16d   : > { %v8099_v5 = vcombine.low %v2108_v25, %v2110_v58  ;;  %v2091_v28 = vunpack.c.l.s8.bf16 %v8006_v59  ;;  %v2095_v59 = vunpack.c.l.s8.bf16 %v8027_v63 }
 0x16e   : > { %v6543_v43 = vcombine.high %v2083_v62, %v2085_v22 }
 0x16f   : > { %1672 = vmatpush1.bf16.msra.mxu0 %v1239_v60  ;;  %3238 = vmatpush1.bf16.msra.mxu1 %v6530_v49  ;;  %v8096_v60 = vcombine.high %v2108_v25, %v2110_v58  ;;  %v2087_v49 = vunpack.c.l.s8.bf16 %v7985_v6  ;;  %v1267_v6 = vunpack.c.h.s8.bf16 %v973_v35  ;;  %v980_v25 = vld [vmem:[%s9564_s14 + $0x410] sm:$0xff] }
 0x170   : > { %1682 = vmatprep.subr.bf16.mxu0 %v1247_v19  ;;  %3239 = vmatprep.subr.bf16.mxu1 %v6535_v9  ;;  %v1261_v9 = vunpack.c.l.s8.bf16 %v974_v18  ;;  %v6542_v19 = vcombine.low %v2083_v62, %v2085_v22  ;;  %v1281_v63 = vunpack.c.h.s8.bf16 %v980_v25 }
 0x171   : > { %v6547_v20 = vcombine.high %v2087_v49, %v2089_v10  ;;  %v6546_v12 = vcombine.low %v2087_v49, %v2089_v10 }
 0x172   : > { %1674 = vmatmul.mubr.bf16.vlgmr.msra.gmra.mrb[4].mxu0 %v7514_v30  ;;  %v1260_v30 = vunpack.c.l.s8.bf16 %v973_v35  ;;  %v987_v35 = vld [vmem:[%s9564_s14 + $0x448] sm:$0xff] }
 0x173   : > { %1683 = vmatpush1.bf16.msra.mxu0 %v1246_v34  ;;  %3240 = vmatpush1.bf16.msra.mxu1 %v6534_v57  ;;  %v2093_v34 = vunpack.c.l.s8.bf16 %v8011_v54  ;;  %v2097_v54 = vunpack.c.l.s8.bf16 %v8032_v1  ;;  %v1288_v49 = vunpack.c.l.s8.bf16 %v987_v35 }
 0x174   : > { %1684 = vmatprep.subr.bf16.mxu0 %v1254_v2  ;;  %1714 = vmatprep.mubr.bf16.mxu0 %v7522_v38  ;;  %v981_v38 = vld [vmem:[%s9564_s14 + $0x418] sm:$0xff]  ;;  %v1274_v2 = vunpack.c.l.s8.bf16 %v980_v25  ;;  %v1002_v25 = vld [vmem:[%s9564_s14 + $0x4c0] sm:$0xff] }
 0x175   : > { %3241 = vmatprep.subr.bf16.mxu1 %v6539_v39  ;;  %v1275_v57 = vunpack.c.l.s8.bf16 %v981_v38  ;;  %v6551_v58 = vcombine.high %v2091_v28, %v2093_v34  ;;  %v6550_v62 = vcombine.low %v2091_v28, %v2093_v34  ;;  %v1282_v22 = vunpack.c.h.s8.bf16 %v981_v38 }
 0x176   : > { %v6555_v18 = vcombine.high %v2095_v59, %v2097_v54  ;;  %v2099_v39 = vunpack.c.l.s8.bf16 %v8048_v42  ;;  %v6554_v1 = vcombine.low %v2095_v59, %v2097_v54  ;;  %v2103_v42 = vunpack.c.l.s8.bf16 %v8069_v44 }
 0x177   : > { %1685 = vmatpush1.bf16.msra.mxu0 %v1253_v26  ;;  %3242 = vmatpush1.bf16.msra.mxu1 %v6538_v40  ;;  %v2101_v26 = vunpack.c.l.s8.bf16 %v8053_v21  ;;  %v988_v40 = vld [vmem:[%s9564_s14 + $0x450] sm:$0xff]  ;;  %v2105_v21 = vunpack.c.l.s8.bf16 %v8074_v47  ;;  %v994_v47 = vld [vmem:[%s9564_s14 + $0x480] sm:$0xff]  ;;  %v9574_v34 = vunpack.c.l.s8.bf16 %v7901_v33  ;;  %v9575_v38 = vunpack.c.l.s8.bf16 %v7896_v55  ;;  %v1001_v33 = vld [vmem:[%s9564_s14 + $0x4b8] sm:$0xff] }
 0x178   : > { %1686 = vmatprep.subr.bf16.mxu0 %v1261_v9  ;;  %3243 = vmatprep.subr.bf16.mxu1 %v6543_v43  ;;  %v1289_v9 = vunpack.c.l.s8.bf16 %v988_v40  ;;  %v1317_v59 = vunpack.c.l.s8.bf16 %v1002_v25  ;;  %v1316_v55 = vunpack.c.l.s8.bf16 %v1001_v33  ;;  %v1324_v54 = vunpack.c.h.s8.bf16 %v1002_v25 }
 0x179   : > { %v6559_v43 = vcombine.high %v2099_v39, %v2101_v26  ;;  %v6558_v10 = vcombine.low %v2099_v39, %v2101_v26  ;;  %v6562_v28 = vcombine.low %v2103_v42, %v2105_v21 }
 0x17b   : > { %1687 = vmatpush1.bf16.msra.mxu0 %v1260_v30  ;;  %3244 = vmatpush1.bf16.msra.mxu1 %v6542_v19  ;;  %v1296_v30 = vunpack.c.h.s8.bf16 %v988_v40  ;;  %v6563_v19 = vcombine.high %v2103_v42, %v2105_v21  ;;  %v1016_v40 = vld [vmem:[%s9564_s14 + $0x530] sm:$0xff]  ;;  %v8164_v21 = vsub.s32 0, %v7300_v37 }
 0x17c   : > { %1688 = vmatprep.subr.bf16.mxu0 %v1268_v27  ;;  %3245 = vmatprep.subr.bf16.mxu1 %v6547_v20  ;;  %v995_v27 = vld [vmem:[%s9564_s14 + $0x488] sm:$0xff]  ;;  %v1295_v20 = vunpack.c.h.s8.bf16 %v987_v35 }
 0x17d   : > { %v1303_v44 = vunpack.c.l.s8.bf16 %v995_v27 }
 0x17f   : > { %1689 = vmatpush1.bf16.msra.mxu0 %v1267_v6  ;;  %3246 = vmatpush1.bf16.msra.mxu1 %v6546_v12  ;;  %v6567_v6 = vcombine.high %v9575_v38, %v9574_v34  ;;  %v1302_v12 = vunpack.c.l.s8.bf16 %v994_v47 }
 0x180   : > { %1690 = vmatprep.subr.bf16.mxu0 %v1275_v57  ;;  %3247 = vmatprep.subr.bf16.mxu1 %v6551_v58  ;;  %v1310_v57 = vunpack.c.h.s8.bf16 %v995_v27  ;;  %v1309_v58 = vunpack.c.h.s8.bf16 %v994_v47  ;;  %v8209_v47 = vld [vmem:[%s9566_s1 + $0x118] sm:$0xff] }
 0x183   : > { %1691 = vmatpush1.bf16.msra.mxu0 %v1274_v2  ;;  %3248 = vmatpush1.bf16.msra.mxu1 %v6550_v62  ;;  %v1009_v2 = vld [vmem:[%s9564_s14 + $0x4f8] sm:$0xff]  ;;  %v1323_v62 = vunpack.c.h.s8.bf16 %v1001_v33 }
 0x184   : > { %1692 = vmatprep.subr.bf16.mxu0 %v1282_v22  ;;  %3249 = vmatprep.subr.bf16.mxu1 %v6555_v18  ;;  %v1331_v22 = vunpack.c.l.s8.bf16 %v1009_v2  ;;  %v1008_v18 = vld [vmem:[%s9564_s14 + $0x4f0] sm:$0xff]  ;;  %v1338_v26 = vunpack.c.h.s8.bf16 %v1009_v2 }
 0x185   : > { %v1330_v39 = vunpack.c.l.s8.bf16 %v1008_v18 }
 0x187   : > { %1693 = vmatpush1.bf16.msra.mxu0 %v1281_v63  ;;  %3250 = vmatpush1.bf16.msra.mxu1 %v6554_v1  ;;  %v1337_v63 = vunpack.c.h.s8.bf16 %v1008_v18  ;;  %v1345_v1 = vunpack.c.l.s8.bf16 %v1016_v40 }
 0x188   : > { %1694 = vmatprep.subr.bf16.mxu0 %v1289_v9  ;;  %3251 = vmatprep.subr.bf16.mxu1 %v6559_v43  ;;  %v1015_v9 = vld [vmem:[%s9564_s14 + $0x528] sm:$0xff]  ;;  %v1352_v43 = vunpack.c.h.s8.bf16 %v1016_v40 }
 0x189   : > { %v1344_v35 = vunpack.c.l.s8.bf16 %v1015_v9  ;;  %v1351_v42 = vunpack.c.h.s8.bf16 %v1015_v9 }
 0x18b   : > { %1695 = vmatpush1.bf16.msra.mxu0 %v1288_v49  ;;  %3252 = vmatpush1.bf16.msra.mxu1 %v6558_v10 }
 0x18c   : > { %1696 = vmatprep.subr.bf16.mxu0 %v1296_v30  ;;  %3253 = vmatprep.subr.bf16.mxu1 %v6563_v19 }
 0x18f   : > { %1697 = vmatpush1.bf16.msra.mxu0 %v1295_v20  ;;  %3254 = vmatpush1.bf16.msra.mxu1 %v6562_v28 }
 0x190   : > { %1698 = vmatprep.subr.bf16.mxu0 %v1303_v44  ;;  %3264 = vmatprep.subr.bf16.mxu1 %v6567_v6 }
 0x193   : > { %1699 = vmatpush1.bf16.msra.mxu0 %v1302_v12 }
 0x194   : > { %1700 = vmatprep.subr.bf16.mxu0 %v1310_v57 }
 0x197   : > { %1701 = vmatpush1.bf16.msra.mxu0 %v1309_v58  ;;  %v2113_v58 = vunpack.c.l.s8.bf16 %v8209_v47 }
 0x198   : > { %1702 = vmatprep.subr.bf16.mxu0 %v1317_v59 }
 0x19b   : > { %1703 = vmatpush1.bf16.msra.mxu0 %v1316_v55  ;;  %v8218_v55 = vld [vmem:[%s9566_s1 + $0x120] sm:$0xff] }
 0x19c   : > { %1704 = vmatprep.subr.bf16.mxu0 %v1324_v54 }
 0x19f   : > { %1705 = vmatpush1.bf16.msra.mxu0 %v1323_v62 }
 0x1a0   : > { %1706 = vmatprep.subr.bf16.mxu0 %v1331_v22  ;;  %v2115_v22 = vunpack.c.l.s8.bf16 %v8218_v55 }
 0x1a3   : > { %1707 = vmatpush1.bf16.msra.mxu0 %v1330_v39  ;;  %v8236_v39 = vld [vmem:[%s9566_s1 + $0x130] sm:$0xff] }
 0x1a4   : > { %1708 = vmatprep.subr.bf16.mxu0 %v1338_v26  ;;  %v2119_v40 = vunpack.c.l.s8.bf16 %v8236_v39 }
 0x1a7   : > { %1709 = vmatpush1.bf16.msra.mxu0 %v1337_v63 }
 0x1a8   : > { %1710 = vmatprep.subr.bf16.mxu0 %v1345_v1  ;;  %v8253_v1 = vld [vmem:[%s9566_s1 + $0x140] sm:$0xff] }
 0x1ab   : > { %1711 = vmatpush1.bf16.msra.mxu0 %v1344_v35  ;;  %v2123_v35 = vunpack.c.l.s8.bf16 %v8253_v1 }
 0x1ac   : > { %1712 = vmatprep.subr.bf16.mxu0 %v1352_v43  ;;  %v8267_v43 = vld [vmem:[%s9566_s1 + $0x150] sm:$0xff] }
 0x1af   : > { %1713 = vmatpush1.bf16.msra.mxu0 %v1351_v42  ;;  %v8272_v42 = vld [vmem:[%s9566_s1 + $0x158] sm:$0xff] }
 0x1b0   : > { %3387 = vmatprep.subr.bf16.mxu0 %v7739_v0  ;;  %v8173_v0 = vsub.s32 1, %v7300_v37 }
 0x1b2   : > { %1715 = vmatmul.mubr.bf16.vlgmr.msra.gmra.mrb[4].mxu0 %v7620_v11  ;;  %v8170_v11 = vld [vmem:[%s9576_s6] sm:$0x7f] }
 0x1b3   : > { %3388 = vmatpush1.bf16.msra.mxu0 %v7754_v4  ;;  %v8176_v4 = vsub.s32 3, %v7300_v37 }
 0x1b4   : > { %3389 = vmatprep.subr.bf16.mxu0 %v7766_v13  ;;  %v8182_v13 = vld [vmem:[%s9577_s2] sm:$0x7f] }
 0x1b5   : > { %v1896_v49 = vrot.slane %v8182_v13, %v8173_v0 }
 0x1b7   : > { %3390 = vmatpush1.bf16.msra.mxu0 %v7768_v14  ;;  %v1848_v14 = vrot.slane %v8170_v11, %v8164_v21 }
 0x1b8   : > { %3391 = vmatprep.subr.bf16.mxu0 %v7787_v23  ;;  %v1852_v23 = vrot.slane %v8170_v11, %v8173_v0 }
 0x1bb   : > { %3392 = vmatpush1.bf16.msra.mxu0 %v7789_v24  ;;  %v1860_v24 = vrot.slane %v8170_v11, %v8176_v4 }
 0x1bc   : > { %3393 = vmatprep.subr.bf16.mxu0 %v7812_v36  ;;  %v1892_v36 = vrot.slane %v8182_v13, %v8164_v21 }
 0x1bf   : > { %3394 = vmatpush1.bf16.msra.mxu0 %v7814_v45 }
 0x1c0   : > { %3395 = vmatprep.subr.bf16.mxu0 %v7828_v50 }
 0x1c3   : > { %3396 = vmatpush1.bf16.msra.mxu0 %v7830_v51  ;;  %v1904_v51 = vrot.slane %v8182_v13, %v8176_v4 }
 0x1c4   : > { %3397 = vmatprep.subr.bf16.mxu0 %v7856_v7  ;;  %v8204_v7 = vld [vmem:[%s9566_s1 + $0x110] sm:$0xff] }
 0x1c5   : > { %v1470_v45 = vpop.f32.mrb[0].mxu0  ;;  %v8194_v50 = vpop.f32.mrb[0].mxu1 }
 0x1c6   : > { %v1880_v10 = vmul.f32 %v1848_v14, %v1470_v45  ;;  %v1472_v30 = vpop.f32.mrb[1].mxu0  ;;  %v1595_v19 = vpop.f32.mrb[1].mxu1 }
 0x1c7   : > { %v1881_v27 = vmul.f32 %v1852_v23, %v1472_v30  ;;  %v1883_v20 = vmul.f32 %v1860_v24, %v1595_v19  ;;  %v1474_v28 = vpop.f32.mrb[2].mxu0  ;;  %v1597_v44 = vpop.f32.mrb[2].mxu1  ;;  %3398 = vmatpush1.bf16.msra.mxu0 %v7858_v8  ;;  %v2111_v8 = vunpack.c.l.s8.bf16 %v8204_v7  ;;  %v2127_v23 = vunpack.c.l.s8.bf16 %v8267_v43  ;;  %v8281_v24 = vld [vmem:[%s9566_s1 + $0x160] sm:$0xff]  ;;  %v8295_v30 = vld [vmem:[%s9566_s1 + $0x170] sm:$0xff]  ;;  %v8300_v19 = vld [vmem:[%s9566_s1 + $0x178] sm:$0xff] }
 0x1c8   : > { %v1924_v34 = vadd.f32 %v1892_v36, %v1880_v10  ;;  %v1475_v38 = vpop.f32.mrb[3].mxu0  ;;  %v1598_v6 = vpop.f32.mrb[3].mxu1  ;;  %3399 = vmatprep.subr.bf16.mxu0 %v7887_v29  ;;  %v8223_v29 = vld [vmem:[%s9566_s1 + $0x128] sm:$0xff]  ;;  %v2135_v44 = vunpack.c.l.s8.bf16 %v8295_v30 }
 0x1c9   : > { %v1925_v12 = vadd.f32 %v1896_v49, %v1881_v27  ;;  %v1927_v57 = vadd.f32 %v1904_v51, %v1883_v20  ;;  %v6571_v62 = vcombine.high %v2111_v8, %v2113_v58  ;;  %v6570_v26 = vcombine.low %v2111_v8, %v2113_v58  ;;  %v8286_v36 = vld [vmem:[%s9566_s1 + $0x168] sm:$0xff]  ;;  %v9580_v27 = vld [vmem:[#allocation8_spill] sm:$0xff]  ;;  %v9581_v38 = vld [vmem:[#allocation9_spill] sm:$0xff] }
 0x1ca   : > { %v1931_v25 = vmax.f32 %v1924_v34, 0.0  ;;  %v2131_v51 = vunpack.c.l.s8.bf16 %v8281_v24  ;;  %v9579_v10 = vld [vmem:[#allocation7_spill] sm:$0xff]  ;;  %v2137_v34 = vunpack.c.l.s8.bf16 %v8300_v19  ;;  %v8309_v6 = vld [vmem:[%s9566_s1 + $0x180] sm:$0xff] }
 0x1cb   : > { %v1932_v59 = vmax.f32 %v1925_v12, 0.0  ;;  %v1934_v33 = vmax.f32 %v1927_v57, 0.0  ;;  %3400 = vmatpush1.bf16.msra.mxu0 %v7889_v31  ;;  %v2117_v31 = vunpack.c.l.s8.bf16 %v8223_v29  ;;  %v8314_v12 = vld [vmem:[%s9566_s1 + $0x188] sm:$0xff] }
 0x1cc   : > { %3401 = vmatprep.subr.bf16.mxu0 %v7910_v52  ;;  %v8226_v2 = vpack.c.bf16 %v1931_v25, %v1931_v25  ;;  %v8241_v52 = vld [vmem:[%s9566_s1 + $0x138] sm:$0xff]  ;;  %v9582_v57 = vld [vmem:[#allocation10_spill] sm:$0xff]  ;;  %v6595_v58 = vcombine.high %v2135_v44, %v2137_v34 }
 0x1cd   : > { %v1939_v54 = vpack.c.bf16 %v1932_v59, %v1932_v59  ;;  %v8230_v18 = vpack.c.bf16 %v1934_v33, %v1934_v33  ;;  %v2121_v63 = vunpack.c.l.s8.bf16 %v8241_v52  ;;  %v2139_v59 = vunpack.c.l.s8.bf16 %v8309_v6 }
 0x1ce   : > { %v2141_v33 = vunpack.c.l.s8.bf16 %v8314_v12 }
 0x1cf   : > { %3255 = vmatprep.mubr.bf16.mxu1 %v1939_v54  ;;  %3402 = vmatpush1.bf16.msra.mxu0 %v7912_v48  ;;  %v6575_v48 = vcombine.high %v2115_v22, %v2117_v31  ;;  %v6579_v9 = vcombine.high %v2119_v40, %v2121_v63 }
 0x1d0   : > { %3419 = vmatprep.mubr.bf16.mxu0 %v1939_v54  ;;  %3256 = vmatmul.mubr.bf16.vlgmr.msra.gmra.mrb[16].mxu1 %v8226_v2 }
 0x1d1   : > { %3265 = vmatpush1.bf16.msra.mxu1 %v7928_v3  ;;  %3296 = vmatprep.mubr.bf16.mxu1 %v8230_v18  ;;  %v8258_v3 = vld [vmem:[%s9566_s1 + $0x148] sm:$0xff] }
 0x1d2   : > { %3403 = vmatprep.subr.bf16.mxu0 %v7937_v17  ;;  %3266 = vmatprep.subr.bf16.mxu1 %v6571_v62  ;;  %v6574_v17 = vcombine.low %v2115_v22, %v2117_v31  ;;  %v9583_v62 = vld [vmem:[#allocation11_spill] sm:$0xff]  ;;  %v8328_v31 = vld [vmem:[%s9566_s1 + $0x198] sm:$0xff] }
 0x1d3   : > { %3404 = vmatpush1.bf16.msra.mxu0 %v7950_v15  ;;  %v2125_v15 = vunpack.c.l.s8.bf16 %v8258_v3  ;;  %v8323_v22 = vld [vmem:[%s9566_s1 + $0x190] sm:$0xff] }
 0x1d4   : > { %3405 = vmatprep.subr.bf16.mxu0 %v7959_v41  ;;  %v6578_v41 = vcombine.low %v2119_v40, %v2121_v63  ;;  %v9584_v40 = vld [vmem:[#allocation12_spill] sm:$0xff] }
 0x1d5   : > { %3267 = vmatpush1.bf16.msra.mxu1 %v6570_v26  ;;  %v6583_v14 = vcombine.high %v2123_v35, %v2125_v15  ;;  %v6582_v45 = vcombine.low %v2123_v35, %v2125_v15  ;;  %v2143_v35 = vunpack.c.l.s8.bf16 %v8323_v22  ;;  %v2145_v15 = vunpack.c.l.s8.bf16 %v8328_v31 }
 0x1d6   : > { %3268 = vmatprep.subr.bf16.mxu1 %v6575_v48 }
 0x1d7   : > { %3406 = vmatpush1.bf16.msra.mxu0 %v7971_v46  ;;  %v2129_v46 = vunpack.c.l.s8.bf16 %v8272_v42 }
 0x1d8   : > { %3407 = vmatprep.subr.bf16.mxu0 %v7980_v16  ;;  %v9578_v16 = vld [vmem:[#allocation6_spill] sm:$0xff] }
 0x1d9   : > { %3269 = vmatpush1.bf16.msra.mxu1 %v6574_v17  ;;  %v6587_v49 = vcombine.high %v2127_v23, %v2129_v46  ;;  %v6586_v20 = vcombine.low %v2127_v23, %v2129_v46  ;;  %v6594_v17 = vcombine.low %v2135_v44, %v2137_v34  ;;  %v2112_v23 = vunpack.c.h.s8.bf16 %v8204_v7 }
 0x1da   : > { %3270 = vmatprep.subr.bf16.mxu1 %v6579_v9  ;;  %v6599_v9 = vcombine.high %v2139_v59, %v2141_v33  ;;  %v2114_v46 = vunpack.c.h.s8.bf16 %v8209_v47  ;;  %v2116_v47 = vunpack.c.h.s8.bf16 %v8218_v55  ;;  %v8373_v55 = vld [vmem:[%s9566_s1 + $0x1c0] sm:$0xff]  ;;  %v2122_v44 = vunpack.c.h.s8.bf16 %v8241_v52 }
 0x1db   : > { %3408 = vmatpush1.bf16.msra.mxu0 %v7992_v53  ;;  %v2133_v53 = vunpack.c.l.s8.bf16 %v8286_v36  ;;  %v2155_v34 = vunpack.c.l.s8.bf16 %v8373_v55 }
 0x1dc   : > { %3409 = vmatprep.subr.bf16.mxu0 %v9578_v16  ;;  %v6598_v16 = vcombine.low %v2139_v59, %v2141_v33  ;;  %v6573_v7 = vcombine.high %v2112_v23, %v2114_v46  ;;  %v8397_v33 = vsub.s32 2, %v7300_v37 }
 0x1dd   : > { %3271 = vmatpush1.bf16.msra.mxu1 %v6578_v41  ;;  %v6591_v28 = vcombine.high %v2131_v51, %v2133_v53  ;;  %v6590_v25 = vcombine.low %v2131_v51, %v2133_v53  ;;  %v8339_v41 = vld [vmem:[%s9566_s1 + $0x1a0] sm:$0xff]  ;;  %v8355_v51 = vld [vmem:[%s9566_s1 + $0x1b0] sm:$0xff]  ;;  %v2118_v53 = vunpack.c.h.s8.bf16 %v8223_v29  ;;  %v8378_v29 = vld [vmem:[%s9566_s1 + $0x1c8] sm:$0xff] }
 0x1de   : > { %3272 = vmatprep.subr.bf16.mxu1 %v6583_v14  ;;  %v8344_v14 = vld [vmem:[%s9566_s1 + $0x1a8] sm:$0xff] }
 0x1df   : > { %3410 = vmatpush1.bf16.msra.mxu0 %v9579_v10  ;;  %v6602_v10 = vcombine.low %v2143_v35, %v2145_v15 }
 0x1e0   : > { %3411 = vmatprep.subr.bf16.mxu0 %v9580_v27  ;;  %v2151_v27 = vunpack.c.l.s8.bf16 %v8355_v51 }
 0x1e1   : > { %3273 = vmatpush1.bf16.msra.mxu1 %v6582_v45  ;;  %v2147_v45 = vunpack.c.l.s8.bf16 %v8339_v41 }
 0x1e2   : > { %3274 = vmatprep.subr.bf16.mxu1 %v6587_v49  ;;  %v2149_v49 = vunpack.c.l.s8.bf16 %v8344_v14 }
 0x1e3   : > { %3412 = vmatpush1.bf16.msra.mxu0 %v9581_v38  ;;  %v2157_v38 = vunpack.c.l.s8.bf16 %v8378_v29 }
 0x1e4   : > { %3413 = vmatprep.subr.bf16.mxu0 %v9582_v57  ;;  %v6576_v57 = vcombine.low %v2116_v47, %v2118_v53 }
 0x1e5   : > { %3275 = vmatpush1.bf16.msra.mxu1 %v6586_v20  ;;  %v6805_v8 = vpop.f32.mrb[4].mxu1 }
 0x1e6   : > { %3276 = vmatprep.subr.bf16.mxu1 %v6591_v28  ;;  %v6806_v54 = vpop.f32.mrb[5].mxu1  ;;  %v2120_v28 = vunpack.c.h.s8.bf16 %v8236_v39  ;;  %v8392_v39 = vld [vmem:[%s9566_s1 + $0x1d8] sm:$0xff] }
 0x1e7   : > { %3414 = vmatpush1.bf16.msra.mxu0 %v9583_v62  ;;  %v8330_v26 = vadd.f32 %v6806_v54, %v6805_v8  ;;  %v6808_v48 = vpop.f32.mrb[6].mxu1  ;;  %v2124_v8 = vunpack.c.h.s8.bf16 %v8253_v1  ;;  %v6615_v54 = vcombine.high %v2155_v34, %v2157_v38  ;;  %v8409_v1 = vld [vmem:[%s9566_s1 + $0x1e8] sm:$0xff] }
 0x1e8   : > { %3415 = vmatprep.subr.bf16.mxu0 %v9584_v40  ;;  %v6809_v63 = vpop.f32.mrb[7].mxu1  ;;  %v6581_v52 = vcombine.high %v2120_v28, %v2122_v44  ;;  %v2161_v48 = vunpack.c.l.s8.bf16 %v8392_v39  ;;  %v6580_v40 = vcombine.low %v2120_v28, %v2122_v44 }
 0x1e9   : > { %3277 = vmatpush1.bf16.msra.mxu1 %v6590_v25  ;;  %v8387_v25 = vld [vmem:[%s9566_s1 + $0x1d0] sm:$0xff]  ;;  %v8404_v63 = vld [vmem:[%s9566_s1 + $0x1e0] sm:$0xff] }
 0x1ea   : > { %3278 = vmatprep.subr.bf16.mxu1 %v6595_v58  ;;  %v2126_v58 = vunpack.c.h.s8.bf16 %v8258_v3  ;;  %v2159_v62 = vunpack.c.l.s8.bf16 %v8387_v25 }
 0x1eb   : > { %3416 = vmatpush1.bf16.msra.mxu0 %v8076_v61  ;;  %v6603_v61 = vcombine.high %v2143_v35, %v2145_v15  ;;  %v6614_v35 = vcombine.low %v2155_v34, %v2157_v38  ;;  %v1856_v15 = vrot.slane %v8170_v11, %v8397_v33 }
 0x1ec   : > { %3417 = vmatprep.subr.bf16.mxu0 %v8085_v56  ;;  %v8360_v56 = vld [vmem:[%s9566_s1 + $0x1b8] sm:$0xff]  ;;  %v6585_v3 = vcombine.high %v2124_v8, %v2126_v58 }
 0x1ed   : > { %3279 = vmatpush1.bf16.msra.mxu1 %v6594_v17  ;;  %v2153_v20 = vunpack.c.l.s8.bf16 %v8360_v56  ;;  %v2128_v17 = vunpack.c.h.s8.bf16 %v8267_v43  ;;  %v8425_v43 = vld [vmem:[%s9566_s1 + $0x1f8] sm:$0xff] }
 0x1ee   : > { %3280 = vmatprep.subr.bf16.mxu1 %v6599_v9  ;;  %v2130_v9 = vunpack.c.h.s8.bf16 %v8272_v42  ;;  %v2132_v42 = vunpack.c.h.s8.bf16 %v8281_v24  ;;  %v8437_v24 = vld [vmem:[%s9566_s1 + $0x200] sm:$0xff] }
 0x1ef   : > { %3418 = vmatpush1.bf16.msra.mxu0 %v8087_v32  ;;  %v6607_v32 = vcombine.high %v2147_v45, %v2149_v49  ;;  %v6610_v59 = vcombine.low %v2151_v27, %v2153_v20  ;;  %v2171_v34 = vunpack.c.l.s8.bf16 %v8437_v24 }
 0x1f0   : > { %3428 = vmatprep.subr.bf16.mxu0 %v8096_v60  ;;  %v6572_v60 = vcombine.low %v2112_v23, %v2114_v46  ;;  %v6619_v23 = vcombine.high %v2159_v62, %v2161_v48  ;;  %v2163_v46 = vunpack.c.l.s8.bf16 %v8404_v63  ;;  %v6589_v11 = vcombine.high %v2128_v17, %v2130_v9 }
 0x1f1   : > { %3281 = vmatpush1.bf16.msra.mxu1 %v6598_v16  ;;  %v2165_v16 = vunpack.c.l.s8.bf16 %v8409_v1 }
 0x1f2   : > { %3420 = vmatmul.mubr.bf16.vlgmr.msra.gmra.mrb[8].mxu0 %v8226_v2  ;;  %3282 = vmatprep.subr.bf16.mxu1 %v6603_v61  ;;  %v6577_v2 = vcombine.high %v2116_v47, %v2118_v53  ;;  %v6584_v61 = vcombine.low %v2124_v8, %v2126_v58  ;;  %v6618_v47 = vcombine.low %v2159_v62, %v2161_v48 }
 0x1f3   : > { %3429 = vmatpush1.bf16.msra.mxu0 %v8099_v5  ;;  %3460 = vmatprep.mubr.bf16.mxu0 %v8230_v18  ;;  %v6606_v5 = vcombine.low %v2147_v45, %v2149_v49  ;;  %v6611_v18 = vcombine.high %v2151_v27, %v2153_v20  ;;  %v8420_v45 = vld [vmem:[%s9566_s1 + $0x1f0] sm:$0xff]  ;;  %v2134_v49 = vunpack.c.h.s8.bf16 %v8286_v36  ;;  %v1882_v53 = vmul.f32 %v1856_v15, %v8194_v50 }
 0x1f4   : > { %3430 = vmatprep.subr.bf16.mxu0 %v6573_v7  ;;  %v1900_v7 = vrot.slane %v8182_v13, %v8397_v33  ;;  %v2169_v27 = vunpack.c.l.s8.bf16 %v8425_v43  ;;  %v6588_v20 = vcombine.low %v2128_v17, %v2130_v9  ;;  %v8442_v13 = vld [vmem:[%s9566_s1 + $0x208] sm:$0xff]  ;;  %v2136_v36 = vunpack.c.h.s8.bf16 %v8295_v30  ;;  %v8451_v30 = vld [vmem:[%s9566_s1 + $0x210] sm:$0xff] }
 0x1f5   : > { %3283 = vmatpush1.bf16.msra.mxu1 %v6602_v10  ;;  %v6623_v10 = vcombine.high %v2163_v46, %v2165_v16  ;;  %v6593_v50 = vcombine.high %v2132_v42, %v2134_v49  ;;  %v2173_v38 = vunpack.c.l.s8.bf16 %v8442_v13  ;;  %v2175_v9 = vunpack.c.l.s8.bf16 %v8451_v30 }
 0x1f6   : > { %3284 = vmatprep.subr.bf16.mxu1 %v6607_v32  ;;  %v2167_v32 = vunpack.c.l.s8.bf16 %v8420_v45  ;;  %v1926_v44 = vadd.f32 %v1900_v7, %v1882_v53  ;;  %v8494_v53 = vld [vmem:[%s9566_s1 + $0x300] sm:$0xff] }
 0x1f7   : > { %3431 = vmatpush1.bf16.msra.mxu0 %v6572_v60  ;;  %v2138_v60 = vunpack.c.h.s8.bf16 %v8300_v19  ;;  %v8456_v19 = vld [vmem:[%s9566_s1 + $0x218] sm:$0xff]  ;;  %v6631_v17 = vcombine.high %v2171_v34, %v2173_v38 }
 0x1f8   : > { %3432 = vmatprep.subr.bf16.mxu0 %v6577_v2  ;;  %v6622_v2 = vcombine.low %v2163_v46, %v2165_v16  ;;  %v6626_v48 = vcombine.low %v2167_v32, %v2169_v27  ;;  %v6630_v16 = vcombine.low %v2171_v34, %v2173_v38  ;;  %v2152_v34 = vunpack.c.h.s8.bf16 %v8355_v51 }
 0x1f9   : > { %3285 = vmatpush1.bf16.msra.mxu1 %v6606_v5  ;;  %v6627_v5 = vcombine.high %v2167_v32, %v2169_v27  ;;  %v6597_v58 = vcombine.high %v2136_v36, %v2138_v60  ;;  %v6596_v15 = vcombine.low %v2136_v36, %v2138_v60  ;;  %v2148_v32 = vunpack.c.h.s8.bf16 %v8339_v41 }
 0x1fa   : > { %3286 = vmatprep.subr.bf16.mxu1 %v6611_v18  ;;  %v2150_v27 = vunpack.c.h.s8.bf16 %v8344_v14  ;;  %v8517_v14 = vld [vmem:[%s9566_s1 + $0x240] sm:$0xff]  ;;  %v2154_v38 = vunpack.c.h.s8.bf16 %v8360_v56  ;;  %v2156_v56 = vunpack.c.h.s8.bf16 %v8373_v55  ;;  %v8550_v55 = vld [vmem:[%s9566_s1 + $0x268] sm:$0xff] }
 0x1fb   : > { %3433 = vmatpush1.bf16.msra.mxu0 %v6576_v57  ;;  %v6592_v57 = vcombine.low %v2132_v42, %v2134_v49  ;;  %v8484_v42 = vld [vmem:[%s9566_s1 + $0x230] sm:$0xff] }
 0x1fc   : > { %3434 = vmatprep.subr.bf16.mxu0 %v6581_v52  ;;  %v6608_v51 = vcombine.low %v2148_v32, %v2150_v27 }
 0x1fd   : > { %3287 = vmatpush1.bf16.msra.mxu1 %v6610_v59  ;;  %v2140_v59 = vunpack.c.h.s8.bf16 %v8309_v6  ;;  %v2146_v6 = vunpack.c.h.s8.bf16 %v8328_v31 }
 0x1fe   : > { %3288 = vmatprep.subr.bf16.mxu1 %v6615_v54  ;;  %v2142_v54 = vunpack.c.h.s8.bf16 %v8314_v12  ;;  %v8470_v12 = vld [vmem:[%s9566_s1 + $0x220] sm:$0xff] }
 0x1ff   : > { %3435 = vmatpush1.bf16.msra.mxu0 %v6580_v40  ;;  %v2179_v31 = vunpack.c.l.s8.bf16 %v8470_v12 }
 0x200   : > { %3436 = vmatprep.subr.bf16.mxu0 %v6585_v3  ;;  %v1933_v3 = vmax.f32 %v1926_v44, 0.0  ;;  %v6601_v46 = vcombine.high %v2140_v59, %v2142_v54  ;;  %v6600_v49 = vcombine.low %v2140_v59, %v2142_v54  ;;  %v8531_v59 = vld [vmem:[%s9566_s1 + $0x250] sm:$0xff]  ;;  %v8536_v54 = vld [vmem:[%s9566_s1 + $0x258] sm:$0xff] }
 0x201   : > { %3289 = vmatpush1.bf16.msra.mxu1 %v6614_v35  ;;  %v2177_v35 = vunpack.c.l.s8.bf16 %v8456_v19 }
 0x202   : > { %3290 = vmatprep.subr.bf16.mxu1 %v6619_v23  ;;  %v2144_v23 = vunpack.c.h.s8.bf16 %v8323_v22 }
 0x203   : > { %3437 = vmatpush1.bf16.msra.mxu0 %v6584_v61  ;;  %v8477_v61 = vpack.c.bf16 %v1933_v3, %v1933_v3  ;;  %v6635_v22 = vcombine.high %v2175_v9, %v2177_v35  ;;  %v6634_v36 = vcombine.low %v2175_v9, %v2177_v35  ;;  %v2193_v9 = vunpack.c.l.s8.bf16 %v8536_v54 }
 0x204   : > { %3438 = vmatprep.subr.bf16.mxu0 %v6589_v11  ;;  %v6605_v7 = vcombine.high %v2144_v23, %v2146_v6  ;;  %v6604_v41 = vcombine.low %v2144_v23, %v2146_v6  ;;  %v8545_v6 = vld [vmem:[%s9566_s1 + $0x260] sm:$0xff] }
 0x205   : > { %3291 = vmatpush1.bf16.msra.mxu1 %v6618_v47  ;;  %v6827_v28 = vpop.f32.mrb[8].mxu1  ;;  %v8489_v47 = vld [vmem:[%s9566_s1 + $0x238] sm:$0xff] }
 0x206   : > { %3292 = vmatprep.subr.bf16.mxu1 %v6623_v10  ;;  %v6828_v18 = vpop.f32.mrb[9].mxu1  ;;  %v8499_v10 = vld [vmem:[%s9566_s1 + $0x308] sm:$0xff] }
 0x207   : > { %3439 = vmatpush1.bf16.msra.mxu0 %v6588_v20  ;;  %v6829_v52 = vadd.f32 %v6828_v18, %v6827_v28  ;;  %v6830_v8 = vpop.f32.mrb[10].mxu1  ;;  %v2235_v20 = vunpack.c.l.s8.bf16 %v8494_v53  ;;  %v2185_v28 = vunpack.c.l.s8.bf16 %v8489_v47  ;;  %v6609_v18 = vcombine.high %v2148_v32, %v2150_v27 }
 0x208   : > { %3440 = vmatprep.subr.bf16.mxu0 %v6593_v50  ;;  %v6831_v62 = vpop.f32.mrb[11].mxu1  ;;  %v2237_v50 = vunpack.c.l.s8.bf16 %v8499_v10  ;;  %v2187_v8 = vunpack.c.l.s8.bf16 %v8517_v14 }
 0x209   : > { %3293 = vmatpush1.bf16.msra.mxu1 %v6622_v2  ;;  %v8461_v40 = vadd.f32 %v6829_v52, %v8330_v26  ;;  %v8475_v26 = vld [vmem:[%s9566_s1 + $0x228] sm:$0xff]  ;;  %v2183_v2 = vunpack.c.l.s8.bf16 %v8484_v42  ;;  %v2158_v62 = vunpack.c.h.s8.bf16 %v8378_v29  ;;  %v2160_v29 = vunpack.c.h.s8.bf16 %v8387_v25 }
 0x20a   : > { %3294 = vmatprep.subr.bf16.mxu1 %v6627_v5  ;;  %v2181_v11 = vunpack.c.l.s8.bf16 %v8475_v26  ;;  %v8512_v44 = vcombine.low %v2235_v20, %v2237_v50  ;;  %v8522_v5 = vld [vmem:[%s9566_s1 + $0x248] sm:$0xff] }
 0x20b   : > { %3441 = vmatpush1.bf16.msra.mxu0 %v6592_v57  ;;  %v6643_v52 = vcombine.high %v2183_v2, %v2185_v28  ;;  %v6642_v3 = vcombine.low %v2183_v2, %v2185_v28  ;;  %v6617_v23 = vcombine.high %v2156_v56, %v2158_v62  ;;  %v6616_v25 = vcombine.low %v2156_v56, %v2158_v62 }
 0x20c   : > { %3442 = vmatprep.subr.bf16.mxu0 %v6597_v58  ;;  %v6639_v60 = vcombine.high %v2179_v31, %v2181_v11  ;;  %v6638_v57 = vcombine.low %v2179_v31, %v2181_v11  ;;  %v2189_v58 = vunpack.c.l.s8.bf16 %v8522_v5  ;;  %v2164_v2 = vunpack.c.h.s8.bf16 %v8404_v63  ;;  %v8584_v63 = vld [vmem:[%s9566_s1 + $0x288] sm:$0xff] }
 0x20d   : > { %3295 = vmatpush1.bf16.msra.mxu1 %v6626_v48  ;;  %v6613_v48 = vcombine.high %v2152_v34, %v2154_v38  ;;  %v2166_v28 = vunpack.c.h.s8.bf16 %v8409_v1 }
 0x20e   : > { %3305 = vmatprep.subr.bf16.mxu1 %v6631_v17  ;;  %v2191_v17 = vunpack.c.l.s8.bf16 %v8531_v59  ;;  %v6647_v35 = vcombine.high %v2187_v8, %v2189_v58  ;;  %v6646_v31 = vcombine.low %v2187_v8, %v2189_v58  ;;  %v2168_v8 = vunpack.c.h.s8.bf16 %v8420_v45  ;;  %v8598_v45 = vld [vmem:[%s9566_s1 + $0x298] sm:$0xff] }
 0x20f   : > { %3443 = vmatpush1.bf16.msra.mxu0 %v6596_v15  ;;  %v6612_v15 = vcombine.low %v2152_v34, %v2154_v38  ;;  %v6625_v1 = vcombine.high %v2164_v2, %v2166_v28  ;;  %v2170_v58 = vunpack.c.h.s8.bf16 %v8425_v43 }
 0x210   : > { %3297 = vmatmul.mubr.bf16.vlgmr.msra.gmra.mrb[16].mxu1 %v8477_v61  ;;  %3444 = vmatprep.subr.bf16.mxu0 %v6601_v46  ;;  %v2162_v46 = vunpack.c.h.s8.bf16 %v8392_v39  ;;  %v6651_v11 = vcombine.high %v2191_v17, %v2193_v9  ;;  %v8565_v39 = vld [vmem:[%s9566_s1 + $0x270] sm:$0xff] }
 0x211   : > { %3306 = vmatpush1.bf16.msra.mxu1 %v6630_v16  ;;  %v2236_v16 = vunpack.c.h.s8.bf16 %v8494_v53  ;;  %v2199_v34 = vunpack.c.l.s8.bf16 %v8565_v39 }
 0x212   : > { %3307 = vmatprep.subr.bf16.mxu1 %v6635_v22  ;;  %v2238_v22 = vunpack.c.h.s8.bf16 %v8499_v10 }
 0x213   : > { %3445 = vmatpush1.bf16.msra.mxu0 %v6600_v49  ;;  %v2195_v49 = vunpack.c.l.s8.bf16 %v8545_v6 }
 0x214   : > { %3446 = vmatprep.subr.bf16.mxu0 %v6605_v7  ;;  %v2197_v7 = vunpack.c.l.s8.bf16 %v8550_v55  ;;  %v8558_v32 = vcombine.high %v2236_v16, %v2238_v22  ;;  %v8560_v27 = vcombine.low %v2236_v16, %v2238_v22 }
 0x215   : > { %3308 = vmatpush1.bf16.msra.mxu1 %v6634_v36  ;;  %v8570_v36 = vld [vmem:[%s9566_s1 + $0x278] sm:$0xff] }
 0x216   : > { %3309 = vmatprep.subr.bf16.mxu1 %v6639_v60  ;;  %v6621_v60 = vcombine.high %v2160_v29, %v2162_v46  ;;  %v2201_v38 = vunpack.c.l.s8.bf16 %v8570_v36  ;;  %v6654_v56 = vcombine.low %v2195_v49, %v2197_v7 }
 0x217   : > { %3447 = vmatpush1.bf16.msra.mxu0 %v6604_v41  ;;  %v6650_v41 = vcombine.low %v2191_v17, %v2193_v9  ;;  %v2205_v17 = vunpack.c.l.s8.bf16 %v8584_v63  ;;  %v6624_v9 = vcombine.low %v2164_v2, %v2166_v28  ;;  %v2178_v2 = vunpack.c.h.s8.bf16 %v8456_v19 }
 0x218   : > { %3448 = vmatprep.subr.bf16.mxu0 %v6609_v18  ;;  %v6655_v18 = vcombine.high %v2195_v49, %v2197_v7  ;;  %v2209_v7 = vunpack.c.l.s8.bf16 %v8598_v45 }
 0x219   : > { %3310 = vmatpush1.bf16.msra.mxu1 %v6638_v57  ;;  %v6620_v57 = vcombine.low %v2160_v29, %v2162_v46  ;;  %v2172_v29 = vunpack.c.h.s8.bf16 %v8437_v24  ;;  %v2174_v46 = vunpack.c.h.s8.bf16 %v8442_v13  ;;  %v8610_v24 = vld [vmem:[%s9566_s1 + $0x2a0] sm:$0xff]  ;;  %v8615_v13 = vld [vmem:[%s9566_s1 + $0x2a8] sm:$0xff] }
 0x21a   : > { %3311 = vmatprep.subr.bf16.mxu1 %v6643_v52  ;;  %v8579_v52 = vld [vmem:[%s9566_s1 + $0x280] sm:$0xff]  ;;  %v2214_v10 = vunpack.c.h.s8.bf16 %v8615_v13 }
 0x21b   : > { %3449 = vmatpush1.bf16.msra.mxu0 %v6608_v51 }
 0x21c   : > { %3450 = vmatprep.subr.bf16.mxu0 %v6613_v48  ;;  %v6659_v48 = vcombine.high %v2199_v34, %v2201_v38 }
 0x21d   : > { %3312 = vmatpush1.bf16.msra.mxu1 %v6642_v3  ;;  %v2203_v3 = vunpack.c.l.s8.bf16 %v8579_v52 }
 0x21e   : > { %3313 = vmatprep.subr.bf16.mxu1 %v6647_v35 }
 0x21f   : > { %3451 = vmatpush1.bf16.msra.mxu0 %v6612_v15  ;;  %v8593_v15 = vld [vmem:[%s9566_s1 + $0x290] sm:$0xff]  ;;  %v6662_v28 = vcombine.low %v2203_v3, %v2205_v17 }
 0x220   : > { %3452 = vmatprep.subr.bf16.mxu0 %v6617_v23  ;;  %v6629_v23 = vcombine.high %v2168_v8, %v2170_v58  ;;  %v2207_v49 = vunpack.c.l.s8.bf16 %v8593_v15 }
 0x221   : > { %3314 = vmatpush1.bf16.msra.mxu1 %v6646_v31  ;;  %v6658_v31 = vcombine.low %v2199_v34, %v2201_v38  ;;  %v2213_v34 = vunpack.c.l.s8.bf16 %v8615_v13  ;;  %v6632_v38 = vcombine.low %v2172_v29, %v2174_v46 }
 0x222   : > { %3315 = vmatprep.subr.bf16.mxu1 %v6651_v11  ;;  %v6663_v11 = vcombine.high %v2203_v3, %v2205_v17  ;;  %v8639_v3 = vld [vmem:[%s9566_s1 + $0x2c0] sm:$0xff]  ;;  %v2186_v17 = vunpack.c.h.s8.bf16 %v8489_v47 }
 0x223   : > { %3453 = vmatpush1.bf16.msra.mxu0 %v6616_v25  ;;  %v6628_v25 = vcombine.low %v2168_v8, %v2170_v58  ;;  %v2182_v8 = vunpack.c.h.s8.bf16 %v8475_v26  ;;  %v6666_v58 = vcombine.low %v2207_v49, %v2209_v7 }
 0x224   : > { %3454 = vmatprep.subr.bf16.mxu0 %v6621_v60  ;;  %v2176_v60 = vunpack.c.h.s8.bf16 %v8451_v30  ;;  %v8629_v30 = vld [vmem:[%s9566_s1 + $0x2b8] sm:$0xff] }
 0x225   : > { %v6849_v51 = vpop.f32.mrb[12].mxu1  ;;  %3316 = vmatpush1.bf16.msra.mxu1 %v6650_v41  ;;  %v6667_v41 = vcombine.high %v2207_v49, %v2209_v7 }
 0x226   : > { %v6850_v62 = vpop.f32.mrb[13].mxu1  ;;  %3317 = vmatprep.subr.bf16.mxu1 %v6655_v18  ;;  %v2211_v18 = vunpack.c.l.s8.bf16 %v8610_v24  ;;  %v6637_v19 = vcombine.high %v2176_v60, %v2178_v2 }
 0x227   : > { %3455 = vmatpush1.bf16.msra.mxu0 %v6620_v57  ;;  %v6851_v35 = vadd.f32 %v6850_v62, %v6849_v51  ;;  %v6852_v43 = vpop.f32.mrb[14].mxu1  ;;  %v8624_v57 = vld [vmem:[%s9566_s1 + $0x2b0] sm:$0xff]  ;;  %v2217_v62 = vunpack.c.l.s8.bf16 %v8629_v30 }
 0x228   : > { %3456 = vmatprep.subr.bf16.mxu0 %v6625_v1  ;;  %v6853_v16 = vpop.f32.mrb[15].mxu1  ;;  %v2180_v1 = vunpack.c.h.s8.bf16 %v8470_v12  ;;  %v6671_v51 = vcombine.high %v2211_v18, %v2213_v34  ;;  %v8644_v12 = vld [vmem:[%s9566_s1 + $0x2c8] sm:$0xff]  ;;  %v2219_v43 = vunpack.c.l.s8.bf16 %v8639_v3 }
 0x229   : > { %v8603_v22 = vadd.f32 %v6851_v35, %v8461_v40  ;;  %3318 = vmatpush1.bf16.msra.mxu1 %v6654_v56  ;;  %v6633_v40 = vcombine.high %v2172_v29, %v2174_v46  ;;  %v2215_v56 = vunpack.c.l.s8.bf16 %v8624_v57  ;;  %v8653_v46 = vld [vmem:[%s9566_s1 + $0x2d0] sm:$0xff]  ;;  %v2188_v16 = vunpack.c.h.s8.bf16 %v8517_v14  ;;  %v8672_v14 = vld [vmem:[%s9566_s1 + $0x2e8] sm:$0xff] }
 0x22a   : > { %3319 = vmatprep.subr.bf16.mxu1 %v6659_v48  ;;  %v6636_v48 = vcombine.low %v2176_v60, %v2178_v2  ;;  %v6641_v26 = vcombine.high %v2180_v1, %v2182_v8  ;;  %v6640_v29 = vcombine.low %v2180_v1, %v2182_v8  ;;  %v2223_v7 = vunpack.c.l.s8.bf16 %v8653_v46  ;;  %v8667_v60 = vld [vmem:[%s9566_s1 + $0x2e0] sm:$0xff]  ;;  %v8681_v1 = vld [vmem:[%s9566_s1 + $0x2f0] sm:$0xff] }
 0x22b   : > { %3457 = vmatpush1.bf16.msra.mxu0 %v6624_v9  ;;  %v6670_v9 = vcombine.low %v2211_v18, %v2213_v34  ;;  %v6675_v35 = vcombine.high %v2215_v56, %v2217_v62  ;;  %v2192_v2 = vunpack.c.h.s8.bf16 %v8531_v59  ;;  %v2227_v34 = vunpack.c.l.s8.bf16 %v8667_v60  ;;  %v8686_v59 = vld [vmem:[%s9566_s1 + $0x2f8] sm:$0xff] }
 0x22c   : > { %3458 = vmatprep.subr.bf16.mxu0 %v6629_v23  ;;  %v2221_v23 = vunpack.c.l.s8.bf16 %v8644_v12  ;;  %v2196_v8 = vunpack.c.h.s8.bf16 %v8545_v6 }
 0x22d   : > { %3320 = vmatpush1.bf16.msra.mxu1 %v6658_v31  ;;  %v2190_v31 = vunpack.c.h.s8.bf16 %v8522_v5 }
 0x22e   : > { %3321 = vmatprep.subr.bf16.mxu1 %v6663_v11  ;;  %v6674_v11 = vcombine.low %v2215_v56, %v2217_v62  ;;  %v6679_v49 = vcombine.high %v2219_v43, %v2221_v23  ;;  %v2231_v62 = vunpack.c.l.s8.bf16 %v8681_v1 }
 0x22f   : > { %3459 = vmatpush1.bf16.msra.mxu0 %v6628_v25  ;;  %v6649_v5 = vcombine.high %v2188_v16, %v2190_v31 }
 0x230   : > { %3469 = vmatprep.subr.bf16.mxu0 %v6633_v40 }
 0x231   : > { %3322 = vmatpush1.bf16.msra.mxu1 %v6662_v28  ;;  %v2194_v28 = vunpack.c.h.s8.bf16 %v8536_v54 }
 0x232   : > { %3461 = vmatmul.mubr.bf16.vlgmr.msra.gmra.mrb[8].mxu0 %v8477_v61  ;;  %3323 = vmatprep.subr.bf16.mxu1 %v6667_v41  ;;  %v2184_v61 = vunpack.c.h.s8.bf16 %v8484_v42  ;;  %v8658_v42 = vld [vmem:[%s9566_s1 + $0x2d8] sm:$0xff]  ;;  %v6678_v41 = vcombine.low %v2219_v43, %v2221_v23  ;;  %v2204_v23 = vunpack.c.h.s8.bf16 %v8579_v52 }
 0x233   : > { %3470 = vmatpush1.bf16.msra.mxu0 %v6632_v38  ;;  %v2225_v25 = vunpack.c.l.s8.bf16 %v8658_v42  ;;  %v2229_v38 = vunpack.c.l.s8.bf16 %v8672_v14  ;;  %v6653_v54 = vcombine.high %v2192_v2, %v2194_v28 }
 0x234   : > { %3471 = vmatprep.subr.bf16.mxu0 %v6637_v19  ;;  %v6645_v47 = vcombine.high %v2184_v61, %v2186_v17  ;;  %v6644_v40 = vcombine.low %v2184_v61, %v2186_v17  ;;  %v6648_v19 = vcombine.low %v2188_v16, %v2190_v31  ;;  %v2200_v17 = vunpack.c.h.s8.bf16 %v8565_v39 }
 0x235   : > { %3324 = vmatpush1.bf16.msra.mxu1 %v6666_v58  ;;  %v6683_v18 = vcombine.high %v2223_v7, %v2225_v25  ;;  %v2198_v58 = vunpack.c.h.s8.bf16 %v8550_v55  ;;  %v6687_v56 = vcombine.high %v2227_v34, %v2229_v38  ;;  %v6686_v6 = vcombine.low %v2227_v34, %v2229_v38 }
 0x236   : > { %3325 = vmatprep.subr.bf16.mxu1 %v6671_v51  ;;  %v6682_v51 = vcombine.low %v2223_v7, %v2225_v25  ;;  %v6695_v39 = vcombine.high %v2235_v20, %v2237_v50  ;;  %v2208_v31 = vunpack.c.h.s8.bf16 %v8593_v15  ;;  %v2216_v50 = vunpack.c.h.s8.bf16 %v8624_v57 }
 0x237   : > { %3472 = vmatpush1.bf16.msra.mxu0 %v6636_v48  ;;  %v2233_v48 = vunpack.c.l.s8.bf16 %v8686_v59  ;;  %v6657_v61 = vcombine.high %v2196_v8, %v2198_v58  ;;  %v2218_v15 = vunpack.c.h.s8.bf16 %v8629_v30  ;;  %v2220_v25 = vunpack.c.h.s8.bf16 %v8639_v3 }
 0x238   : > { %3473 = vmatprep.subr.bf16.mxu0 %v6641_v26  ;;  %v6652_v26 = vcombine.low %v2192_v2, %v2194_v28  ;;  %v2226_v2 = vunpack.c.h.s8.bf16 %v8658_v42  ;;  %v2228_v28 = vunpack.c.h.s8.bf16 %v8667_v60  ;;  %v2234_v34 = vunpack.c.h.s8.bf16 %v8686_v59  ;;  %v7076_v59 = vld [vmem:[%s9577_s2] sm:$0x7f] }
 0x239   : > { %3326 = vmatpush1.bf16.msra.mxu1 %v6670_v9  ;;  %v2202_v9 = vunpack.c.h.s8.bf16 %v8570_v36  ;;  %v6691_v55 = vcombine.high %v2231_v62, %v2233_v48  ;;  %v6677_v7 = vcombine.high %v2216_v50, %v2218_v15  ;;  %v1863_v60 = vsub.s32 4, %v7300_v37 }
 0x23a   : > { %3327 = vmatprep.subr.bf16.mxu1 %v6675_v35  ;;  %v6656_v35 = vcombine.low %v2196_v8, %v2198_v58 }
 0x23b   : > { %3474 = vmatpush1.bf16.msra.mxu0 %v6640_v29  ;;  %v6661_v43 = vcombine.high %v2200_v17, %v2202_v9  ;;  %v2206_v29 = vunpack.c.h.s8.bf16 %v8584_v63  ;;  %v6660_v36 = vcombine.low %v2200_v17, %v2202_v9  ;;  %v1908_v8 = vrot.slane %v7076_v59, %v1863_v60 }
 0x23c   : > { %3475 = vmatprep.subr.bf16.mxu0 %v6645_v47  ;;  %v6690_v47 = vcombine.low %v2231_v62, %v2233_v48 }
 0x23d   : > { %3328 = vmatpush1.bf16.msra.mxu1 %v6674_v11  ;;  %v6665_v16 = vcombine.high %v2204_v23, %v2206_v29  ;;  %v2210_v11 = vunpack.c.h.s8.bf16 %v8598_v45  ;;  %v6664_v52 = vcombine.low %v2204_v23, %v2206_v29 }
 0x23e   : > { %3329 = vmatprep.subr.bf16.mxu1 %v6679_v49  ;;  %v2212_v49 = vunpack.c.h.s8.bf16 %v8610_v24  ;;  %v6676_v24 = vcombine.low %v2216_v50, %v2218_v15  ;;  %v7011_v50 = vld [vmem:[%s9522_s8 + $0x50] ss:$8 sps:$4 sm:$0xff]   ;;  %v7016_v15 = vld [vmem:[%s9522_s8 + $0x64] ss:$8 sps:$4 sm:$0xff]  }
 0x23f   : > { %3476 = vmatpush1.bf16.msra.mxu0 %v6644_v40  ;;  %v6669_v63 = vcombine.high %v2208_v31, %v2210_v11  ;;  %v6668_v53 = vcombine.low %v2208_v31, %v2210_v11  ;;  %v2222_v40 = vunpack.c.h.s8.bf16 %v8644_v12  ;;  %v6999_v11 = vld [vmem:[%s9522_s8 + $0x10] ss:$8 sps:$4 sm:$0xff]  }
 0x240   : > { %3477 = vmatprep.subr.bf16.mxu0 %v6649_v5  ;;  %v6673_v20 = vcombine.high %v2212_v49, %v2214_v10  ;;  %v6672_v45 = vcombine.low %v2212_v49, %v2214_v10  ;;  %v2224_v5 = vunpack.c.h.s8.bf16 %v8653_v46  ;;  %v7005_v49 = vld [vmem:[%s9522_s8 + $0x30] ss:$8 sps:$4 sm:$0xff]   ;;  %v7010_v10 = vld [vmem:[%s9522_s8 + $0x44] ss:$8 sps:$4 sm:$0xff]  }
 0x241   : > { %3330 = vmatpush1.bf16.msra.mxu1 %v6678_v41  ;;  %v6681_v13 = vcombine.high %v2220_v25, %v2222_v40  ;;  %v6680_v57 = vcombine.low %v2220_v25, %v2222_v40  ;;  %v2230_v41 = vunpack.c.h.s8.bf16 %v8672_v14  ;;  %v1867_v14 = vsub.s32 5, %v7300_v37  ;;  %v7017_v25 = vld [vmem:[%s9522_s8 + $0x70] ss:$8 sps:$4 sm:$0xff]   ;;  %v7022_v40 = vld [vmem:[%s9522_s8 + $0x84] ss:$8 sps:$4 sm:$0xff]  }
 0x242   : > { %3331 = vmatprep.subr.bf16.mxu1 %v6683_v18  ;;  %v6685_v30 = vcombine.high %v2224_v5, %v2226_v2  ;;  %v6684_v3 = vcombine.low %v2224_v5, %v2226_v2  ;;  %v2232_v18 = vunpack.c.h.s8.bf16 %v8681_v1  ;;  %v7023_v5 = vld [vmem:[%s9522_s8 + $0x90] ss:$8 sps:$4 sm:$0xff]   ;;  %v7028_v2 = vld [vmem:[%s9522_s8 + $0xa4] ss:$8 sps:$4 sm:$0xff]  }
 0x243   : > { %3478 = vmatpush1.bf16.msra.mxu0 %v6648_v19  ;;  %v6689_v12 = vcombine.high %v2228_v28, %v2230_v41  ;;  %v6688_v46 = vcombine.low %v2228_v28, %v2230_v41  ;;  %v7075_v19 = vld [vmem:[%s9576_s6] sm:$0x7f]  ;;  %v7029_v28 = vld [vmem:[%s9522_s8 + $0xb0] ss:$8 sps:$4 sm:$0xff]  }
 0x244   : > { %3479 = vmatprep.subr.bf16.mxu0 %v6653_v54  ;;  %v6693_v42 = vcombine.high %v2232_v18, %v2234_v34  ;;  %v6692_v38 = vcombine.low %v2232_v18, %v2234_v34  ;;  %v1864_v54 = vrot.slane %v7075_v19, %v1863_v60  ;;  %v1868_v1 = vrot.slane %v7075_v19, %v1867_v14  ;;  %v7034_v41 = vld [vmem:[%s9522_s8 + $0xc4] ss:$8 sps:$4 sm:$0xff]   ;;  %v7035_v18 = vld [vmem:[%s9522_s8 + $0xd0] ss:$8 sps:$4 sm:$0xff]  }
 0x245   : > { %3332 = vmatpush1.bf16.msra.mxu1 %v6682_v51  ;;  %v1912_v51 = vrot.slane %v7076_v59, %v1867_v14  ;;  %v7040_v34 = vld [vmem:[%s9522_s8 + $0xe4] ss:$8 sps:$4 sm:$0xff]  }
 0x246   : > { %3333 = vmatprep.subr.bf16.mxu1 %v6687_v56  ;;  %v1871_v56 = vsub.s32 6, %v7300_v37  ;;  %v7088_v37 = vmov 0   ;;  %v7046_v60 = vld [vmem:[%s9522_s8 + $0x104] ss:$8 sps:$4 sm:$0xff]  }
 0x247   : > { %3480 = vmatpush1.bf16.msra.mxu0 %v6652_v26  ;;  %v4010_v14 = vld [vmem:[%s9524_s10] sm:$0xff] }
 0x248   : > { %3481 = vmatprep.subr.bf16.mxu0 %v6657_v61 }
 0x249   : > { %3334 = vmatpush1.bf16.msra.mxu1 %v6686_v6 }
 0x24a   : > { %3335 = vmatprep.subr.bf16.mxu1 %v6691_v55  ;;  %v1872_v55 = vrot.slane %v7075_v19, %v1871_v56  ;;  %v4011_v19 = vld [vmem:[%s9524_s10 + $0x8] sm:$0xff] }
 0x24b   : > { %3482 = vmatpush1.bf16.msra.mxu0 %v6656_v35 }
 0x24c   : > { %3483 = vmatprep.subr.bf16.mxu0 %v6661_v43  ;;  %v1886_v29 = vmul.f32 %v1872_v55, %v8603_v22  ;;  %v6998_v22 = vld [vmem:[%s9522_s8 + $0x4] ss:$8 sps:$4 sm:$0xff]   ;;  %v4020_v55 = vld [vmem:[%s9524_s10 + $0x50] sm:$0xff] }
 0x24d   : > { %3336 = vmatpush1.bf16.msra.mxu1 %v6690_v47  ;;  %v1916_v47 = vrot.slane %v7076_v59, %v1871_v56  ;;  %v6856_v59 = vpack.c.bf16 %v4011_v19, %v4010_v14  ;;  %v4015_v56 = vld [vmem:[%s9524_s10 + $0x28] sm:$0xff]  ;;  %v7053_v19 = vld [vmem:[%s9522_s8 + $0x130] ss:$8 sps:$4 sm:$0xff]  }
 0x24e   : > { %3346 = vmatprep.subr.bf16.mxu1 %v6695_v39 }
 0x24f   : > { %3484 = vmatpush1.bf16.msra.mxu0 %v6660_v36  ;;  %v1930_v36 = vadd.f32 %v1916_v47, %v1886_v29  ;;  %v4023_v29 = vld [vmem:[%s9524_s10 + $0x68] sm:$0xff] }
 0x250   : > { %3485 = vmatprep.subr.bf16.mxu0 %v6665_v16 }
 0x251   : > { %v1937_v16 = vmax.f32 %v1930_v36, 0.0 }
 0x253   : > { %3486 = vmatpush1.bf16.msra.mxu0 %v6664_v52  ;;  %v1944_v31 = vpack.c.bf16 %v1937_v16, %v1937_v16  ;;  %v7002_v52 = vld [vmem:[%s9522_s8 + $0x20] ss:$8 sps:$4 sm:$0xff]  }
 0x254   : > { %3487 = vmatprep.subr.bf16.mxu0 %v6669_v63  ;;  %v7007_v63 = vld [vmem:[%s9522_s8 + $0x34] ss:$8 sps:$4 sm:$0xff]  }
 0x257   : > { %3488 = vmatpush1.bf16.msra.mxu0 %v6668_v53  ;;  %v7008_v53 = vld [vmem:[%s9522_s8 + $0x40] ss:$8 sps:$4 sm:$0xff]  }
 0x258   : > { %3489 = vmatprep.subr.bf16.mxu0 %v6673_v20  ;;  %v7013_v20 = vld [vmem:[%s9522_s8 + $0x54] ss:$8 sps:$4 sm:$0xff]  }
 0x25b   : > { %3490 = vmatpush1.bf16.msra.mxu0 %v6672_v45  ;;  %v7014_v45 = vld [vmem:[%s9522_s8 + $0x60] ss:$8 sps:$4 sm:$0xff]  }
 0x25c   : > { %3491 = vmatprep.subr.bf16.mxu0 %v6677_v7  ;;  %v7019_v7 = vld [vmem:[%s9522_s8 + $0x74] ss:$8 sps:$4 sm:$0xff]  }
 0x25f   : > { %3492 = vmatpush1.bf16.msra.mxu0 %v6676_v24  ;;  %v7020_v24 = vld [vmem:[%s9522_s8 + $0x80] ss:$8 sps:$4 sm:$0xff]  }
 0x260   : > { %3493 = vmatprep.subr.bf16.mxu0 %v6681_v13  ;;  %v7025_v13 = vld [vmem:[%s9522_s8 + $0x94] ss:$8 sps:$4 sm:$0xff]  }
 0x263   : > { %3494 = vmatpush1.bf16.msra.mxu0 %v6680_v57  ;;  %v7026_v57 = vld [vmem:[%s9522_s8 + $0xa0] ss:$8 sps:$4 sm:$0xff]  }
 0x264   : > { %3495 = vmatprep.subr.bf16.mxu0 %v6685_v30  ;;  %v7031_v30 = vld [vmem:[%s9522_s8 + $0xb4] ss:$8 sps:$4 sm:$0xff]  }
 0x267   : > { %3496 = vmatpush1.bf16.msra.mxu0 %v6684_v3  ;;  %v7032_v3 = vld [vmem:[%s9522_s8 + $0xc0] ss:$8 sps:$4 sm:$0xff]  }
 0x268   : > { %3497 = vmatprep.subr.bf16.mxu0 %v6689_v12  ;;  %v7037_v12 = vld [vmem:[%s9522_s8 + $0xd4] ss:$8 sps:$4 sm:$0xff]  }
 0x26b   : > { %3498 = vmatpush1.bf16.msra.mxu0 %v6688_v46  ;;  %v7038_v46 = vld [vmem:[%s9522_s8 + $0xe0] ss:$8 sps:$4 sm:$0xff]  }
 0x26c   : > { %3499 = vmatprep.subr.bf16.mxu0 %v6693_v42  ;;  %v7043_v42 = vld [vmem:[%s9522_s8 + $0xf4] ss:$8 sps:$4 sm:$0xff]  }
 0x26f   : > { %3500 = vmatpush1.bf16.msra.mxu0 %v6692_v38  ;;  %v7041_v38 = vld [vmem:[%s9522_s8 + $0xf0] ss:$8 sps:$4 sm:$0xff]  }
 0x285   : > { %v1716_v58 = vpop.f32.mrb[4].mxu0 }
 0x286   : > { %v1884_v62 = vmul.f32 %v1864_v54, %v1716_v58  ;;  %v1718_v48 = vpop.f32.mrb[5].mxu0  ;;  %v4012_v54 = vld [vmem:[%s9524_s10 + $0x10] sm:$0xff] }
 0x287   : > { %v1885_v26 = vmul.f32 %v1868_v1, %v1718_v48  ;;  %v1720_v61 = vpop.f32.mrb[6].mxu0  ;;  %v7089_v1 = vmov 0.0|0.0   ;;  %v4016_v48 = vld [vmem:[%s9524_s10 + $0x30] sm:$0xff] }
 0x288   : > { %v1928_v17 = vadd.f32 %v1908_v8, %v1884_v62  ;;  %v1721_v9 = vpop.f32.mrb[7].mxu0  ;;  %6855 = vmatprep.subr.bf16.mxu0 %v7089_v1  ;;  %v4013_v8 = vld [vmem:[%s9524_s10 + $0x18] sm:$0xff] }
 0x289   : > { %v1929_v6 = vadd.f32 %v1912_v51, %v1885_v26  ;;  %v6859_v58 = vpack.c.bf16 %v4013_v8, %v4012_v54  ;;  %v4014_v51 = vld [vmem:[%s9524_s10 + $0x20] sm:$0xff]  ;;  %v4017_v26 = vld [vmem:[%s9524_s10 + $0x38] sm:$0xff]  ;;  %v4019_v9 = vld [vmem:[%s9524_s10 + $0x48] sm:$0xff] }
 0x28a   : > { %v1935_v35 = vmax.f32 %v1928_v17, 0.0  ;;  %v6862_v62 = vpack.c.bf16 %v4015_v56, %v4014_v51  ;;  %v6865_v61 = vpack.c.bf16 %v4017_v26, %v4016_v48  ;;  %v4018_v17 = vld [vmem:[%s9524_s10 + $0x40] sm:$0xff]  ;;  %v7061_v8 = vld [vmem:[%s9522_s8 + $0x154] ss:$8 sps:$4 sm:$0xff]  }
 0x28b   : > { %v1936_v43 = vmax.f32 %v1929_v6, 0.0  ;;  %v6868_v6 = vpack.c.bf16 %v4019_v9, %v4018_v17  ;;  %v7058_v54 = vld [vmem:[%s9522_s8 + $0x144] ss:$8 sps:$4 sm:$0xff]   ;;  %v7065_v17 = vld [vmem:[%s9522_s8 + $0x170] ss:$8 sps:$4 sm:$0xff]  }
 0x28c   : > { %v1942_v39 = vpack.c.bf16 %v1935_v35, %v1935_v35  ;;  %v4021_v35 = vld [vmem:[%s9524_s10 + $0x58] sm:$0xff]  ;;  %v7064_v56 = vld [vmem:[%s9522_s8 + $0x164] ss:$8 sps:$4 sm:$0xff]  }
 0x28d   : > { %v1943_v23 = vpack.c.bf16 %v1936_v43, %v1936_v43  ;;  %v6871_v43 = vpack.c.bf16 %v4021_v35, %v4020_v55 }
 0x28f   : > { %3337 = vmatprep.mubr.bf16.mxu1 %v1943_v23  ;;  %3501 = vmatprep.mubr.bf16.mxu0 %v1943_v23  ;;  %v4022_v23 = vld [vmem:[%s9524_s10 + $0x60] sm:$0xff] }
 0x290   : > { %3338 = vmatmul.mubr.bf16.vlgmr.msra.gmra.mrb[16].mxu1 %v1942_v39  ;;  %3502 = vmatmul.mubr.bf16.vlgmr.msra.gmra.mrb[8].mxu0 %v1942_v39  ;;  %v6874_v47 = vpack.c.bf16 %v4023_v29, %v4022_v23  ;;  %v4025_v23 = vld [vmem:[%s9524_s10 + $0x78] sm:$0xff] }
 0x291   : > { %3347 = vmatpush1.bf16.msra.mxu1 %v8512_v44  ;;  %3378 = vmatprep.mubr.bf16.mxu1 %v7088_v37  ;;  %v6996_v44 = vld [vmem:[%s9522_s8] ss:$8 sps:$4 sm:$0xff]  }
 0x292   : > { %3510 = vmatprep.subr.bf16.mxu1 %v8558_v32  ;;  %v7001_v32 = vld [vmem:[%s9522_s8 + $0x14] ss:$8 sps:$4 sm:$0xff]   ;;  %6857 = vmatpush1.bf16.msra.mxu0 %v6856_v59  ;;  %v7056_v59 = vld [vmem:[%s9522_s8 + $0x140] ss:$8 sps:$4 sm:$0xff]  }
 0x293   : > { %6858 = vmatprep.subr.bf16.mxu0 %v7089_v1 }
 0x296   : > { %6860 = vmatpush1.bf16.msra.mxu0 %v6859_v58  ;;  %v7059_v58 = vld [vmem:[%s9522_s8 + $0x150] ss:$8 sps:$4 sm:$0xff]  }
 0x297   : > { %6861 = vmatprep.subr.bf16.mxu0 %v7089_v1 }
 0x29a   : > { %6863 = vmatpush1.bf16.msra.mxu0 %v6862_v62  ;;  %v7062_v62 = vld [vmem:[%s9522_s8 + $0x160] ss:$8 sps:$4 sm:$0xff]  }
 0x29b   : > { %6864 = vmatprep.subr.bf16.mxu0 %v7089_v1 }
 0x29c   : > { %6698 = vmatmul.mubr.msk.bf16.vlgmr.msra.gmra.mrb[16].mxu1 %vm3219_vm0, %v1944_v31 }
 0x29d   : > { %3511 = vmatpush1.bf16.msra.mxu1 %v8560_v27  ;;  %3542 = vmatprep.mubr.bf16.mxu1 %v7088_v37  ;;  %v7004_v27 = vld [vmem:[%s9522_s8 + $0x24] ss:$8 sps:$4 sm:$0xff]  }
 0x29e   : > { %3926 = vmatprep.subr.bf16.mxu1 %v6998_v22  ;;  %6866 = vmatpush1.bf16.msra.mxu0 %v6865_v61  ;;  %v8884_v22 = vld [vmem:[%s9521_s7] sm:$0xf]  ;;  %v7067_v61 = vld [vmem:[%s9522_s8 + $0x174] ss:$8 sps:$4 sm:$0xff]  }
 0x29f   : > { %6867 = vmatprep.subr.bf16.mxu0 %v7089_v1  ;;  %v3590_v26 = vrot.slane %v8884_v22, %v8397_v33 }
 0x2a2   : > { %6869 = vmatpush1.bf16.msra.mxu0 %v6868_v6  ;;  %v7070_v6 = vld [vmem:[%s9522_s8 + $0x184] ss:$8 sps:$4 sm:$0xff]  }
 0x2a3   : > { %6870 = vmatprep.subr.bf16.mxu0 %v7089_v1 }
 0x2a4   : > { %6699 = vmatmul.mubr.msk.bf16.vlgmr.msra.gmra.mrb[20].mxu1 %vm3219_vm0, %v1944_v31  ;;  %v3551_v31 = vld [vmem:[%s9585_s26] sm:$0xf] }
 0x2a5   : > { %3927 = vmatpush1.bf16.msra.mxu1 %v6996_v44  ;;  %v3556_v44 = vrot.slane %v3551_v31, %v8164_v21  ;;  %v3564_v51 = vrot.slane %v3551_v31, %v8397_v33  ;;  %v7068_v33 = vld [vmem:[%s9522_s8 + $0x180] ss:$8 sps:$4 sm:$0xff]  }
 0x2a6   : > { %3928 = vmatprep.subr.bf16.mxu1 %v7001_v32  ;;  %6872 = vmatpush1.bf16.msra.mxu0 %v6871_v43  ;;  %v3560_v32 = vrot.slane %v3551_v31, %v8173_v0  ;;  %v4024_v43 = vld [vmem:[%s9524_s10 + $0x70] sm:$0xff] }
 0x2a7   : > { %6873 = vmatprep.subr.bf16.mxu0 %v7089_v1  ;;  %v6877_v29 = vpack.c.bf16 %v4025_v23, %v4024_v43 }
 0x2a9   : > { %3929 = vmatpush1.bf16.msra.mxu1 %v6999_v11  ;;  %v3582_v11 = vrot.slane %v8884_v22, %v8164_v21 }
 0x2aa   : > { %3930 = vmatprep.subr.bf16.mxu1 %v7004_v27  ;;  %6875 = vmatpush1.bf16.msra.mxu0 %v6874_v47  ;;  %v4026_v47 = vld [vmem:[%s9524_s10 + $0x80] sm:$0xff] }
 0x2ab   : > { %6876 = vmatprep.subr.bf16.mxu0 %v7089_v1 }
 0x2ad   : > { %3931 = vmatpush1.bf16.msra.mxu1 %v7002_v52  ;;  %v3586_v52 = vrot.slane %v8884_v22, %v8173_v0 }
 0x2ae   : > { %3932 = vmatprep.subr.bf16.mxu1 %v7007_v63  ;;  %6878 = vmatpush1.bf16.msra.mxu0 %v6877_v29 }
 0x2af   : > { %6879 = vmatprep.subr.bf16.mxu0 %v7089_v1 }
 0x2b1   : > { %3933 = vmatpush1.bf16.msra.mxu1 %v7005_v49 }
 0x2b2   : > { %3934 = vmatprep.subr.bf16.mxu1 %v7010_v10 }
 0x2b5   : > { %3935 = vmatpush1.bf16.msra.mxu1 %v7008_v53 }
 0x2b6   : > { %3936 = vmatprep.subr.bf16.mxu1 %v7013_v20 }
 0x2b9   : > { %3937 = vmatpush1.bf16.msra.mxu1 %v7011_v50 }
 0x2ba   : > { %3938 = vmatprep.subr.bf16.mxu1 %v7016_v15 }
 0x2bd   : > { %3939 = vmatpush1.bf16.msra.mxu1 %v7014_v45 }
 0x2be   : > { %3940 = vmatprep.subr.bf16.mxu1 %v7019_v7 }
 0x2c1   : > { %3941 = vmatpush1.bf16.msra.mxu1 %v7017_v25 }
 0x2c2   : > { %3942 = vmatprep.subr.bf16.mxu1 %v7022_v40 }
 0x2c5   : > { %3943 = vmatpush1.bf16.msra.mxu1 %v7020_v24  ;;  %v3568_v24 = vrot.slane %v3551_v31, %v8176_v4 }
 0x2c6   : > { %3944 = vmatprep.subr.bf16.mxu1 %v7025_v13  ;;  %v7044_v13 = vld [vmem:[%s9522_s8 + $0x100] ss:$8 sps:$4 sm:$0xff]  }
 0x2c9   : > { %3945 = vmatpush1.bf16.msra.mxu1 %v7023_v5 }
 0x2ca   : > { %3946 = vmatprep.subr.bf16.mxu1 %v7028_v2 }
 0x2cd   : > { %3947 = vmatpush1.bf16.msra.mxu1 %v7026_v57 }
 0x2ce   : > { %3948 = vmatprep.subr.bf16.mxu1 %v7031_v30  ;;  %v7049_v30 = vld [vmem:[%s9522_s8 + $0x114] ss:$8 sps:$4 sm:$0xff]  }
 0x2d1   : > { %3949 = vmatpush1.bf16.msra.mxu1 %v7029_v28 }
 0x2d2   : > { %3950 = vmatprep.subr.bf16.mxu1 %v7034_v41  ;;  %v3594_v41 = vrot.slane %v8884_v22, %v8176_v4  ;;  %v7050_v4 = vld [vmem:[%s9522_s8 + $0x120] ss:$8 sps:$4 sm:$0xff]  }
 0x2d5   : > { %3951 = vmatpush1.bf16.msra.mxu1 %v7032_v3 }
 0x2d6   : > { %3952 = vmatprep.subr.bf16.mxu1 %v7037_v12 }
 0x2d9   : > { %3953 = vmatpush1.bf16.msra.mxu1 %v7035_v18 }
 0x2da   : > { %3954 = vmatprep.subr.bf16.mxu1 %v7040_v34  ;;  %v7047_v34 = vld [vmem:[%s9522_s8 + $0x110] ss:$8 sps:$4 sm:$0xff]  }
 0x2dd   : > { %3955 = vmatpush1.bf16.msra.mxu1 %v7038_v46  ;;  %v7052_v46 = vld [vmem:[%s9522_s8 + $0x124] ss:$8 sps:$4 sm:$0xff]  }
 0x2de   : > { %3956 = vmatprep.subr.bf16.mxu1 %v7043_v42 }
 0x2e1   : > { %3957 = vmatpush1.bf16.msra.mxu1 %v7041_v38 }
 0x2e2   : > { %3967 = vmatprep.subr.bf16.mxu1 %v7046_v60  ;;  %v7055_v60 = vld [vmem:[%s9522_s8 + $0x134] ss:$8 sps:$4 sm:$0xff]  }
 0x363   : > { %v3503_v39 = vpop.f32.mrb[8].mxu0 }
 0x364   : > { %v3505_v37 = vpop.f32.mrb[9].mxu0 }
 0x365   : > { %v3507_v36 = vpop.f32.mrb[10].mxu0 }
 0x366   : > { %v3508_v16 = vpop.f32.mrb[11].mxu0  ;;  %v3661_v36 = vld [vmem:[%s9523_s9] sm:$0x3] }
 0x367   : > { %v3666_v16 = vrot.slane %v3661_v36, %v8164_v21  ;;  %v3670_v31 = vrot.slane %v3661_v36, %v8173_v0 }
 0x36f   : > { %v3380_v27 = vpop.f32.mrb[16].mxu1 }
 0x370   : > { %v3573_v63 = vmul.f32 %v3556_v44, %v3380_v27  ;;  %v3382_v49 = vpop.f32.mrb[17].mxu1 }
 0x371   : > { %v3574_v10 = vmul.f32 %v3560_v32, %v3382_v49  ;;  %v3384_v53 = vpop.f32.mrb[18].mxu1  ;;  %v6751_v49 = vld [vmem:[%s9586_s13] ss:$0 sm:$0xff] }
 0x372   : > { %v3599_v20 = vadd.f32 %v3582_v11, %v3573_v63  ;;  %v3385_v50 = vpop.f32.mrb[19].mxu1 }
 0x373   : > { %v3600_v15 = vadd.f32 %v3586_v52, %v3574_v10 }
 0x374   : > { %v3603_v45 = vmax.f32 %v3599_v20, 0.0 }
 0x375   : > { %v3604_v7 = vmax.f32 %v3600_v15, 0.0 }
 0x376   : > { %v3607_v5 = vpack.c.bf16 %v3603_v45, %v3603_v45 }
 0x377   : > { %v3608_v25 = vpack.c.bf16 %v3604_v7, %v3604_v7  ;;  %v3544_v40 = vpop.f32.mrb[20].mxu1 }
 0x378   : > { %v6882_v2 = vadd.f32 %v3544_v40, %v3503_v39  ;;  %v3546_v57 = vpop.f32.mrb[21].mxu1  ;;  %v4027_v39 = vld [vmem:[%s9524_s10 + $0x88] sm:$0xff] }
 0x379   : > { %v6883_v28 = vadd.f32 %v3546_v57, %v3505_v37  ;;  %v3548_v3 = vpop.f32.mrb[22].mxu1  ;;  %3958 = vmatprep.mubr.bf16.mxu1 %v3608_v25  ;;  %v6880_v37 = vpack.c.bf16 %v4027_v39, %v4026_v47  ;;  %v6754_v57 = vld [vmem:[%s9588_s3] ss:$0 sm:$0xff] }
 0x37a   : > { %v3549_v12 = vpop.f32.mrb[23].mxu1  ;;  %3959 = vmatmul.mubr.bf16.vlgmr.msra.gmra.mrb[24].mxu1 %v3607_v5  ;;  %v3575_v48 = vmul.f32 %v6882_v2, %v3564_v51  ;;  %v6753_v5 = vld [vmem:[%s9587_s5] ss:$0 sm:$0xff] }
 0x37b   : > { %v3576_v18 = vmul.f32 %v6883_v28, %v3568_v24  ;;  %3968 = vmatpush1.bf16.msra.mxu1 %v7044_v13  ;;  %6881 = vmatpush1.bf16.msra.mxu0 %v6880_v37 }
 0x37c   : > { %3969 = vmatprep.subr.bf16.mxu1 %v7049_v30  ;;  %v3601_v9 = vadd.f32 %v3590_v26, %v3575_v48 }
 0x37d   : > { %v3602_v42 = vadd.f32 %v3594_v41, %v3576_v18 }
 0x37e   : > { %v3605_v55 = vmax.f32 %v3601_v9, 0.0 }
 0x37f   : > { %v3606_v38 = vmax.f32 %v3602_v42, 0.0  ;;  %3970 = vmatpush1.bf16.msra.mxu1 %v7047_v34 }
 0x380   : > { %3971 = vmatprep.subr.bf16.mxu1 %v7052_v46  ;;  %v3609_v35 = vpack.c.bf16 %v3605_v55, %v3605_v55 }
 0x381   : > { %v3610_v14 = vpack.c.bf16 %v3606_v38, %v3606_v38 }
 0x383   : > { %3972 = vmatpush1.bf16.msra.mxu1 %v7050_v4  ;;  %6750 = vmatprep.mubr.msk.bf16.mxu1 %vm3219_vm0, %v3610_v14 }
 0x384   : > { %3973 = vmatprep.subr.bf16.mxu1 %v7055_v60 }
 0x387   : > { %3974 = vmatpush1.bf16.msra.mxu1 %v7053_v19 }
 0x388   : > { %3975 = vmatprep.subr.bf16.mxu1 %v7058_v54 }
 0x38b   : > { %3976 = vmatpush1.bf16.msra.mxu1 %v7056_v59 }
 0x38c   : > { %3977 = vmatprep.subr.bf16.mxu1 %v7061_v8 }
 0x38f   : > { %3978 = vmatpush1.bf16.msra.mxu1 %v7059_v58 }
 0x390   : > { %3979 = vmatprep.subr.bf16.mxu1 %v7064_v56 }
 0x393   : > { %3980 = vmatpush1.bf16.msra.mxu1 %v7062_v62 }
 0x394   : > { %3981 = vmatprep.subr.bf16.mxu1 %v7067_v61 }
 0x397   : > { %3982 = vmatpush1.bf16.msra.mxu1 %v7065_v17 }
 0x398   : > { %3983 = vmatprep.subr.bf16.mxu1 %v7070_v6 }
 0x39b   : > { %3984 = vmatpush1.bf16.msra.mxu1 %v7068_v33 }
 0x39e   : > { %4000 = vmatmul.mubr.bf16.vlgmr.msra.gmra.mrb[24].mxu1 %v3609_v35 }
 0x471   : > { %v4001_v22 = vpop.f32.mrb[24].mxu1 }
 0x472   : > { %v6884_v1 = vadd.f32 %v4001_v22, %v3666_v16  ;;  %v4003_v44 = vpop.f32.mrb[25].mxu1 }
 0x473   : > { %v6885_v32 = vadd.f32 %v4003_v44, %v3670_v31  ;;  %v4005_v11 = vpop.f32.mrb[26].mxu1 }
 0x474   : > { %v4006_v27 = vpop.f32.mrb[27].mxu1  ;;  %v4008_v63 = vmax.f32 %v6884_v1, 0.0 }
 0x475   : > { %v4009_v52 = vmax.f32 %v6885_v32, 0.0 }
 0x477   : > { %6752 = vmatprep.mubr.msk.f32.mxu0 %vm3219_vm0, %v4009_v52 }
 0x478   : > { %4103 = vmatmul.mubr.f32.vlgmr.msra.gmra.mrb[12].mxu0 %v4008_v63 }
 0x54b   : > { %v4104_v10 = vpop.f32.mrb[12].mxu0 }
 0x54c   : > { %v4105_v21 = vadd.f32 %v6751_v49, %v4104_v10  ;;  %v4106_v53 = vpop.f32.mrb[13].mxu0 }
 0x54e   : > { %v4109_v0 = vsel %vm4108_vm1, %v4105_v21, 0.0 }
 0x54f   : > { %4110 = vadd.xlane.f32.xlu0 %v4109_v0 }
 0x5dc   : > { %v4111_v20 = vpop.xlane.xlu0 %4110 }
 0x5dd   : > { %v4113_v50 = vmul.f32 0.03125, %v4111_v20 }
 0x5df   : > { %v4114_v15 = vsub.f32 %v4105_v21, %v4113_v50 }
 0x5e1   : > { %v4115_v45 = vmul.f32 %v4114_v15, %v4114_v15 }
 0x5e3   : > { %v4116_v7 = vsel %vm4108_vm1, %v4115_v45, 0.0 }
 0x5e4   : > { %4117 = vadd.xlane.f32.xlu0 %v4116_v7 }
 0x671   : > { %v4118_v25 = vpop.xlane.xlu0 %4117 }
 0x672   : > { %v4119_v40 = vmul.f32 0.03125, %v4118_v25 }
 0x674   : > { %v4120_v24 = vadd.f32 1e-05, %v4119_v40 }
 0x676   : > { %7071 = vrsqrt.f32 %v4120_v24 }
 0x680   : > { %v7072_v13 = vpop.eup %7071 }
 0x681   : > { %v4122_v2 = vmul.f32 %v7072_v13, %v4114_v15 }
 0x683   : > { %v4130_v30 = vmul.f32 %v6753_v5, %v4122_v2 }
 0x685   : > { %v4138_v28 = vadd.f32 %v6754_v57, %v4130_v30 }
 0x687   : > { %7073 = vtanh.f32 %v4138_v28 }
 0x691   : > { %v7074_v41 = vpop.eup %7073 }
 0x692   : > { %4140 = vst.msk [vmem:[#allocation2] sm:$0x3] %vm4108_vm1, %v7074_v41 }
 0x693 PF: > { %v4169_v3 = vlaneseq  ;;  %s9589_s28 = sld [smem:[#allocation5_spill]]  ;;  %v7090_v12 = vmov 1983009808   ;;  %v7091_v34 = vmov 0   ;;  %s9590_s15 = sld [smem:[#allocation4_spill]]  ;;  %vm4203_vm2 = vcmask 1041408  }
 0x694   : > { %v4167_v18 = vunpack.c.l.s4 %v7090_v12  ;;  %4260 = vmatprep.mubr.bf16.mxu0 %v7091_v34  ;;  %4301 = vmatprep.mubr.bf16.mxu1 %v7091_v34  ;;  %s9591_s26 = sld [smem:[#allocation14_spill]]  ;;  %vm4199_vm3 = vcmask 31744   ;;  %vm4472_vm4 = vcmask 261120   ;;  %v4699_v24 = vld [vmem:[%s7240_s30 + $0x8] sm:$0xff]  ;;  %v4701_v2 = vld [vmem:[%s7240_s30 + $0x18] sm:$0xff]  ;;  %v4698_v30 = vld [vmem:[%s7240_s30] sm:$0xff]  ;;  %s9592_s24 = scalar_lea.vmem %s9530_s16, %s7230_s25 }
 0x695   : > { %v8984_v42 = vshrl.u32 %v4169_v3, 7  ;;  %v4955_v57 = vunpack.c.l.s8.bf16 %v4699_v24  ;;  %v4957_v41 = vunpack.c.l.s8.bf16 %v4701_v2  ;;  %v4700_v3 = vld [vmem:[%s7240_s30 + $0x10] sm:$0xff]  ;;  %v4954_v12 = vunpack.c.l.s8.bf16 %v4698_v30  ;;  %s9593_s4 = scalar_lea.vmem %s9532_s18, %s7230_s25  ;;  %s9595_s23 = scalar_lea.vmem %s9535_s21, %s7215_s29 }
 0x696   : > { %v4168_v38 = vunpack.c.0.s8 %v4167_v18  ;;  %v4963_v18 = vunpack.c.h.s8.bf16 %v4699_v24  ;;  %v4739_v24 = vld [vmem:[%s7240_s30 + $0x148] sm:$0xff]  ;;  %vm6348_vm5 = vcmask 1024  }
 0x698   : > { %v4171_v19 = vsub.s32 %v4168_v38, %v8984_v42  ;;  %v4707_v38 = vld [vmem:[%s7240_s30 + $0x48] sm:$0xff] }
 0x699   : > { %v4161_v46 = vld [vmem:[%s9589_s28] sm:$0xff]  ;;  %v4162_v4 = vld [vmem:[%s9589_s28 + $0x8] sm:$0xff]  ;;  %v4147_v1 = vld [vmem:[%s9590_s15 + $0x10] sm:$0xff] }
 0x69a   : > { %v4165_v60 = vcombine.high %v4161_v46, %v4161_v46  ;;  %v4182_v14 = vcombine.high %v4162_v4, %v4162_v4  ;;  %v4172_v54 = vrot.slane %v4161_v46, %v4171_v19  ;;  %v4189_v59 = vrot.slane %v4162_v4, %v4171_v19  ;;  %v4143_v51 = vld [vmem:[%s9591_s26] sm:$0x3]  ;;  %v4146_v55 = vld [vmem:[%s9590_s15 + $0x8] sm:$0xff]  ;;  %v4151_v44 = vld [vmem:[%s9590_s15 + $0x30] sm:$0xff]  ;;  %s9594_s26 = scalar_lea.vmem %s9533_s19, %s7230_s25 }
 0x69b   : > { %v4145_v26 = vld [vmem:[%s9590_s15] sm:$0xff]  ;;  %v4144_v33 = vpack.c.bf16 %v4143_v51, %v4143_v51  ;;  %v4150_v35 = vld [vmem:[%s9590_s15 + $0x28] sm:$0xff]  ;;  %v4148_v63 = vld [vmem:[%s9590_s15 + $0x18] sm:$0xff]  ;;  %v6768_v10 = vcombine.high %v4147_v1, %v4151_v44  ;;  %v6767_v15 = vcombine.low %v4147_v1, %v4151_v44  ;;  %v4956_v46 = vunpack.c.l.s8.bf16 %v4700_v3 }
 0x69c   : > { %v4179_v8 = vrot.slane %v4165_v60, %v4171_v19  ;;  %v4196_v58 = vrot.slane %v4182_v14, %v4171_v19  ;;  %v4180_v56 = vcombine.high %v4172_v54, %v4172_v54  ;;  %v4205_v62 = vsel %vm4203_vm2, %v4172_v54, 0  ;;  %v4149_v61 = vld [vmem:[%s9590_s15 + $0x20] sm:$0xff]  ;;  %v4154_v16 = vld [vmem:[%s9590_s15 + $0x48] sm:$0xff]  ;;  %v4152_v49 = vld [vmem:[%s9590_s15 + $0x38] sm:$0xff] }
 0x69d   : > { %v4197_v48 = vcombine.high %v4189_v59, %v4189_v59  ;;  %v4217_v43 = vsel %vm4203_vm2, %v4189_v59, 0  ;;  %v6764_v23 = vcombine.high %v4145_v26, %v4149_v61  ;;  %v6766_v47 = vcombine.high %v4146_v55, %v4150_v35  ;;  %v4153_v39 = vld [vmem:[%s9590_s15 + $0x40] sm:$0xff]  ;;  %v4158_v31 = vld [vmem:[%s9590_s15 + $0x68] sm:$0xff]  ;;  %v4155_v21 = vld [vmem:[%s9590_s15 + $0x50] sm:$0xff] }
 0x69e   : > { %v4181_v17 = vcombine.high %v4179_v8, %v4179_v8  ;;  %v4211_v9 = vsel %vm4203_vm2, %v4179_v8, 0  ;;  %v4198_v6 = vcombine.high %v4196_v58, %v4196_v58  ;;  %6755 = vmatprep.subr.msk.bf16.mxu0 %vm4203_vm2, %v4180_v56  ;;  %v4223_v29 = vsel %vm4203_vm2, %v4196_v58, 0  ;;  %v4157_v37 = vld [vmem:[%s9590_s15 + $0x60] sm:$0xff]  ;;  %v4159_v53 = vld [vmem:[%s9590_s15 + $0x70] sm:$0xff]  ;;  %v4156_v45 = vld [vmem:[%s9590_s15 + $0x58] sm:$0xff] }
 0x69f   : > { %4229 = vmatpush1.bf16.msra.mxu0 %v4205_v62  ;;  %v6763_v36 = vcombine.low %v4145_v26, %v4149_v61  ;;  %v6772_v22 = vcombine.high %v4153_v39, %v4157_v37  ;;  %v6765_v32 = vcombine.low %v4146_v55, %v4150_v35  ;;  %v6774_v11 = vcombine.high %v4154_v16, %v4158_v31  ;;  %v4141_v52 = vld [vmem:[#allocation2] sm:$0x3]  ;;  %v4160_v7 = vld [vmem:[%s9590_s15 + $0x78] sm:$0xff]  ;;  %v4708_v8 = vld [vmem:[%s7240_s30 + $0x50] sm:$0xff] }
 0x6a0   : > { %6757 = vmatprep.subr.msk.bf16.mxu1 %vm4203_vm2, %v4181_v17  ;;  %6759 = vmatprep.subr.msk.bf16.mxu0 %vm4203_vm2, %v4197_v48  ;;  %v6771_v27 = vcombine.low %v4153_v39, %v4157_v37  ;;  %v6773_v0 = vcombine.low %v4154_v16, %v4158_v31  ;;  %v4142_v20 = vpack.c.bf16 %v4141_v52, %v4141_v52  ;;  %v4965_v4 = vunpack.c.h.s8.bf16 %v4701_v2  ;;  %v4706_v19 = vld [vmem:[%s7240_s30 + $0x40] sm:$0xff]  ;;  %v4715_v62 = vld [vmem:[%s7240_s30 + $0x88] sm:$0xff]  ;;  %v4717_v61 = vld [vmem:[%s7240_s30 + $0x98] sm:$0xff] }
 0x6a1   : > { %4270 = vmatpush1.bf16.msra.mxu1 %v4211_v9  ;;  %v6770_v50 = vcombine.high %v4148_v63, %v4152_v49  ;;  %v6776_v25 = vcombine.high %v4155_v21, %v4159_v53  ;;  %v6769_v40 = vcombine.low %v4148_v63, %v4152_v49  ;;  %v6778_v13 = vcombine.high %v4156_v45, %v4160_v7  ;;  %v4714_v9 = vld [vmem:[%s7240_s30 + $0x80] sm:$0xff]  ;;  %v4716_v55 = vld [vmem:[%s7240_s30 + $0x90] sm:$0xff]  ;;  %v4725_v37 = vld [vmem:[%s7240_s30 + $0xd8] sm:$0xff] }
 0x6a2   : > { %6761 = vmatprep.subr.msk.bf16.mxu1 %vm4203_vm2, %v4198_v6  ;;  %6756 = vmatmul.mubr.msk.bf16.vlgmr.msra.gmra.mrb[0].mxu0 %vm4199_vm3, %v4144_v33  ;;  %v6775_v5 = vcombine.low %v4155_v21, %v4159_v53  ;;  %v6777_v28 = vcombine.low %v4156_v45, %v4160_v7  ;;  %v4962_v60 = vunpack.c.h.s8.bf16 %v4698_v30  ;;  %v4971_v14 = vunpack.c.l.s8.bf16 %v4707_v38  ;;  %v4722_v16 = vld [vmem:[%s7240_s30 + $0xc0] sm:$0xff]  ;;  %v4724_v1 = vld [vmem:[%s7240_s30 + $0xd0] sm:$0xff]  ;;  %v4733_v49 = vld [vmem:[%s7240_s30 + $0x118] sm:$0xff] }
 0x6a3   : > { %4311 = vmatpush1.bf16.msra.mxu0 %v4217_v43  ;;  %4342 = vmatprep.mubr.bf16.mxu0 %v7091_v34  ;;  %v4964_v54 = vunpack.c.h.s8.bf16 %v4700_v3  ;;  %v4970_v58 = vunpack.c.l.s8.bf16 %v4706_v19  ;;  %v4979_v51 = vunpack.c.h.s8.bf16 %v4707_v38  ;;  %v4972_v56 = vunpack.c.l.s8.bf16 %v4708_v8  ;;  %v4730_v21 = vld [vmem:[%s7240_s30 + $0x100] sm:$0xff]  ;;  %v4740_v30 = vld [vmem:[%s7240_s30 + $0x150] sm:$0xff]  ;;  %v4747_v38 = vld [vmem:[%s7240_s30 + $0x188] sm:$0xff] }
 0x6a4   : > { %4476 = vmatprep.subr.bf16.mxu0 %v6764_v23  ;;  %6758 = vmatmul.mubr.msk.bf16.vlgmr.msra.gmra.mrb[0].mxu1 %vm4199_vm3, %v4144_v33  ;;  %v4978_v26 = vunpack.c.h.s8.bf16 %v4706_v19  ;;  %v4987_v17 = vunpack.c.l.s8.bf16 %v4715_v62  ;;  %v4980_v6 = vunpack.c.h.s8.bf16 %v4708_v8  ;;  %v4986_v35 = vunpack.c.l.s8.bf16 %v4714_v9  ;;  %v4748_v19 = vld [vmem:[%s7240_s30 + $0x190] sm:$0xff] }
 0x6a5   : > { %4352 = vmatpush1.bf16.msra.mxu1 %v4223_v29  ;;  %4383 = vmatprep.mubr.bf16.mxu1 %v7091_v34  ;;  %v4995_v43 = vunpack.c.h.s8.bf16 %v4715_v62  ;;  %v4988_v23 = vunpack.c.l.s8.bf16 %v4716_v55  ;;  %v4723_v29 = vld [vmem:[%s7240_s30 + $0xc8] sm:$0xff]  ;;  %v4994_v39 = vunpack.c.h.s8.bf16 %v4714_v9  ;;  %v4996_v31 = vunpack.c.h.s8.bf16 %v4716_v55  ;;  %v4756_v9 = vld [vmem:[%s7240_s30 + $0x1d0] sm:$0xff] }
 0x6a6   : > { %4517 = vmatprep.subr.bf16.mxu1 %v6766_v47  ;;  %v4997_v47 = vunpack.c.h.s8.bf16 %v4717_v61  ;;  %v5002_v44 = vunpack.c.l.s8.bf16 %v4722_v16  ;;  %v5013_v52 = vunpack.c.h.s8.bf16 %v4725_v37  ;;  %v5010_v63 = vunpack.c.h.s8.bf16 %v4722_v16  ;;  %v4755_v62 = vld [vmem:[%s7240_s30 + $0x1c8] sm:$0xff] }
 0x6a7   : > { %v5012_v53 = vunpack.c.h.s8.bf16 %v4724_v1  ;;  %v5029_v7 = vunpack.c.h.s8.bf16 %v4733_v49  ;;  %v5043_v3 = vunpack.c.h.s8.bf16 %v4739_v24  ;;  %v5059_v8 = vunpack.c.h.s8.bf16 %v4747_v38 }
 0x6a8   : > { %v5075_v55 = vunpack.c.h.s8.bf16 %v4755_v62 }
 0x6aa   : > { %6760 = vmatmul.mubr.msk.bf16.vlgmr.msra.gmra.mrb[4].mxu0 %vm4199_vm3, %v4144_v33 }
 0x6ab   : > { %4477 = vmatpush1.bf16.msra.mxu0 %v6763_v36  ;;  %4508 = vmatprep.mubr.bf16.mxu0 %v7091_v34  ;;  %v5003_v36 = vunpack.c.l.s8.bf16 %v4723_v29 }
 0x6ac   : > { %4478 = vmatprep.subr.bf16.mxu0 %v6772_v22  ;;  %6762 = vmatmul.mubr.msk.bf16.vlgmr.msra.gmra.mrb[4].mxu1 %vm4199_vm3, %v4144_v33  ;;  %v4989_v33 = vunpack.c.l.s8.bf16 %v4717_v61  ;;  %v5005_v22 = vunpack.c.l.s8.bf16 %v4725_v37 }
 0x6ad   : > { %4518 = vmatpush1.bf16.msra.mxu1 %v6765_v32  ;;  %4549 = vmatprep.mubr.bf16.mxu1 %v7091_v34  ;;  %v5011_v32 = vunpack.c.h.s8.bf16 %v4723_v29  ;;  %v9062_v29 = vld [vmem:[%s7240_s30 + $0x208] sm:$0xff] }
 0x6ae   : > { %4519 = vmatprep.subr.bf16.mxu1 %v6774_v11  ;;  %v5004_v11 = vunpack.c.l.s8.bf16 %v4724_v1 }
 0x6af   : > { %4479 = vmatpush1.bf16.msra.mxu0 %v6771_v27  ;;  %v4731_v27 = vld [vmem:[%s7240_s30 + $0x108] sm:$0xff] }
 0x6b0   : > { %4558 = vmatprep.subr.bf16.mxu0 %v6768_v10  ;;  %v5019_v10 = vunpack.c.l.s8.bf16 %v4731_v27 }
 0x6b1   : > { %4520 = vmatpush1.bf16.msra.mxu1 %v6773_v0  ;;  %v5021_v0 = vunpack.c.l.s8.bf16 %v4733_v49 }
 0x6b2   : > { %6779 = vmatmul.mubr.msk.bf16.vlgmr.msra.gmra.mrb[8].mxu0 %vm4472_vm4, %v4142_v20  ;;  %4599 = vmatprep.subr.bf16.mxu1 %v6770_v50  ;;  %v5018_v50 = vunpack.c.l.s8.bf16 %v4730_v21 }
 0x6b3   : > { %4559 = vmatpush1.bf16.msra.mxu0 %v6767_v15  ;;  %4590 = vmatprep.mubr.bf16.mxu0 %v7091_v34  ;;  %v5027_v15 = vunpack.c.h.s8.bf16 %v4731_v27 }
 0x6b4   : > { %4560 = vmatprep.subr.bf16.mxu0 %v6776_v25  ;;  %6780 = vmatmul.mubr.msk.bf16.vlgmr.msra.gmra.mrb[8].mxu1 %vm4472_vm4, %v4142_v20  ;;  %v5026_v25 = vunpack.c.h.s8.bf16 %v4730_v21  ;;  %v9072_v21 = vsub.s32 0, %v8984_v42 }
 0x6b5   : > { %4600 = vmatpush1.bf16.msra.mxu1 %v6769_v40  ;;  %4631 = vmatprep.mubr.bf16.mxu1 %v7091_v34  ;;  %v4709_v34 = vld [vmem:[%s7240_s30 + $0x58] sm:$0xff] }
 0x6b6   : > { %4601 = vmatprep.subr.bf16.mxu1 %v6778_v13  ;;  %v4973_v59 = vunpack.c.l.s8.bf16 %v4709_v34  ;;  %v4981_v48 = vunpack.c.h.s8.bf16 %v4709_v34  ;;  %v4741_v13 = vld [vmem:[%s7240_s30 + $0x158] sm:$0xff] }
 0x6b7   : > { %4561 = vmatpush1.bf16.msra.mxu0 %v6775_v5  ;;  %v5035_v5 = vunpack.c.l.s8.bf16 %v4739_v24  ;;  %v5037_v2 = vunpack.c.l.s8.bf16 %v4741_v13 }
 0x6b8   : > { %5474 = vmatprep.subr.bf16.mxu0 %v4955_v57  ;;  %v4738_v57 = vld [vmem:[%s7240_s30 + $0x140] sm:$0xff] }
 0x6b9   : > { %4602 = vmatpush1.bf16.msra.mxu1 %v6777_v28  ;;  %v5034_v28 = vunpack.c.l.s8.bf16 %v4738_v57 }
 0x6ba   : > { %6781 = vmatmul.mubr.msk.bf16.vlgmr.msra.gmra.mrb[12].mxu0 %vm4472_vm4, %v4142_v20  ;;  %5638 = vmatprep.subr.bf16.mxu1 %v4957_v41  ;;  %v5036_v41 = vunpack.c.l.s8.bf16 %v4740_v30 }
 0x6bb   : > { %5475 = vmatpush1.bf16.msra.mxu0 %v4954_v12  ;;  %v5045_v12 = vunpack.c.h.s8.bf16 %v4741_v13 }
 0x6bc   : > { %6782 = vmatmul.mubr.msk.bf16.vlgmr.msra.gmra.mrb[12].mxu1 %vm4472_vm4, %v4142_v20  ;;  %5476 = vmatprep.subr.bf16.mxu0 %v4963_v18  ;;  %v4732_v20 = vld [vmem:[%s7240_s30 + $0x110] sm:$0xff]  ;;  %v5042_v18 = vunpack.c.h.s8.bf16 %v4738_v57 }
 0x6bd   : > { %5639 = vmatpush1.bf16.msra.mxu1 %v4956_v46  ;;  %v5020_v45 = vunpack.c.l.s8.bf16 %v4732_v20  ;;  %v5028_v40 = vunpack.c.h.s8.bf16 %v4732_v20  ;;  %v5044_v46 = vunpack.c.h.s8.bf16 %v4740_v30  ;;  %v9084_v20 = vsub.s32 1, %v8984_v42 }
 0x6be   : > { %5640 = vmatprep.subr.bf16.mxu1 %v4965_v4  ;;  %v4749_v4 = vld [vmem:[%s7240_s30 + $0x198] sm:$0xff] }
 0x6bf   : > { %5477 = vmatpush1.bf16.msra.mxu0 %v4962_v60  ;;  %v5051_v60 = vunpack.c.l.s8.bf16 %v4747_v38  ;;  %v5053_v34 = vunpack.c.l.s8.bf16 %v4749_v4 }
 0x6c0   : > { %5478 = vmatprep.subr.bf16.mxu0 %v4971_v14  ;;  %v4746_v14 = vld [vmem:[%s7240_s30 + $0x180] sm:$0xff] }
 0x6c1   : > { %5641 = vmatpush1.bf16.msra.mxu1 %v4964_v54  ;;  %v5050_v54 = vunpack.c.l.s8.bf16 %v4746_v14 }
 0x6c2   : > { %5642 = vmatprep.subr.bf16.mxu1 %v4973_v59  ;;  %v5052_v59 = vunpack.c.l.s8.bf16 %v4748_v19 }
 0x6c3   : > { %5479 = vmatpush1.bf16.msra.mxu0 %v4970_v58  ;;  %v5061_v58 = vunpack.c.h.s8.bf16 %v4749_v4 }
 0x6c4   : > { %5480 = vmatprep.subr.bf16.mxu0 %v4979_v51  ;;  %v5058_v51 = vunpack.c.h.s8.bf16 %v4746_v14 }
 0x6c5   : > { %5643 = vmatpush1.bf16.msra.mxu1 %v4972_v56  ;;  %v5060_v56 = vunpack.c.h.s8.bf16 %v4748_v19 }
 0x6c6   : > { %5644 = vmatprep.subr.bf16.mxu1 %v4981_v48  ;;  %v4757_v48 = vld [vmem:[%s7240_s30 + $0x1d8] sm:$0xff] }
 0x6c7   : > { %5481 = vmatpush1.bf16.msra.mxu0 %v4978_v26  ;;  %v5067_v26 = vunpack.c.l.s8.bf16 %v4755_v62  ;;  %v5069_v61 = vunpack.c.l.s8.bf16 %v4757_v48 }
 0x6c8   : > { %5482 = vmatprep.subr.bf16.mxu0 %v4987_v17  ;;  %v4754_v17 = vld [vmem:[%s7240_s30 + $0x1c0] sm:$0xff] }
 0x6c9   : > { %5645 = vmatpush1.bf16.msra.mxu1 %v4980_v6  ;;  %v5066_v6 = vunpack.c.l.s8.bf16 %v4754_v17 }
 0x6ca   : > { %5646 = vmatprep.subr.bf16.mxu1 %v4989_v33  ;;  %v5068_v33 = vunpack.c.l.s8.bf16 %v4756_v9 }
 0x6cb   : > { %5483 = vmatpush1.bf16.msra.mxu0 %v4986_v35  ;;  %v5077_v35 = vunpack.c.h.s8.bf16 %v4757_v48  ;;  %v9114_v48 = vsub.s32 7, %v8984_v42 }
 0x6cc   : > { %5484 = vmatprep.subr.bf16.mxu0 %v4995_v43  ;;  %v5074_v43 = vunpack.c.h.s8.bf16 %v4754_v17 }
 0x6cd   : > { %5647 = vmatpush1.bf16.msra.mxu1 %v4988_v23  ;;  %v5076_v23 = vunpack.c.h.s8.bf16 %v4756_v9 }
 0x6ce   : > { %5648 = vmatprep.subr.bf16.mxu1 %v4997_v47  ;;  %v9065_v47 = vld [vmem:[%s7240_s30 + $0x218] sm:$0xff] }
 0x6cf   : > { %5485 = vmatpush1.bf16.msra.mxu0 %v4994_v39  ;;  %v5083_v39 = vunpack.c.l.s8.bf16 %v9062_v29  ;;  %v5085_v37 = vunpack.c.l.s8.bf16 %v9065_v47 }
 0x6d0   : > { %5486 = vmatprep.subr.bf16.mxu0 %v5003_v36 }
 0x6d1   : > { %5649 = vmatpush1.bf16.msra.mxu1 %v4996_v31 }
 0x6d2   : > { %5650 = vmatprep.subr.bf16.mxu1 %v5005_v22 }
 0x6d3   : > { %5487 = vmatpush1.bf16.msra.mxu0 %v5002_v44 }
 0x6d4   : > { %5488 = vmatprep.subr.bf16.mxu0 %v5011_v32 }
 0x6d5   : > { %5651 = vmatpush1.bf16.msra.mxu1 %v5004_v11 }
 0x6d6   : > { %5652 = vmatprep.subr.bf16.mxu1 %v5013_v52 }
 0x6d7   : > { %5489 = vmatpush1.bf16.msra.mxu0 %v5010_v63 }
 0x6d8   : > { %5490 = vmatprep.subr.bf16.mxu0 %v5019_v10 }
 0x6d9   : > { %5653 = vmatpush1.bf16.msra.mxu1 %v5012_v53 }
 0x6da   : > { %5654 = vmatprep.subr.bf16.mxu1 %v5021_v0  ;;  %v9081_v0 = vld [vmem:[%s9592_s24] sm:$0xff] }
 0x6db   : > { %5491 = vmatpush1.bf16.msra.mxu0 %v5018_v50  ;;  %v4649_v24 = vrot.slane %v9081_v0, %v9084_v20 }
 0x6dc   : > { %5492 = vmatprep.subr.bf16.mxu0 %v5027_v15 }
 0x6dd   : > { %5655 = vmatpush1.bf16.msra.mxu1 %v5020_v45  ;;  %v9087_v45 = vsub.s32 2, %v8984_v42 }
 0x6de   : > { %5656 = vmatprep.subr.bf16.mxu1 %v5029_v7  ;;  %v9090_v7 = vsub.s32 3, %v8984_v42 }
 0x6df   : > { %5493 = vmatpush1.bf16.msra.mxu0 %v5026_v25  ;;  %v4645_v25 = vrot.slane %v9081_v0, %v9072_v21 }
 0x6e0   : > { %5494 = vmatprep.subr.bf16.mxu0 %v5035_v5 }
 0x6e1   : > { %5657 = vmatpush1.bf16.msra.mxu1 %v5028_v40 }
 0x6e2   : > { %5658 = vmatprep.subr.bf16.mxu1 %v5037_v2  ;;  %v4653_v2 = vrot.slane %v9081_v0, %v9087_v45 }
 0x6e3   : > { %5495 = vmatpush1.bf16.msra.mxu0 %v5034_v28 }
 0x6e4   : > { %5496 = vmatprep.subr.bf16.mxu0 %v5043_v3 }
 0x6e5   : > { %5659 = vmatpush1.bf16.msra.mxu1 %v5036_v41  ;;  %v4657_v41 = vrot.slane %v9081_v0, %v9090_v7 }
 0x6e6   : > { %5660 = vmatprep.subr.bf16.mxu1 %v5045_v12 }
 0x6e7   : > { %5497 = vmatpush1.bf16.msra.mxu0 %v5042_v18  ;;  %v9101_v18 = vsub.s32 4, %v8984_v42 }
 0x6e8   : > { %5498 = vmatprep.subr.bf16.mxu0 %v5051_v60 }
 0x6e9   : > { %5661 = vmatpush1.bf16.msra.mxu1 %v5044_v46  ;;  %v9104_v46 = vsub.s32 5, %v8984_v42 }
 0x6ea   : > { %5662 = vmatprep.subr.bf16.mxu1 %v5053_v34  ;;  %v4762_v34 = vld [vmem:[%s7240_s30 + $0x200] sm:$0xff] }
 0x6eb   : > { %5499 = vmatpush1.bf16.msra.mxu0 %v5050_v54  ;;  %v5082_v17 = vunpack.c.l.s8.bf16 %v4762_v34 }
 0x6ec   : > { %5500 = vmatprep.subr.bf16.mxu0 %v5059_v8 }
 0x6ed   : > { %5663 = vmatpush1.bf16.msra.mxu1 %v5052_v59  ;;  %v4764_v59 = vld [vmem:[%s7240_s30 + $0x210] sm:$0xff] }
 0x6ee   : > { %5664 = vmatprep.subr.bf16.mxu1 %v5061_v58 }
 0x6ef   : > { %5501 = vmatpush1.bf16.msra.mxu0 %v5058_v51  ;;  %v9111_v51 = vsub.s32 6, %v8984_v42 }
 0x6f0   : > { %5502 = vmatprep.subr.bf16.mxu0 %v5067_v26  ;;  %v4661_v26 = vrot.slane %v9081_v0, %v9101_v18 }
 0x6f1   : > { %5665 = vmatpush1.bf16.msra.mxu1 %v5060_v56 }
 0x6f2   : > { %5666 = vmatprep.subr.bf16.mxu1 %v5069_v61  ;;  %v4665_v61 = vrot.slane %v9081_v0, %v9104_v46 }
 0x6f3   : > { %5503 = vmatpush1.bf16.msra.mxu0 %v5066_v6 }
 0x6f4   : > { %5504 = vmatprep.subr.bf16.mxu0 %v5075_v55  ;;  %v5091_v55 = vunpack.c.h.s8.bf16 %v9062_v29 }
 0x6f5   : > { %5667 = vmatpush1.bf16.msra.mxu1 %v5068_v33  ;;  %v5084_v33 = vunpack.c.l.s8.bf16 %v4764_v59 }
 0x6f6   : > { %5668 = vmatprep.subr.bf16.mxu1 %v5077_v35 }
 0x6f7   : > { %5505 = vmatpush1.bf16.msra.mxu0 %v5074_v43 }
 0x6f8   : > { %5515 = vmatprep.subr.bf16.mxu0 %v5083_v39  ;;  %v5093_v39 = vunpack.c.h.s8.bf16 %v9065_v47 }
 0x6f9   : > { %5669 = vmatpush1.bf16.msra.mxu1 %v5076_v23 }
 0x6fa   : > { %5679 = vmatprep.subr.bf16.mxu1 %v5085_v37  ;;  %v4669_v37 = vrot.slane %v9081_v0, %v9111_v51 }
 0x775   : > { %v4262_v36 = vpop.f32.mrb[0].mxu0 }
 0x776   : > { %v4264_v16 = vpop.f32.mrb[1].mxu0 }
 0x777   : > { %v4266_v31 = vpop.f32.mrb[2].mxu0  ;;  %v4303_v22 = vpop.f32.mrb[0].mxu1 }
 0x778   : > { %v4267_v1 = vpop.f32.mrb[3].mxu0  ;;  %v4305_v44 = vpop.f32.mrb[1].mxu1  ;;  %v4773_v31 = vld [vmem:[%s7240_s30 + $0x258] sm:$0xff] }
 0x779   : > { %v4307_v32 = vpop.f32.mrb[2].mxu1  ;;  %v4673_v1 = vrot.slane %v9081_v0, %v9114_v48 }
 0x77a   : > { %v4308_v11 = vpop.f32.mrb[3].mxu1 }
 0x77d   : > { %v4344_v27 = vpop.f32.mrb[4].mxu0 }
 0x77e   : > { %v4346_v52 = vpop.f32.mrb[5].mxu0 }
 0x77f   : > { %v4348_v63 = vpop.f32.mrb[6].mxu0  ;;  %v9069_v49 = vpop.f32.mrb[4].mxu1 }
 0x780   : > { %v4349_v10 = vpop.f32.mrb[7].mxu0  ;;  %v9074_v53 = vpop.f32.mrb[5].mxu1  ;;  %v5090_v63 = vunpack.c.h.s8.bf16 %v4762_v34  ;;  %v4780_v34 = vld [vmem:[%s7240_s30 + $0x290] sm:$0xff] }
 0x781   : > { %v4389_v50 = vpop.f32.mrb[6].mxu1  ;;  %v5092_v10 = vunpack.c.h.s8.bf16 %v4764_v59 }
 0x782   : > { %v4390_v15 = vpop.f32.mrb[7].mxu1 }
 0x785   : > { %v4510_v40 = vpop.f32.mrb[8].mxu0 }
 0x786   : > { %v4511_v13 = vadd.f32 %v4510_v40, %v4262_v36  ;;  %v4512_v5 = vpop.f32.mrb[9].mxu0  ;;  %v4770_v40 = vld [vmem:[%s7240_s30 + $0x240] sm:$0xff] }
 0x787   : > { %v4513_v57 = vadd.f32 %v4512_v5, %v4264_v16  ;;  %v4514_v30 = vpop.f32.mrb[10].mxu0  ;;  %v4551_v28 = vpop.f32.mrb[8].mxu1  ;;  %v4771_v16 = vld [vmem:[%s7240_s30 + $0x248] sm:$0xff] }
 0x788   : > { %v4682_v3 = vadd.f32 %v4645_v25, %v4511_v13  ;;  %v4515_v12 = vpop.f32.mrb[11].mxu0  ;;  %v4552_v38 = vadd.f32 %v4551_v28, %v4303_v22  ;;  %v4553_v4 = vpop.f32.mrb[9].mxu1  ;;  %v5099_v15 = vunpack.c.l.s8.bf16 %v4771_v16  ;;  %v5101_v25 = vunpack.c.l.s8.bf16 %v4773_v31  ;;  %v4779_v28 = vld [vmem:[%s7240_s30 + $0x288] sm:$0xff] }
 0x789   : > { %v4683_v60 = vadd.f32 %v4649_v24, %v4513_v57  ;;  %v4554_v14 = vadd.f32 %v4553_v4, %v4305_v44  ;;  %v4555_v19 = vpop.f32.mrb[10].mxu1  ;;  %v4772_v24 = vld [vmem:[%s7240_s30 + $0x250] sm:$0xff]  ;;  %v5107_v57 = vunpack.c.h.s8.bf16 %v4771_v16  ;;  %v5109_v30 = vunpack.c.h.s8.bf16 %v4773_v31 }
 0x78a   : > { %v4690_v54 = vmax.f32 %v4682_v3, 0.0  ;;  %v9108_v8 = vadd.f32 %v4653_v2, %v4552_v38  ;;  %v4556_v58 = vpop.f32.mrb[11].mxu1  ;;  %v5100_v2 = vunpack.c.l.s8.bf16 %v4772_v24  ;;  %v5106_v3 = vunpack.c.h.s8.bf16 %v4770_v40 }
 0x78b   : > { %v4691_v56 = vmax.f32 %v4683_v60, 0.0  ;;  %v4685_v62 = vadd.f32 %v4657_v41, %v4554_v14  ;;  %v4781_v41 = vld [vmem:[%s7240_s30 + $0x298] sm:$0xff]  ;;  %v5108_v12 = vunpack.c.h.s8.bf16 %v4772_v24  ;;  %v5115_v38 = vunpack.c.l.s8.bf16 %v4779_v28  ;;  %v4778_v60 = vld [vmem:[%s7240_s30 + $0x280] sm:$0xff]  ;;  %v4787_v58 = vld [vmem:[%s7240_s30 + $0x2c8] sm:$0xff] }
 0x78c   : > { %v9123_v43 = vpack.c.bf16 %v4690_v54, %v4690_v54  ;;  %v5117_v4 = vunpack.c.l.s8.bf16 %v4781_v41  ;;  %v5114_v14 = vunpack.c.l.s8.bf16 %v4778_v60  ;;  %v5116_v19 = vunpack.c.l.s8.bf16 %v4780_v34  ;;  %v4802_v24 = vld [vmem:[%s7240_s30 + $0x340] sm:$0xff] }
 0x78d   : > { %v9120_v9 = vpack.c.bf16 %v4691_v56, %v4691_v56  ;;  %v4592_v6 = vpop.f32.mrb[12].mxu0  ;;  %v4693_v35 = vmax.f32 %v4685_v62, 0.0  ;;  %v5123_v54 = vunpack.c.h.s8.bf16 %v4779_v28  ;;  %v5125_v59 = vunpack.c.h.s8.bf16 %v4781_v41  ;;  %v4789_v56 = vld [vmem:[%s7240_s30 + $0x2d8] sm:$0xff]  ;;  %v4811_v28 = vld [vmem:[%s7240_s30 + $0x388] sm:$0xff] }
 0x78e   : > { %v4593_v42 = vadd.f32 %v4592_v6, %v4344_v27  ;;  %v4594_v23 = vpop.f32.mrb[13].mxu0  ;;  %v5122_v62 = vunpack.c.h.s8.bf16 %v4778_v60  ;;  %v4786_v6 = vld [vmem:[%s7240_s30 + $0x2c0] sm:$0xff]  ;;  %v4813_v41 = vld [vmem:[%s7240_s30 + $0x398] sm:$0xff] }
 0x78f   : > { %v4595_v36 = vadd.f32 %v4594_v23, %v4346_v52  ;;  %5506 = vmatprep.mubr.bf16.mxu0 %v9120_v9  ;;  %5670 = vmatprep.mubr.bf16.mxu1 %v9120_v9  ;;  %v9132_v22 = vpack.c.bf16 %v4693_v35, %v4693_v35  ;;  %v4633_v29 = vpop.f32.mrb[12].mxu1  ;;  %v4596_v44 = vpop.f32.mrb[14].mxu0  ;;  %v5141_v23 = vunpack.c.h.s8.bf16 %v4789_v56  ;;  %v4810_v60 = vld [vmem:[%s7240_s30 + $0x380] sm:$0xff] }
 0x790   : > { %v9136_v32 = vadd.f32 %v4661_v26, %v4593_v42  ;;  %5507 = vmatmul.mubr.bf16.vlgmr.msra.gmra.mrb[16].mxu0 %v9123_v43  ;;  %5671 = vmatmul.mubr.bf16.vlgmr.msra.gmra.mrb[16].mxu1 %v9123_v43  ;;  %v4634_v47 = vadd.f32 %v4633_v29, %v9069_v49  ;;  %v4635_v11 = vpop.f32.mrb[13].mxu1  ;;  %v4597_v27 = vpop.f32.mrb[15].mxu0  ;;  %v5124_v26 = vunpack.c.h.s8.bf16 %v4780_v34  ;;  %v5139_v42 = vunpack.c.h.s8.bf16 %v4787_v58  ;;  %v4796_v44 = vld [vmem:[%s7240_s30 + $0x310] sm:$0xff] }
 0x791   : > { %v9141_v52 = vadd.f32 %v4665_v61, %v4595_v36  ;;  %5516 = vmatpush1.bf16.msra.mxu0 %v5082_v17  ;;  %5680 = vmatpush1.bf16.msra.mxu1 %v5084_v33  ;;  %v4636_v0 = vadd.f32 %v4635_v11, %v9074_v53  ;;  %v4637_v50 = vpop.f32.mrb[14].mxu1  ;;  %v5098_v53 = vunpack.c.l.s8.bf16 %v4770_v40  ;;  %v5131_v61 = vunpack.c.l.s8.bf16 %v4787_v58  ;;  %v4788_v33 = vld [vmem:[%s7240_s30 + $0x2d0] sm:$0xff]  ;;  %v4819_v58 = vld [vmem:[%s7240_s30 + $0x3c8] sm:$0xff] }
 0x792   : > { %5517 = vmatprep.subr.bf16.mxu0 %v5091_v55  ;;  %5681 = vmatprep.subr.bf16.mxu1 %v5093_v39  ;;  %v9146_v49 = vadd.f32 %v4669_v37, %v4634_v47  ;;  %v4638_v13 = vpop.f32.mrb[15].mxu1  ;;  %v5133_v17 = vunpack.c.l.s8.bf16 %v4789_v56  ;;  %v5130_v55 = vunpack.c.l.s8.bf16 %v4786_v6  ;;  %v5132_v35 = vunpack.c.l.s8.bf16 %v4788_v33  ;;  %v4795_v39 = vld [vmem:[%s7240_s30 + $0x308] sm:$0xff]  ;;  %v4797_v37 = vld [vmem:[%s7240_s30 + $0x318] sm:$0xff]  ;;  %v4812_v34 = vld [vmem:[%s7240_s30 + $0x390] sm:$0xff] }
 0x793   : > { %v9148_v5 = vadd.f32 %v4673_v1, %v4636_v0  ;;  %5547 = vmatprep.mubr.bf16.mxu0 %v9132_v22  ;;  %5711 = vmatprep.mubr.bf16.mxu1 %v9132_v22  ;;  %v5138_v36 = vunpack.c.h.s8.bf16 %v4786_v6  ;;  %v5140_v16 = vunpack.c.h.s8.bf16 %v4788_v33  ;;  %v5147_v31 = vunpack.c.l.s8.bf16 %v4795_v39  ;;  %v4794_v1 = vld [vmem:[%s7240_s30 + $0x300] sm:$0xff]  ;;  %v4805_v0 = vld [vmem:[%s7240_s30 + $0x358] sm:$0xff]  ;;  %v4804_v13 = vld [vmem:[%s7240_s30 + $0x350] sm:$0xff] }
 0x794   : > { %v5149_v29 = vunpack.c.l.s8.bf16 %v4797_v37  ;;  %v5146_v47 = vunpack.c.l.s8.bf16 %v4794_v1  ;;  %v5148_v11 = vunpack.c.l.s8.bf16 %v4796_v44  ;;  %v5155_v27 = vunpack.c.h.s8.bf16 %v4795_v39  ;;  %v4821_v56 = vld [vmem:[%s7240_s30 + $0x3d8] sm:$0xff]  ;;  %v4818_v6 = vld [vmem:[%s7240_s30 + $0x3c0] sm:$0xff]  ;;  %v4820_v33 = vld [vmem:[%s7240_s30 + $0x3d0] sm:$0xff] }
 0x795   : > { %5518 = vmatpush1.bf16.msra.mxu0 %v5090_v63  ;;  %5682 = vmatpush1.bf16.msra.mxu1 %v5092_v10  ;;  %v5157_v63 = vunpack.c.h.s8.bf16 %v4797_v37  ;;  %v4803_v10 = vld [vmem:[%s7240_s30 + $0x348] sm:$0xff]  ;;  %v5154_v50 = vunpack.c.h.s8.bf16 %v4794_v1  ;;  %v5165_v40 = vunpack.c.l.s8.bf16 %v4805_v0  ;;  %v4829_v37 = vld [vmem:[%s7240_s30 + $0x418] sm:$0xff] }
 0x796   : > { %5519 = vmatprep.subr.bf16.mxu0 %v5099_v15  ;;  %5683 = vmatprep.subr.bf16.mxu1 %v5101_v25  ;;  %v5156_v15 = vunpack.c.h.s8.bf16 %v4796_v44  ;;  %v5163_v25 = vunpack.c.l.s8.bf16 %v4803_v10  ;;  %v4827_v39 = vld [vmem:[%s7240_s30 + $0x408] sm:$0xff]  ;;  %v5213_v1 = vunpack.c.l.s8.bf16 %v4829_v37  ;;  %v4826_v44 = vld [vmem:[%s7240_s30 + $0x400] sm:$0xff] }
 0x799   : > { %5520 = vmatpush1.bf16.msra.mxu0 %v5098_v53  ;;  %5684 = vmatpush1.bf16.msra.mxu1 %v5100_v2  ;;  %v5162_v53 = vunpack.c.l.s8.bf16 %v4802_v24  ;;  %v5164_v2 = vunpack.c.l.s8.bf16 %v4804_v13 }
 0x79a   : > { %5521 = vmatprep.subr.bf16.mxu0 %v5107_v57  ;;  %5685 = vmatprep.subr.bf16.mxu1 %v5109_v30  ;;  %v5171_v57 = vunpack.c.h.s8.bf16 %v4803_v10  ;;  %v5173_v30 = vunpack.c.h.s8.bf16 %v4805_v0  ;;  %v5219_v0 = vunpack.c.h.s8.bf16 %v4827_v39 }
 0x79d   : > { %5522 = vmatpush1.bf16.msra.mxu0 %v5106_v3  ;;  %5686 = vmatpush1.bf16.msra.mxu1 %v5108_v12  ;;  %v5170_v3 = vunpack.c.h.s8.bf16 %v4802_v24  ;;  %v5172_v12 = vunpack.c.h.s8.bf16 %v4804_v13  ;;  %v4834_v13 = vld [vmem:[%s7240_s30 + $0x440] sm:$0xff] }
 0x79e   : > { %5523 = vmatprep.subr.bf16.mxu0 %v5115_v38  ;;  %5687 = vmatprep.subr.bf16.mxu1 %v5117_v4  ;;  %v5179_v38 = vunpack.c.l.s8.bf16 %v4811_v28  ;;  %v5181_v4 = vunpack.c.l.s8.bf16 %v4813_v41 }
 0x7a1   : > { %5524 = vmatpush1.bf16.msra.mxu0 %v5114_v14  ;;  %5688 = vmatpush1.bf16.msra.mxu1 %v5116_v19  ;;  %v5178_v14 = vunpack.c.l.s8.bf16 %v4810_v60  ;;  %v5180_v19 = vunpack.c.l.s8.bf16 %v4812_v34 }
 0x7a2   : > { %5525 = vmatprep.subr.bf16.mxu0 %v5123_v54  ;;  %5689 = vmatprep.subr.bf16.mxu1 %v5125_v59  ;;  %v5187_v54 = vunpack.c.h.s8.bf16 %v4811_v28  ;;  %v5189_v59 = vunpack.c.h.s8.bf16 %v4813_v41 }
 0x7a5   : > { %5526 = vmatpush1.bf16.msra.mxu0 %v5122_v62  ;;  %5690 = vmatpush1.bf16.msra.mxu1 %v5124_v26  ;;  %v5186_v62 = vunpack.c.h.s8.bf16 %v4810_v60  ;;  %v5188_v26 = vunpack.c.h.s8.bf16 %v4812_v34  ;;  %v4842_v34 = vld [vmem:[%s7240_s30 + $0x480] sm:$0xff] }
 0x7a6   : > { %5527 = vmatprep.subr.bf16.mxu0 %v5131_v61  ;;  %5691 = vmatprep.subr.bf16.mxu1 %v5133_v17  ;;  %v5195_v61 = vunpack.c.l.s8.bf16 %v4819_v58  ;;  %v5197_v17 = vunpack.c.l.s8.bf16 %v4821_v56 }
 0x7a9   : > { %5528 = vmatpush1.bf16.msra.mxu0 %v5130_v55  ;;  %5692 = vmatpush1.bf16.msra.mxu1 %v5132_v35  ;;  %v5194_v55 = vunpack.c.l.s8.bf16 %v4818_v6  ;;  %v5196_v35 = vunpack.c.l.s8.bf16 %v4820_v33 }
 0x7aa   : > { %5529 = vmatprep.subr.bf16.mxu0 %v5139_v42  ;;  %5693 = vmatprep.subr.bf16.mxu1 %v5141_v23  ;;  %v5203_v42 = vunpack.c.h.s8.bf16 %v4819_v58  ;;  %v5205_v23 = vunpack.c.h.s8.bf16 %v4821_v56 }
 0x7ad   : > { %5530 = vmatpush1.bf16.msra.mxu0 %v5138_v36  ;;  %5694 = vmatpush1.bf16.msra.mxu1 %v5140_v16  ;;  %v5202_v36 = vunpack.c.h.s8.bf16 %v4818_v6  ;;  %v5204_v16 = vunpack.c.h.s8.bf16 %v4820_v33  ;;  %v4850_v33 = vld [vmem:[%s7240_s30 + $0x4c0] sm:$0xff] }
 0x7ae   : > { %5531 = vmatprep.subr.bf16.mxu0 %v5147_v31  ;;  %5695 = vmatprep.subr.bf16.mxu1 %v5149_v29  ;;  %v4692_v31 = vmax.f32 %v9108_v8, 0.0  ;;  %v5211_v29 = vunpack.c.l.s8.bf16 %v4827_v39 }
 0x7b1   : > { %5532 = vmatpush1.bf16.msra.mxu0 %v5146_v47  ;;  %5696 = vmatpush1.bf16.msra.mxu1 %v5148_v11  ;;  %v4695_v47 = vmax.f32 %v9141_v52, 0.0  ;;  %v4828_v11 = vld [vmem:[%s7240_s30 + $0x410] sm:$0xff]  ;;  %v4837_v52 = vld [vmem:[%s7240_s30 + $0x458] sm:$0xff] }
 0x7b2   : > { %5533 = vmatprep.subr.bf16.mxu0 %v5155_v27  ;;  %5697 = vmatprep.subr.bf16.mxu1 %v5157_v63  ;;  %v5210_v27 = vunpack.c.l.s8.bf16 %v4826_v44  ;;  %v9182_v63 = vpack.c.bf16 %v4692_v31, %v4692_v31  ;;  %v5212_v10 = vunpack.c.l.s8.bf16 %v4828_v11  ;;  %v5237_v41 = vunpack.c.h.s8.bf16 %v4837_v52 }
 0x7b3   : > { %v9184_v8 = vpack.c.bf16 %v4695_v47, %v4695_v47  ;;  %v5266_v31 = vunpack.c.h.s8.bf16 %v4850_v33 }
 0x7b5   : > { %5534 = vmatpush1.bf16.msra.mxu0 %v5154_v50  ;;  %5698 = vmatpush1.bf16.msra.mxu1 %v5156_v15  ;;  %v5221_v50 = vunpack.c.h.s8.bf16 %v4829_v37  ;;  %v4835_v15 = vld [vmem:[%s7240_s30 + $0x448] sm:$0xff] }
 0x7b6   : > { %5535 = vmatprep.subr.bf16.mxu0 %v5163_v25  ;;  %5699 = vmatprep.subr.bf16.mxu1 %v5165_v40  ;;  %v5218_v25 = vunpack.c.h.s8.bf16 %v4826_v44  ;;  %v5220_v40 = vunpack.c.h.s8.bf16 %v4828_v11  ;;  %v5227_v24 = vunpack.c.l.s8.bf16 %v4835_v15  ;;  %v5235_v28 = vunpack.c.h.s8.bf16 %v4835_v15  ;;  %v4858_v44 = vld [vmem:[%s7240_s30 + $0x500] sm:$0xff]  ;;  %v4860_v11 = vld [vmem:[%s7240_s30 + $0x510] sm:$0xff]  ;;  %v4867_v15 = vld [vmem:[%s7240_s30 + $0x548] sm:$0xff] }
 0x7b9   : > { %5536 = vmatpush1.bf16.msra.mxu0 %v5162_v53  ;;  %5700 = vmatpush1.bf16.msra.mxu1 %v5164_v2  ;;  %v5229_v53 = vunpack.c.l.s8.bf16 %v4837_v52  ;;  %v4836_v2 = vld [vmem:[%s7240_s30 + $0x450] sm:$0xff]  ;;  %v4869_v52 = vld [vmem:[%s7240_s30 + $0x558] sm:$0xff] }
 0x7ba   : > { %5537 = vmatprep.subr.bf16.mxu0 %v5171_v57  ;;  %5701 = vmatprep.subr.bf16.mxu1 %v5173_v30  ;;  %v5226_v57 = vunpack.c.l.s8.bf16 %v4834_v13  ;;  %v5228_v30 = vunpack.c.l.s8.bf16 %v4836_v2 }
 0x7bd   : > { %5538 = vmatpush1.bf16.msra.mxu0 %v5170_v3  ;;  %5702 = vmatpush1.bf16.msra.mxu1 %v5172_v12  ;;  %v4843_v3 = vld [vmem:[%s7240_s30 + $0x488] sm:$0xff]  ;;  %v4845_v12 = vld [vmem:[%s7240_s30 + $0x498] sm:$0xff] }
 0x7be   : > { %5539 = vmatprep.subr.bf16.mxu0 %v5179_v38  ;;  %5703 = vmatprep.subr.bf16.mxu1 %v5181_v4  ;;  %v5234_v38 = vunpack.c.h.s8.bf16 %v4834_v13  ;;  %v5236_v4 = vunpack.c.h.s8.bf16 %v4836_v2  ;;  %v5243_v60 = vunpack.c.l.s8.bf16 %v4843_v3  ;;  %v5251_v58 = vunpack.c.h.s8.bf16 %v4843_v3  ;;  %v4866_v13 = vld [vmem:[%s7240_s30 + $0x540] sm:$0xff]  ;;  %v4868_v2 = vld [vmem:[%s7240_s30 + $0x550] sm:$0xff]  ;;  %v4875_v3 = vld [vmem:[%s7240_s30 + $0x588] sm:$0xff] }
 0x7bf   : > { %v5253_v56 = vunpack.c.h.s8.bf16 %v4845_v12 }
 0x7c1   : > { %5540 = vmatpush1.bf16.msra.mxu0 %v5178_v14  ;;  %5704 = vmatpush1.bf16.msra.mxu1 %v5180_v19  ;;  %v5245_v14 = vunpack.c.l.s8.bf16 %v4845_v12  ;;  %v4844_v19 = vld [vmem:[%s7240_s30 + $0x490] sm:$0xff]  ;;  %v4877_v12 = vld [vmem:[%s7240_s30 + $0x598] sm:$0xff] }
 0x7c2   : > { %5541 = vmatprep.subr.bf16.mxu0 %v5187_v54  ;;  %5705 = vmatprep.subr.bf16.mxu1 %v5189_v59  ;;  %v5242_v54 = vunpack.c.l.s8.bf16 %v4842_v34  ;;  %v5244_v59 = vunpack.c.l.s8.bf16 %v4844_v19 }
 0x7c5   : > { %5542 = vmatpush1.bf16.msra.mxu0 %v5186_v62  ;;  %5706 = vmatpush1.bf16.msra.mxu1 %v5188_v26  ;;  %v4851_v62 = vld [vmem:[%s7240_s30 + $0x4c8] sm:$0xff]  ;;  %v4853_v26 = vld [vmem:[%s7240_s30 + $0x4d8] sm:$0xff] }
 0x7c6   : > { %5543 = vmatprep.subr.bf16.mxu0 %v5195_v61  ;;  %5707 = vmatprep.subr.bf16.mxu1 %v5197_v17  ;;  %v5250_v61 = vunpack.c.h.s8.bf16 %v4842_v34  ;;  %v5252_v17 = vunpack.c.h.s8.bf16 %v4844_v19  ;;  %v5259_v6 = vunpack.c.l.s8.bf16 %v4851_v62  ;;  %v5267_v39 = vunpack.c.h.s8.bf16 %v4851_v62  ;;  %v4874_v34 = vld [vmem:[%s7240_s30 + $0x580] sm:$0xff]  ;;  %v4876_v19 = vld [vmem:[%s7240_s30 + $0x590] sm:$0xff]  ;;  %v4883_v62 = vld [vmem:[%s7240_s30 + $0x5c8] sm:$0xff] }
 0x7c7   : > { %v5269_v37 = vunpack.c.h.s8.bf16 %v4853_v26 }
 0x7c9   : > { %5544 = vmatpush1.bf16.msra.mxu0 %v5194_v55  ;;  %5708 = vmatpush1.bf16.msra.mxu1 %v5196_v35  ;;  %v5261_v55 = vunpack.c.l.s8.bf16 %v4853_v26  ;;  %v4852_v35 = vld [vmem:[%s7240_s30 + $0x4d0] sm:$0xff]  ;;  %v4885_v26 = vld [vmem:[%s7240_s30 + $0x5d8] sm:$0xff] }
 0x7ca   : > { %5545 = vmatprep.subr.bf16.mxu0 %v5203_v42  ;;  %5709 = vmatprep.subr.bf16.mxu1 %v5205_v23  ;;  %v5258_v42 = vunpack.c.l.s8.bf16 %v4850_v33  ;;  %v5260_v23 = vunpack.c.l.s8.bf16 %v4852_v35  ;;  %v4882_v33 = vld [vmem:[%s7240_s30 + $0x5c0] sm:$0xff] }
 0x7cd   : > { %5546 = vmatpush1.bf16.msra.mxu0 %v5202_v36  ;;  %5710 = vmatpush1.bf16.msra.mxu1 %v5204_v16  ;;  %v4859_v36 = vld [vmem:[%s7240_s30 + $0x508] sm:$0xff]  ;;  %v4861_v16 = vld [vmem:[%s7240_s30 + $0x518] sm:$0xff] }
 0x7ce   : > { %5556 = vmatprep.subr.bf16.mxu0 %v5211_v29  ;;  %5720 = vmatprep.subr.bf16.mxu1 %v5213_v1  ;;  %v5268_v29 = vunpack.c.h.s8.bf16 %v4852_v35  ;;  %v5275_v1 = vunpack.c.l.s8.bf16 %v4859_v36  ;;  %v5277_v47 = vunpack.c.l.s8.bf16 %v4861_v16  ;;  %v4884_v35 = vld [vmem:[%s7240_s30 + $0x5d0] sm:$0xff] }
 0x7d0   : > { %5548 = vmatmul.mubr.bf16.vlgmr.msra.gmra.mrb[16].mxu0 %v9182_v63  ;;  %5712 = vmatmul.mubr.bf16.vlgmr.msra.gmra.mrb[16].mxu1 %v9182_v63 }
 0x7d1   : > { %5557 = vmatpush1.bf16.msra.mxu0 %v5210_v27  ;;  %5588 = vmatprep.mubr.bf16.mxu0 %v9184_v8  ;;  %v5274_v27 = vunpack.c.l.s8.bf16 %v4858_v44 }
 0x7d2   : > { %5721 = vmatpush1.bf16.msra.mxu1 %v5212_v10  ;;  %5752 = vmatprep.mubr.bf16.mxu1 %v9184_v8  ;;  %v5276_v10 = vunpack.c.l.s8.bf16 %v4860_v11 }
 0x7d3   : > { %5558 = vmatprep.subr.bf16.mxu0 %v5219_v0  ;;  %5722 = vmatprep.subr.bf16.mxu1 %v5221_v50  ;;  %v5283_v0 = vunpack.c.h.s8.bf16 %v4859_v36  ;;  %v5285_v50 = vunpack.c.h.s8.bf16 %v4861_v16  ;;  %v4891_v36 = vld [vmem:[%s7240_s30 + $0x608] sm:$0xff]  ;;  %v4893_v16 = vld [vmem:[%s7240_s30 + $0x618] sm:$0xff] }
 0x7d5   : > { %5559 = vmatpush1.bf16.msra.mxu0 %v5218_v25  ;;  %v5282_v25 = vunpack.c.h.s8.bf16 %v4858_v44  ;;  %v5339_v44 = vunpack.c.l.s8.bf16 %v4891_v36 }
 0x7d6   : > { %5723 = vmatpush1.bf16.msra.mxu1 %v5220_v40  ;;  %5560 = vmatprep.subr.bf16.mxu0 %v5227_v24  ;;  %v5284_v40 = vunpack.c.h.s8.bf16 %v4860_v11  ;;  %v5291_v24 = vunpack.c.l.s8.bf16 %v4867_v15  ;;  %v5341_v11 = vunpack.c.l.s8.bf16 %v4893_v16 }
 0x7d7   : > { %5724 = vmatprep.subr.bf16.mxu1 %v5229_v53  ;;  %v5293_v53 = vunpack.c.l.s8.bf16 %v4869_v52 }
 0x7d9   : > { %5561 = vmatpush1.bf16.msra.mxu0 %v5226_v57  ;;  %v5290_v57 = vunpack.c.l.s8.bf16 %v4866_v13 }
 0x7da   : > { %5725 = vmatpush1.bf16.msra.mxu1 %v5228_v30  ;;  %5562 = vmatprep.subr.bf16.mxu0 %v5235_v28  ;;  %v5292_v30 = vunpack.c.l.s8.bf16 %v4868_v2  ;;  %v5299_v28 = vunpack.c.h.s8.bf16 %v4867_v15  ;;  %v5347_v15 = vunpack.c.h.s8.bf16 %v4891_v36 }
 0x7db   : > { %5726 = vmatprep.subr.bf16.mxu1 %v5237_v41  ;;  %v5301_v41 = vunpack.c.h.s8.bf16 %v4869_v52  ;;  %v4899_v52 = vld [vmem:[%s7240_s30 + $0x648] sm:$0xff] }
 0x7dd   : > { %5563 = vmatpush1.bf16.msra.mxu0 %v5234_v38  ;;  %v5298_v38 = vunpack.c.h.s8.bf16 %v4866_v13 }
 0x7de   : > { %5727 = vmatpush1.bf16.msra.mxu1 %v5236_v4  ;;  %5564 = vmatprep.subr.bf16.mxu0 %v5243_v60  ;;  %v5300_v4 = vunpack.c.h.s8.bf16 %v4868_v2  ;;  %v5307_v60 = vunpack.c.l.s8.bf16 %v4875_v3  ;;  %v4898_v2 = vld [vmem:[%s7240_s30 + $0x640] sm:$0xff] }
 0x7df   : > { %5728 = vmatprep.subr.bf16.mxu1 %v5245_v14  ;;  %v5309_v14 = vunpack.c.l.s8.bf16 %v4877_v12 }
 0x7e1   : > { %5565 = vmatpush1.bf16.msra.mxu0 %v5242_v54  ;;  %v5306_v54 = vunpack.c.l.s8.bf16 %v4874_v34 }
 0x7e2   : > { %5729 = vmatpush1.bf16.msra.mxu1 %v5244_v59  ;;  %5566 = vmatprep.subr.bf16.mxu0 %v5251_v58  ;;  %v5308_v59 = vunpack.c.l.s8.bf16 %v4876_v19  ;;  %v5315_v58 = vunpack.c.h.s8.bf16 %v4875_v3  ;;  %v5363_v3 = vunpack.c.h.s8.bf16 %v4899_v52 }
 0x7e3   : > { %5730 = vmatprep.subr.bf16.mxu1 %v5253_v56  ;;  %v5317_v56 = vunpack.c.h.s8.bf16 %v4877_v12 }
 0x7e5   : > { %5567 = vmatpush1.bf16.msra.mxu0 %v5250_v61  ;;  %v5314_v61 = vunpack.c.h.s8.bf16 %v4874_v34 }
 0x7e6   : > { %5731 = vmatpush1.bf16.msra.mxu1 %v5252_v17  ;;  %5568 = vmatprep.subr.bf16.mxu0 %v5259_v6  ;;  %v5316_v17 = vunpack.c.h.s8.bf16 %v4876_v19  ;;  %v5323_v6 = vunpack.c.l.s8.bf16 %v4883_v62  ;;  %v4906_v19 = vld [vmem:[%s7240_s30 + $0x680] sm:$0xff] }
 0x7e7   : > { %5732 = vmatprep.subr.bf16.mxu1 %v5261_v55  ;;  %v5325_v55 = vunpack.c.l.s8.bf16 %v4885_v26 }
 0x7e9   : > { %5569 = vmatpush1.bf16.msra.mxu0 %v5258_v42  ;;  %v5322_v42 = vunpack.c.l.s8.bf16 %v4882_v33 }
 0x7ea   : > { %5733 = vmatpush1.bf16.msra.mxu1 %v5260_v23  ;;  %5570 = vmatprep.subr.bf16.mxu0 %v5267_v39  ;;  %v5324_v23 = vunpack.c.l.s8.bf16 %v4884_v35  ;;  %v5331_v39 = vunpack.c.h.s8.bf16 %v4883_v62 }
 0x7eb   : > { %5734 = vmatprep.subr.bf16.mxu1 %v5269_v37  ;;  %v5333_v37 = vunpack.c.h.s8.bf16 %v4885_v26 }
 0x7ed   : > { %5571 = vmatpush1.bf16.msra.mxu0 %v5266_v31  ;;  %v5330_v31 = vunpack.c.h.s8.bf16 %v4882_v33 }
 0x7ee   : > { %5735 = vmatpush1.bf16.msra.mxu1 %v5268_v29  ;;  %5572 = vmatprep.subr.bf16.mxu0 %v5275_v1  ;;  %v4694_v29 = vmax.f32 %v9136_v32, 0.0  ;;  %v5332_v1 = vunpack.c.h.s8.bf16 %v4884_v35  ;;  %v4914_v35 = vld [vmem:[%s7240_s30 + $0x6c0] sm:$0xff] }
 0x7ef   : > { %5736 = vmatprep.subr.bf16.mxu1 %v5277_v47  ;;  %v4890_v47 = vld [vmem:[%s7240_s30 + $0x600] sm:$0xff] }
 0x7f1   : > { %5573 = vmatpush1.bf16.msra.mxu0 %v5274_v27  ;;  %v4892_v27 = vld [vmem:[%s7240_s30 + $0x610] sm:$0xff] }
 0x7f2   : > { %5737 = vmatpush1.bf16.msra.mxu1 %v5276_v10  ;;  %5574 = vmatprep.subr.bf16.mxu0 %v5283_v0  ;;  %v4697_v10 = vmax.f32 %v9148_v5, 0.0  ;;  %v5338_v0 = vunpack.c.l.s8.bf16 %v4890_v47  ;;  %v5340_v32 = vunpack.c.l.s8.bf16 %v4892_v27  ;;  %v5346_v5 = vunpack.c.h.s8.bf16 %v4890_v47 }
 0x7f3   : > { %5738 = vmatprep.subr.bf16.mxu1 %v5285_v50  ;;  %v9224_v50 = vpack.c.bf16 %v4694_v29, %v4694_v29  ;;  %v5348_v13 = vunpack.c.h.s8.bf16 %v4892_v27  ;;  %v4925_v29 = vld [vmem:[%s7240_s30 + $0x718] sm:$0xff] }
 0x7f4   : > { %v5405_v27 = vunpack.c.l.s8.bf16 %v4925_v29 }
 0x7f5   : > { %5575 = vmatpush1.bf16.msra.mxu0 %v5282_v25  ;;  %v9227_v25 = vpack.c.bf16 %v4697_v10, %v4697_v10  ;;  %v4924_v10 = vld [vmem:[%s7240_s30 + $0x710] sm:$0xff] }
 0x7f6   : > { %5739 = vmatpush1.bf16.msra.mxu1 %v5284_v40  ;;  %5576 = vmatprep.subr.bf16.mxu0 %v5291_v24  ;;  %v5349_v40 = vunpack.c.h.s8.bf16 %v4893_v16  ;;  %v4901_v24 = vld [vmem:[%s7240_s30 + $0x658] sm:$0xff] }
 0x7f7   : > { %5740 = vmatprep.subr.bf16.mxu1 %v5293_v53  ;;  %v5355_v53 = vunpack.c.l.s8.bf16 %v4899_v52  ;;  %v5365_v12 = vunpack.c.h.s8.bf16 %v4901_v24  ;;  %v5413_v52 = vunpack.c.h.s8.bf16 %v4925_v29  ;;  %v4705_v29 = vld [vmem:[%s7240_s30 + $0x38] sm:$0xff] }
 0x7f9   : > { %5577 = vmatpush1.bf16.msra.mxu0 %v5290_v57  ;;  %v5357_v57 = vunpack.c.l.s8.bf16 %v4901_v24  ;;  %v4933_v24 = vld [vmem:[%s7240_s30 + $0x758] sm:$0xff] }
 0x7fa   : > { %5741 = vmatpush1.bf16.msra.mxu1 %v5292_v30  ;;  %5578 = vmatprep.subr.bf16.mxu0 %v5299_v28  ;;  %v4900_v30 = vld [vmem:[%s7240_s30 + $0x650] sm:$0xff]  ;;  %v5354_v28 = vunpack.c.l.s8.bf16 %v4898_v2 }
 0x7fb   : > { %5742 = vmatprep.subr.bf16.mxu1 %v5301_v41  ;;  %v5356_v41 = vunpack.c.l.s8.bf16 %v4900_v30  ;;  %v5364_v34 = vunpack.c.h.s8.bf16 %v4900_v30  ;;  %v4932_v30 = vld [vmem:[%s7240_s30 + $0x750] sm:$0xff] }
 0x7fd   : > { %5579 = vmatpush1.bf16.msra.mxu0 %v5298_v38  ;;  %v4907_v38 = vld [vmem:[%s7240_s30 + $0x688] sm:$0xff] }
 0x7fe   : > { %5743 = vmatpush1.bf16.msra.mxu1 %v5300_v4  ;;  %5580 = vmatprep.subr.bf16.mxu0 %v5307_v60  ;;  %v4909_v4 = vld [vmem:[%s7240_s30 + $0x698] sm:$0xff]  ;;  %v5362_v60 = vunpack.c.h.s8.bf16 %v4898_v2  ;;  %v5379_v62 = vunpack.c.h.s8.bf16 %v4907_v38  ;;  %v4930_v2 = vld [vmem:[%s7240_s30 + $0x740] sm:$0xff] }
 0x7ff   : > { %5744 = vmatprep.subr.bf16.mxu1 %v5309_v14  ;;  %v5371_v14 = vunpack.c.l.s8.bf16 %v4907_v38  ;;  %v5381_v26 = vunpack.c.h.s8.bf16 %v4909_v4  ;;  %v4939_v38 = vld [vmem:[%s7240_s30 + $0x788] sm:$0xff] }
 0x801   : > { %5581 = vmatpush1.bf16.msra.mxu0 %v5306_v54  ;;  %v5373_v54 = vunpack.c.l.s8.bf16 %v4909_v4  ;;  %v4941_v4 = vld [vmem:[%s7240_s30 + $0x798] sm:$0xff] }
 0x802   : > { %5745 = vmatpush1.bf16.msra.mxu1 %v5308_v59  ;;  %5582 = vmatprep.subr.bf16.mxu0 %v5315_v58  ;;  %v4908_v59 = vld [vmem:[%s7240_s30 + $0x690] sm:$0xff]  ;;  %v5370_v58 = vunpack.c.l.s8.bf16 %v4906_v19 }
 0x803   : > { %5746 = vmatprep.subr.bf16.mxu1 %v5317_v56  ;;  %v5372_v56 = vunpack.c.l.s8.bf16 %v4908_v59  ;;  %v5380_v33 = vunpack.c.h.s8.bf16 %v4908_v59  ;;  %v4940_v59 = vld [vmem:[%s7240_s30 + $0x790] sm:$0xff] }
 0x805   : > { %5583 = vmatpush1.bf16.msra.mxu0 %v5314_v61  ;;  %v4915_v61 = vld [vmem:[%s7240_s30 + $0x6c8] sm:$0xff] }
 0x806   : > { %5747 = vmatpush1.bf16.msra.mxu1 %v5316_v17  ;;  %5584 = vmatprep.subr.bf16.mxu0 %v5323_v6  ;;  %v4917_v17 = vld [vmem:[%s7240_s30 + $0x6d8] sm:$0xff]  ;;  %v5378_v6 = vunpack.c.h.s8.bf16 %v4906_v19  ;;  %v5395_v36 = vunpack.c.h.s8.bf16 %v4915_v61  ;;  %v4938_v19 = vld [vmem:[%s7240_s30 + $0x780] sm:$0xff] }
 0x807   : > { %5748 = vmatprep.subr.bf16.mxu1 %v5325_v55  ;;  %v5387_v55 = vunpack.c.l.s8.bf16 %v4915_v61  ;;  %v5397_v16 = vunpack.c.h.s8.bf16 %v4917_v17  ;;  %v4947_v61 = vld [vmem:[%s7240_s30 + $0x7c8] sm:$0xff] }
 0x809   : > { %5585 = vmatpush1.bf16.msra.mxu0 %v5322_v42  ;;  %v5389_v42 = vunpack.c.l.s8.bf16 %v4917_v17  ;;  %v4949_v17 = vld [vmem:[%s7240_s30 + $0x7d8] sm:$0xff] }
 0x80a   : > { %5749 = vmatpush1.bf16.msra.mxu1 %v5324_v23  ;;  %5586 = vmatprep.subr.bf16.mxu0 %v5331_v39  ;;  %v4916_v23 = vld [vmem:[%s7240_s30 + $0x6d0] sm:$0xff]  ;;  %v5386_v39 = vunpack.c.l.s8.bf16 %v4914_v35 }
 0x80b   : > { %5750 = vmatprep.subr.bf16.mxu1 %v5333_v37  ;;  %v5388_v37 = vunpack.c.l.s8.bf16 %v4916_v23 }
 0x80d   : > { %5587 = vmatpush1.bf16.msra.mxu0 %v5330_v31  ;;  %v4923_v31 = vld [vmem:[%s7240_s30 + $0x708] sm:$0xff] }
 0x80e   : > { %5751 = vmatpush1.bf16.msra.mxu1 %v5332_v1  ;;  %5597 = vmatprep.subr.bf16.mxu0 %v5339_v44  ;;  %v5394_v1 = vunpack.c.h.s8.bf16 %v4914_v35  ;;  %v5396_v44 = vunpack.c.h.s8.bf16 %v4916_v23  ;;  %v5403_v47 = vunpack.c.l.s8.bf16 %v4923_v31  ;;  %v4946_v35 = vld [vmem:[%s7240_s30 + $0x7c0] sm:$0xff]  ;;  %v4948_v23 = vld [vmem:[%s7240_s30 + $0x7d0] sm:$0xff] }
 0x80f   : > { %5761 = vmatprep.subr.bf16.mxu1 %v5341_v11  ;;  %v4922_v11 = vld [vmem:[%s7240_s30 + $0x700] sm:$0xff] }
 0x810   : > { %5589 = vmatmul.mubr.bf16.vlgmr.msra.gmra.mrb[16].mxu0 %v9224_v50 }
 0x811   : > { %5753 = vmatmul.mubr.bf16.vlgmr.msra.gmra.mrb[16].mxu1 %v9224_v50  ;;  %5598 = vmatpush1.bf16.msra.mxu0 %v5338_v0  ;;  %v5402_v0 = vunpack.c.l.s8.bf16 %v4922_v11 }
 0x812   : > { %5629 = vmatprep.mubr.bf16.mxu0 %v9227_v25  ;;  %5762 = vmatpush1.bf16.msra.mxu1 %v5340_v32  ;;  %v5404_v32 = vunpack.c.l.s8.bf16 %v4924_v10 }
 0x813   : > { %5793 = vmatprep.mubr.bf16.mxu1 %v9227_v25  ;;  %5599 = vmatprep.subr.bf16.mxu0 %v5347_v15  ;;  %v5411_v15 = vunpack.c.h.s8.bf16 %v4923_v31  ;;  %v4703_v31 = vld [vmem:[%s7240_s30 + $0x28] sm:$0xff] }
 0x814   : > { %5763 = vmatprep.subr.bf16.mxu1 %v5349_v40  ;;  %v4931_v40 = vld [vmem:[%s7240_s30 + $0x748] sm:$0xff] }
 0x815   : > { %5600 = vmatpush1.bf16.msra.mxu0 %v5346_v5  ;;  %v5410_v5 = vunpack.c.h.s8.bf16 %v4922_v11  ;;  %v4959_v11 = vunpack.c.l.s8.bf16 %v4703_v31 }
 0x816   : > { %5764 = vmatpush1.bf16.msra.mxu1 %v5348_v13  ;;  %5601 = vmatprep.subr.bf16.mxu0 %v5355_v53  ;;  %v5412_v13 = vunpack.c.h.s8.bf16 %v4924_v10  ;;  %v5419_v53 = vunpack.c.l.s8.bf16 %v4931_v40  ;;  %v4961_v10 = vunpack.c.l.s8.bf16 %v4705_v29 }
 0x817   : > { %5765 = vmatprep.subr.bf16.mxu1 %v5357_v57  ;;  %v5421_v57 = vunpack.c.l.s8.bf16 %v4933_v24 }
 0x819   : > { %5602 = vmatpush1.bf16.msra.mxu0 %v5354_v28  ;;  %v5418_v28 = vunpack.c.l.s8.bf16 %v4930_v2 }
 0x81a   : > { %5766 = vmatpush1.bf16.msra.mxu1 %v5356_v41  ;;  %5603 = vmatprep.subr.bf16.mxu0 %v5363_v3  ;;  %v5420_v41 = vunpack.c.l.s8.bf16 %v4932_v30  ;;  %v5427_v3 = vunpack.c.h.s8.bf16 %v4931_v40  ;;  %v4711_v40 = vld [vmem:[%s7240_s30 + $0x68] sm:$0xff] }
 0x81b   : > { %5767 = vmatprep.subr.bf16.mxu1 %v5365_v12  ;;  %v5429_v12 = vunpack.c.h.s8.bf16 %v4933_v24  ;;  %v4969_v24 = vunpack.c.h.s8.bf16 %v4705_v29  ;;  %v4737_v29 = vld [vmem:[%s7240_s30 + $0x138] sm:$0xff] }
 0x81d   : > { %5604 = vmatpush1.bf16.msra.mxu0 %v5362_v60  ;;  %v5426_v60 = vunpack.c.h.s8.bf16 %v4930_v2  ;;  %v4975_v2 = vunpack.c.l.s8.bf16 %v4711_v40 }
 0x81e   : > { %5768 = vmatpush1.bf16.msra.mxu1 %v5364_v34  ;;  %5605 = vmatprep.subr.bf16.mxu0 %v5371_v14  ;;  %v5428_v34 = vunpack.c.h.s8.bf16 %v4932_v30  ;;  %v5435_v14 = vunpack.c.l.s8.bf16 %v4939_v38 }
 0x81f   : > { %5769 = vmatprep.subr.bf16.mxu1 %v5373_v54  ;;  %v5437_v54 = vunpack.c.l.s8.bf16 %v4941_v4 }
 0x821   : > { %5606 = vmatpush1.bf16.msra.mxu0 %v5370_v58  ;;  %v5434_v58 = vunpack.c.l.s8.bf16 %v4938_v19 }
 0x822   : > { %5770 = vmatpush1.bf16.msra.mxu1 %v5372_v56  ;;  %5607 = vmatprep.subr.bf16.mxu0 %v5379_v62  ;;  %v5436_v56 = vunpack.c.l.s8.bf16 %v4940_v59  ;;  %v5443_v62 = vunpack.c.h.s8.bf16 %v4939_v38 }
 0x823   : > { %5771 = vmatprep.subr.bf16.mxu1 %v5381_v26  ;;  %v5445_v26 = vunpack.c.h.s8.bf16 %v4941_v4  ;;  %v4719_v4 = vld [vmem:[%s7240_s30 + $0xa8] sm:$0xff] }
 0x825   : > { %5608 = vmatpush1.bf16.msra.mxu0 %v5378_v6  ;;  %v5442_v6 = vunpack.c.h.s8.bf16 %v4938_v19  ;;  %v4718_v19 = vld [vmem:[%s7240_s30 + $0xa0] sm:$0xff] }
 0x826   : > { %5772 = vmatpush1.bf16.msra.mxu1 %v5380_v33  ;;  %5609 = vmatprep.subr.bf16.mxu0 %v5387_v55  ;;  %v5444_v33 = vunpack.c.h.s8.bf16 %v4940_v59  ;;  %v5451_v55 = vunpack.c.l.s8.bf16 %v4947_v61  ;;  %v4720_v59 = vld [vmem:[%s7240_s30 + $0xb0] sm:$0xff] }
 0x827   : > { %5773 = vmatprep.subr.bf16.mxu1 %v5389_v42  ;;  %v5453_v42 = vunpack.c.l.s8.bf16 %v4949_v17 }
 0x829   : > { %5610 = vmatpush1.bf16.msra.mxu0 %v5386_v39  ;;  %v5450_v39 = vunpack.c.l.s8.bf16 %v4946_v35 }
 0x82a   : > { %5774 = vmatpush1.bf16.msra.mxu1 %v5388_v37  ;;  %5611 = vmatprep.subr.bf16.mxu0 %v5395_v36  ;;  %v5452_v37 = vunpack.c.l.s8.bf16 %v4948_v23  ;;  %v5459_v36 = vunpack.c.h.s8.bf16 %v4947_v61  ;;  %v4727_v61 = vld [vmem:[%s7240_s30 + $0xe8] sm:$0xff] }
 0x82b   : > { %5775 = vmatprep.subr.bf16.mxu1 %v5397_v16  ;;  %v5461_v16 = vunpack.c.h.s8.bf16 %v4949_v17  ;;  %v4729_v17 = vld [vmem:[%s7240_s30 + $0xf8] sm:$0xff] }
 0x82d   : > { %5612 = vmatpush1.bf16.msra.mxu0 %v5394_v1  ;;  %v5458_v1 = vunpack.c.h.s8.bf16 %v4946_v35  ;;  %v4726_v35 = vld [vmem:[%s7240_s30 + $0xe0] sm:$0xff] }
 0x82e   : > { %5776 = vmatpush1.bf16.msra.mxu1 %v5396_v44  ;;  %5613 = vmatprep.subr.bf16.mxu0 %v5403_v47  ;;  %v4696_v44 = vmax.f32 %v9146_v49, 0.0  ;;  %v5460_v47 = vunpack.c.h.s8.bf16 %v4948_v23  ;;  %v4967_v49 = vunpack.c.h.s8.bf16 %v4703_v31  ;;  %v4728_v23 = vld [vmem:[%s7240_s30 + $0xf0] sm:$0xff]  ;;  %v4735_v31 = vld [vmem:[%s7240_s30 + $0x128] sm:$0xff] }
 0x82f   : > { %5777 = vmatprep.subr.bf16.mxu1 %v5405_v27  ;;  %v4702_v27 = vld [vmem:[%s7240_s30 + $0x20] sm:$0xff] }
 0x831   : > { %5614 = vmatpush1.bf16.msra.mxu0 %v5402_v0  ;;  %v4704_v0 = vld [vmem:[%s7240_s30 + $0x30] sm:$0xff] }
 0x832   : > { %5778 = vmatpush1.bf16.msra.mxu1 %v5404_v32  ;;  %5615 = vmatprep.subr.bf16.mxu0 %v5411_v15  ;;  %v4958_v32 = vunpack.c.l.s8.bf16 %v4702_v27  ;;  %v9265_v15 = vpack.c.bf16 %v4696_v44, %v4696_v44  ;;  %v5016_v44 = vunpack.c.h.s8.bf16 %v4728_v23 }
 0x833   : > { %5779 = vmatprep.subr.bf16.mxu1 %v5413_v52  ;;  %v4960_v52 = vunpack.c.l.s8.bf16 %v4704_v0 }
 0x835   : > { %5616 = vmatpush1.bf16.msra.mxu0 %v5410_v5  ;;  %v4713_v5 = vld [vmem:[%s7240_s30 + $0x78] sm:$0xff] }
 0x836   : > { %5780 = vmatpush1.bf16.msra.mxu1 %v5412_v13  ;;  %5617 = vmatprep.subr.bf16.mxu0 %v5419_v53  ;;  %v4966_v13 = vunpack.c.h.s8.bf16 %v4702_v27  ;;  %v4968_v53 = vunpack.c.h.s8.bf16 %v4704_v0  ;;  %v4977_v30 = vunpack.c.l.s8.bf16 %v4713_v5  ;;  %v4985_v38 = vunpack.c.h.s8.bf16 %v4713_v5 }
 0x837   : > { %5781 = vmatprep.subr.bf16.mxu1 %v5421_v57  ;;  %v4710_v57 = vld [vmem:[%s7240_s30 + $0x60] sm:$0xff]  ;;  %v5025_v27 = vunpack.c.l.s8.bf16 %v4737_v29 }
 0x839   : > { %5618 = vmatpush1.bf16.msra.mxu0 %v5418_v28  ;;  %v4712_v28 = vld [vmem:[%s7240_s30 + $0x70] sm:$0xff] }
 0x83a   : > { %5782 = vmatpush1.bf16.msra.mxu1 %v5420_v41  ;;  %5619 = vmatprep.subr.bf16.mxu0 %v5427_v3  ;;  %v4974_v41 = vunpack.c.l.s8.bf16 %v4710_v57  ;;  %v4976_v3 = vunpack.c.l.s8.bf16 %v4712_v28 }
 0x83b   : > { %5783 = vmatprep.subr.bf16.mxu1 %v5429_v12  ;;  %v4983_v12 = vunpack.c.h.s8.bf16 %v4711_v40  ;;  %v4743_v40 = vld [vmem:[%s7240_s30 + $0x168] sm:$0xff] }
 0x83d   : > { %5620 = vmatpush1.bf16.msra.mxu0 %v5426_v60  ;;  %v4721_v60 = vld [vmem:[%s7240_s30 + $0xb8] sm:$0xff] }
 0x83e   : > { %5784 = vmatpush1.bf16.msra.mxu1 %v5428_v34  ;;  %5621 = vmatprep.subr.bf16.mxu0 %v5435_v14  ;;  %v4982_v34 = vunpack.c.h.s8.bf16 %v4710_v57  ;;  %v4991_v14 = vunpack.c.l.s8.bf16 %v4719_v4 }
 0x83f   : > { %5785 = vmatprep.subr.bf16.mxu1 %v5437_v54  ;;  %v4993_v54 = vunpack.c.l.s8.bf16 %v4721_v60 }
 0x841   : > { %5622 = vmatpush1.bf16.msra.mxu0 %v5434_v58  ;;  %v4990_v58 = vunpack.c.l.s8.bf16 %v4718_v19 }
 0x842   : > { %5786 = vmatpush1.bf16.msra.mxu1 %v5436_v56  ;;  %5623 = vmatprep.subr.bf16.mxu0 %v5443_v62  ;;  %v4992_v56 = vunpack.c.l.s8.bf16 %v4720_v59  ;;  %v4999_v62 = vunpack.c.h.s8.bf16 %v4719_v4  ;;  %v4753_v4 = vld [vmem:[%s7240_s30 + $0x1b8] sm:$0xff] }
 0x843   : > { %5787 = vmatprep.subr.bf16.mxu1 %v5445_v26  ;;  %v5001_v26 = vunpack.c.h.s8.bf16 %v4721_v60 }
 0x845   : > { %5624 = vmatpush1.bf16.msra.mxu0 %v5442_v6  ;;  %v4998_v6 = vunpack.c.h.s8.bf16 %v4718_v19  ;;  %v5057_v19 = vunpack.c.l.s8.bf16 %v4753_v4 }
 0x846   : > { %5788 = vmatpush1.bf16.msra.mxu1 %v5444_v33  ;;  %5625 = vmatprep.subr.bf16.mxu0 %v5451_v55  ;;  %v5000_v33 = vunpack.c.h.s8.bf16 %v4720_v59  ;;  %v5007_v55 = vunpack.c.l.s8.bf16 %v4727_v61 }
 0x847   : > { %5789 = vmatprep.subr.bf16.mxu1 %v5453_v42  ;;  %v5009_v42 = vunpack.c.l.s8.bf16 %v4729_v17 }
 0x849   : > { %5626 = vmatpush1.bf16.msra.mxu0 %v5450_v39  ;;  %v5006_v39 = vunpack.c.l.s8.bf16 %v4726_v35 }
 0x84a   : > { %5790 = vmatpush1.bf16.msra.mxu1 %v5452_v37  ;;  %5627 = vmatprep.subr.bf16.mxu0 %v5459_v36  ;;  %v5008_v37 = vunpack.c.l.s8.bf16 %v4728_v23  ;;  %v5015_v36 = vunpack.c.h.s8.bf16 %v4727_v61  ;;  %v4761_v61 = vld [vmem:[%s7240_s30 + $0x1f8] sm:$0xff] }
 0x84b   : > { %5791 = vmatprep.subr.bf16.mxu1 %v5461_v16  ;;  %v5017_v16 = vunpack.c.h.s8.bf16 %v4729_v17 }
 0x84d   : > { %5628 = vmatpush1.bf16.msra.mxu0 %v5458_v1  ;;  %v5014_v1 = vunpack.c.h.s8.bf16 %v4726_v35  ;;  %v5073_v35 = vunpack.c.l.s8.bf16 %v4761_v61 }
 0x84e   : > { %5792 = vmatpush1.bf16.msra.mxu1 %v5460_v47  ;;  %5802 = vmatprep.subr.bf16.mxu0 %v4959_v11  ;;  %v5023_v47 = vunpack.c.l.s8.bf16 %v4735_v31  ;;  %v4734_v11 = vld [vmem:[%s7240_s30 + $0x120] sm:$0xff] }
 0x84f   : > { %5966 = vmatprep.subr.bf16.mxu1 %v4961_v10  ;;  %v4736_v10 = vld [vmem:[%s7240_s30 + $0x130] sm:$0xff]  ;;  %v5022_v0 = vunpack.c.l.s8.bf16 %v4734_v11  ;;  %v5030_v5 = vunpack.c.h.s8.bf16 %v4734_v11 }
 0x850   : > { %5630 = vmatmul.mubr.bf16.vlgmr.msra.gmra.mrb[16].mxu0 %v9265_v15 }
 0x851   : > { %5794 = vmatmul.mubr.bf16.vlgmr.msra.gmra.mrb[16].mxu1 %v9265_v15  ;;  %5803 = vmatpush1.bf16.msra.mxu0 %v4958_v32  ;;  %v5024_v32 = vunpack.c.l.s8.bf16 %v4736_v10 }
 0x852   : > { %5834 = vmatprep.mubr.bf16.mxu0 %v9120_v9  ;;  %5967 = vmatpush1.bf16.msra.mxu1 %v4960_v52  ;;  %v5031_v52 = vunpack.c.h.s8.bf16 %v4735_v31  ;;  %v4769_v31 = vld [vmem:[%s7240_s30 + $0x238] sm:$0xff] }
 0x853   : > { %5998 = vmatprep.mubr.bf16.mxu1 %v9120_v9  ;;  %5804 = vmatprep.subr.bf16.mxu0 %v4967_v49  ;;  %v4984_v9 = vunpack.c.h.s8.bf16 %v4712_v28  ;;  %v5033_v49 = vunpack.c.h.s8.bf16 %v4737_v29  ;;  %v5089_v11 = vunpack.c.l.s8.bf16 %v4769_v31 }
 0x854   : > { %5968 = vmatprep.subr.bf16.mxu1 %v4969_v24  ;;  %v4745_v24 = vld [vmem:[%s7240_s30 + $0x178] sm:$0xff] }
 0x855   : > { %5805 = vmatpush1.bf16.msra.mxu0 %v4966_v13  ;;  %v5032_v13 = vunpack.c.h.s8.bf16 %v4736_v10  ;;  %v5041_v57 = vunpack.c.l.s8.bf16 %v4745_v24 }
 0x856   : > { %5969 = vmatpush1.bf16.msra.mxu1 %v4968_v53  ;;  %5806 = vmatprep.subr.bf16.mxu0 %v4975_v2  ;;  %v5039_v53 = vunpack.c.l.s8.bf16 %v4743_v40  ;;  %v4742_v2 = vld [vmem:[%s7240_s30 + $0x160] sm:$0xff] }
 0x857   : > { %5970 = vmatprep.subr.bf16.mxu1 %v4977_v30  ;;  %v4744_v30 = vld [vmem:[%s7240_s30 + $0x170] sm:$0xff]  ;;  %v5038_v28 = vunpack.c.l.s8.bf16 %v4742_v2  ;;  %v5046_v60 = vunpack.c.h.s8.bf16 %v4742_v2 }
 0x859   : > { %5807 = vmatpush1.bf16.msra.mxu0 %v4974_v41  ;;  %v5040_v41 = vunpack.c.l.s8.bf16 %v4744_v30 }
 0x85a   : > { %5971 = vmatpush1.bf16.msra.mxu1 %v4976_v3  ;;  %5808 = vmatprep.subr.bf16.mxu0 %v4983_v12  ;;  %v5047_v3 = vunpack.c.h.s8.bf16 %v4743_v40  ;;  %v5049_v12 = vunpack.c.h.s8.bf16 %v4745_v24  ;;  %v4777_v40 = vld [vmem:[%s7240_s30 + $0x278] sm:$0xff] }
 0x85b   : > { %5972 = vmatprep.subr.bf16.mxu1 %v4985_v38  ;;  %v4751_v38 = vld [vmem:[%s7240_s30 + $0x1a8] sm:$0xff]  ;;  %v5105_v2 = vunpack.c.l.s8.bf16 %v4777_v40 }
 0x85d   : > { %5809 = vmatpush1.bf16.msra.mxu0 %v4982_v34  ;;  %v5048_v34 = vunpack.c.h.s8.bf16 %v4744_v30 }
 0x85e   : > { %5973 = vmatpush1.bf16.msra.mxu1 %v4984_v9  ;;  %5810 = vmatprep.subr.bf16.mxu0 %v4991_v14  ;;  %v5055_v9 = vunpack.c.l.s8.bf16 %v4751_v38  ;;  %v4750_v14 = vld [vmem:[%s7240_s30 + $0x1a0] sm:$0xff] }
 0x85f   : > { %5974 = vmatprep.subr.bf16.mxu1 %v4993_v54  ;;  %v4752_v54 = vld [vmem:[%s7240_s30 + $0x1b0] sm:$0xff]  ;;  %v5054_v59 = vunpack.c.l.s8.bf16 %v4750_v14  ;;  %v5062_v17 = vunpack.c.h.s8.bf16 %v4750_v14 }
 0x861   : > { %5811 = vmatpush1.bf16.msra.mxu0 %v4990_v58  ;;  %v5056_v58 = vunpack.c.l.s8.bf16 %v4752_v54 }
 0x862   : > { %5975 = vmatpush1.bf16.msra.mxu1 %v4992_v56  ;;  %5812 = vmatprep.subr.bf16.mxu0 %v4999_v62  ;;  %v5063_v56 = vunpack.c.h.s8.bf16 %v4751_v38  ;;  %v5065_v62 = vunpack.c.h.s8.bf16 %v4753_v4 }
 0x863   : > { %5976 = vmatprep.subr.bf16.mxu1 %v5001_v26  ;;  %v4759_v26 = vld [vmem:[%s7240_s30 + $0x1e8] sm:$0xff] }
 0x865   : > { %5813 = vmatpush1.bf16.msra.mxu0 %v4998_v6  ;;  %v5064_v6 = vunpack.c.h.s8.bf16 %v4752_v54 }
 0x866   : > { %5977 = vmatpush1.bf16.msra.mxu1 %v5000_v33  ;;  %5814 = vmatprep.subr.bf16.mxu0 %v5007_v55  ;;  %v5071_v33 = vunpack.c.l.s8.bf16 %v4759_v26  ;;  %v4758_v55 = vld [vmem:[%s7240_s30 + $0x1e0] sm:$0xff] }
 0x867   : > { %5978 = vmatprep.subr.bf16.mxu1 %v5009_v42  ;;  %v4760_v42 = vld [vmem:[%s7240_s30 + $0x1f0] sm:$0xff]  ;;  %v5070_v23 = vunpack.c.l.s8.bf16 %v4758_v55  ;;  %v5078_v29 = vunpack.c.h.s8.bf16 %v4758_v55 }
 0x869   : > { %5815 = vmatpush1.bf16.msra.mxu0 %v5006_v39  ;;  %v5072_v39 = vunpack.c.l.s8.bf16 %v4760_v42 }
 0x86a   : > { %5979 = vmatpush1.bf16.msra.mxu1 %v5008_v37  ;;  %5816 = vmatprep.subr.bf16.mxu0 %v5015_v36  ;;  %v5079_v37 = vunpack.c.h.s8.bf16 %v4759_v26  ;;  %v5081_v36 = vunpack.c.h.s8.bf16 %v4761_v61 }
 0x86b   : > { %5980 = vmatprep.subr.bf16.mxu1 %v5017_v16  ;;  %v4767_v16 = vld [vmem:[%s7240_s30 + $0x228] sm:$0xff] }
 0x86d   : > { %5817 = vmatpush1.bf16.msra.mxu0 %v5014_v1  ;;  %v5080_v1 = vunpack.c.h.s8.bf16 %v4760_v42 }
 0x86e   : > { %5981 = vmatpush1.bf16.msra.mxu1 %v5016_v44  ;;  %5818 = vmatprep.subr.bf16.mxu0 %v5023_v47  ;;  %v5087_v44 = vunpack.c.l.s8.bf16 %v4767_v16  ;;  %v4766_v47 = vld [vmem:[%s7240_s30 + $0x220] sm:$0xff] }
 0x86f   : > { %5982 = vmatprep.subr.bf16.mxu1 %v5025_v27  ;;  %v4768_v27 = vld [vmem:[%s7240_s30 + $0x230] sm:$0xff]  ;;  %v5086_v10 = vunpack.c.l.s8.bf16 %v4766_v47  ;;  %v5094_v24 = vunpack.c.h.s8.bf16 %v4766_v47 }
 0x871   : > { %5819 = vmatpush1.bf16.msra.mxu0 %v5022_v0  ;;  %v5088_v0 = vunpack.c.l.s8.bf16 %v4768_v27 }
 0x872   : > { %5983 = vmatpush1.bf16.msra.mxu1 %v5024_v32  ;;  %5820 = vmatprep.subr.bf16.mxu0 %v5031_v52  ;;  %v5095_v32 = vunpack.c.h.s8.bf16 %v4767_v16  ;;  %v4775_v52 = vld [vmem:[%s7240_s30 + $0x268] sm:$0xff] }
 0x873   : > { %5984 = vmatprep.subr.bf16.mxu1 %v5033_v49  ;;  %v5097_v49 = vunpack.c.h.s8.bf16 %v4769_v31 }
 0x875   : > { %5821 = vmatpush1.bf16.msra.mxu0 %v5030_v5  ;;  %v5096_v5 = vunpack.c.h.s8.bf16 %v4768_v27 }
 0x876   : > { %5985 = vmatpush1.bf16.msra.mxu1 %v5032_v13  ;;  %5822 = vmatprep.subr.bf16.mxu0 %v5039_v53  ;;  %v5103_v13 = vunpack.c.l.s8.bf16 %v4775_v52  ;;  %v4774_v53 = vld [vmem:[%s7240_s30 + $0x260] sm:$0xff] }
 0x877   : > { %5986 = vmatprep.subr.bf16.mxu1 %v5041_v57  ;;  %v4776_v57 = vld [vmem:[%s7240_s30 + $0x270] sm:$0xff]  ;;  %v5102_v30 = vunpack.c.l.s8.bf16 %v4774_v53  ;;  %v5110_v38 = vunpack.c.h.s8.bf16 %v4774_v53 }
 0x879   : > { %5823 = vmatpush1.bf16.msra.mxu0 %v5038_v28  ;;  %v5111_v28 = vunpack.c.h.s8.bf16 %v4775_v52 }
 0x87a   : > { %5987 = vmatpush1.bf16.msra.mxu1 %v5040_v41  ;;  %5824 = vmatprep.subr.bf16.mxu0 %v5047_v3  ;;  %v5113_v41 = vunpack.c.h.s8.bf16 %v4777_v40  ;;  %v4783_v3 = vld [vmem:[%s7240_s30 + $0x2a8] sm:$0xff] }
 0x87b   : > { %5988 = vmatprep.subr.bf16.mxu1 %v5049_v12  ;;  %v4785_v12 = vld [vmem:[%s7240_s30 + $0x2b8] sm:$0xff]  ;;  %v5119_v4 = vunpack.c.l.s8.bf16 %v4783_v3  ;;  %v5127_v54 = vunpack.c.h.s8.bf16 %v4783_v3 }
 0x87d   : > { %5825 = vmatpush1.bf16.msra.mxu0 %v5046_v60  ;;  %v4782_v60 = vld [vmem:[%s7240_s30 + $0x2a0] sm:$0xff] }
 0x87e   : > { %5989 = vmatpush1.bf16.msra.mxu1 %v5048_v34  ;;  %5826 = vmatprep.subr.bf16.mxu0 %v5055_v9  ;;  %v5121_v34 = vunpack.c.l.s8.bf16 %v4785_v12  ;;  %v4784_v9 = vld [vmem:[%s7240_s30 + $0x2b0] sm:$0xff]  ;;  %v5118_v14 = vunpack.c.l.s8.bf16 %v4782_v60 }
 0x87f   : > { %5990 = vmatprep.subr.bf16.mxu1 %v5057_v19  ;;  %v5120_v19 = vunpack.c.l.s8.bf16 %v4784_v9  ;;  %v5128_v26 = vunpack.c.h.s8.bf16 %v4784_v9 }
 0x881   : > { %5827 = vmatpush1.bf16.msra.mxu0 %v5054_v59  ;;  %v5129_v59 = vunpack.c.h.s8.bf16 %v4785_v12 }
 0x882   : > { %5991 = vmatpush1.bf16.msra.mxu1 %v5056_v58  ;;  %5828 = vmatprep.subr.bf16.mxu0 %v5063_v56  ;;  %v4791_v58 = vld [vmem:[%s7240_s30 + $0x2e8] sm:$0xff]  ;;  %v4793_v56 = vld [vmem:[%s7240_s30 + $0x2f8] sm:$0xff] }
 0x883   : > { %5992 = vmatprep.subr.bf16.mxu1 %v5065_v62  ;;  %v5126_v62 = vunpack.c.h.s8.bf16 %v4782_v60  ;;  %v5135_v61 = vunpack.c.l.s8.bf16 %v4791_v58  ;;  %v5143_v42 = vunpack.c.h.s8.bf16 %v4791_v58 }
 0x885   : > { %5829 = vmatpush1.bf16.msra.mxu0 %v5062_v17  ;;  %v4790_v17 = vld [vmem:[%s7240_s30 + $0x2e0] sm:$0xff] }
 0x886   : > { %5993 = vmatpush1.bf16.msra.mxu1 %v5064_v6  ;;  %5830 = vmatprep.subr.bf16.mxu0 %v5071_v33  ;;  %v5137_v6 = vunpack.c.l.s8.bf16 %v4793_v56  ;;  %v4792_v33 = vld [vmem:[%s7240_s30 + $0x2f0] sm:$0xff]  ;;  %v5134_v55 = vunpack.c.l.s8.bf16 %v4790_v17 }
 0x887   : > { %5994 = vmatprep.subr.bf16.mxu1 %v5073_v35  ;;  %v5136_v35 = vunpack.c.l.s8.bf16 %v4792_v33  ;;  %v5144_v16 = vunpack.c.h.s8.bf16 %v4792_v33 }
 0x889   : > { %5831 = vmatpush1.bf16.msra.mxu0 %v5070_v23  ;;  %v5145_v23 = vunpack.c.h.s8.bf16 %v4793_v56 }
 0x88a   : > { %5995 = vmatpush1.bf16.msra.mxu1 %v5072_v39  ;;  %5832 = vmatprep.subr.bf16.mxu0 %v5079_v37  ;;  %v4799_v39 = vld [vmem:[%s7240_s30 + $0x328] sm:$0xff]  ;;  %v4801_v37 = vld [vmem:[%s7240_s30 + $0x338] sm:$0xff] }
 0x88b   : > { %5996 = vmatprep.subr.bf16.mxu1 %v5081_v36  ;;  %v5142_v36 = vunpack.c.h.s8.bf16 %v4790_v17  ;;  %v5151_v31 = vunpack.c.l.s8.bf16 %v4799_v39  ;;  %v5159_v27 = vunpack.c.h.s8.bf16 %v4799_v39 }
 0x88d   : > { %5833 = vmatpush1.bf16.msra.mxu0 %v5078_v29  ;;  %v4798_v29 = vld [vmem:[%s7240_s30 + $0x320] sm:$0xff] }
 0x88e   : > { %5997 = vmatpush1.bf16.msra.mxu1 %v5080_v1  ;;  %5843 = vmatprep.subr.bf16.mxu0 %v5087_v44  ;;  %v5153_v1 = vunpack.c.l.s8.bf16 %v4801_v37  ;;  %v4800_v44 = vld [vmem:[%s7240_s30 + $0x330] sm:$0xff]  ;;  %v5150_v47 = vunpack.c.l.s8.bf16 %v4798_v29  ;;  %v5158_v52 = vunpack.c.h.s8.bf16 %v4798_v29 }
 0x88f   : > { %6007 = vmatprep.subr.bf16.mxu1 %v5089_v11  ;;  %v5152_v11 = vunpack.c.l.s8.bf16 %v4800_v44 }
 0x890   : > { %5835 = vmatmul.mubr.bf16.vlgmr.msra.gmra.mrb[20].mxu0 %v9123_v43 }
 0x891   : > { %5999 = vmatmul.mubr.bf16.vlgmr.msra.gmra.mrb[20].mxu1 %v9123_v43  ;;  %5844 = vmatpush1.bf16.msra.mxu0 %v5086_v10  ;;  %v5104_v43 = vunpack.c.l.s8.bf16 %v4776_v57  ;;  %v5161_v10 = vunpack.c.h.s8.bf16 %v4801_v37 }
 0x892   : > { %5875 = vmatprep.mubr.bf16.mxu0 %v9132_v22  ;;  %6008 = vmatpush1.bf16.msra.mxu1 %v5088_v0  ;;  %v4807_v0 = vld [vmem:[%s7240_s30 + $0x368] sm:$0xff] }
 0x893   : > { %6039 = vmatprep.mubr.bf16.mxu1 %v9132_v22  ;;  %5845 = vmatprep.subr.bf16.mxu0 %v5095_v32  ;;  %v5112_v22 = vunpack.c.h.s8.bf16 %v4776_v57  ;;  %v4809_v32 = vld [vmem:[%s7240_s30 + $0x378] sm:$0xff]  ;;  %v5167_v40 = vunpack.c.l.s8.bf16 %v4807_v0  ;;  %v5175_v57 = vunpack.c.h.s8.bf16 %v4807_v0 }
 0x894   : > { %6009 = vmatprep.subr.bf16.mxu1 %v5097_v49  ;;  %v5160_v49 = vunpack.c.h.s8.bf16 %v4800_v44 }
 0x895   : > { %5846 = vmatpush1.bf16.msra.mxu0 %v5094_v24  ;;  %v4806_v24 = vld [vmem:[%s7240_s30 + $0x360] sm:$0xff] }
 0x896   : > { %6010 = vmatpush1.bf16.msra.mxu1 %v5096_v5  ;;  %5847 = vmatprep.subr.bf16.mxu0 %v5103_v13  ;;  %v5169_v5 = vunpack.c.l.s8.bf16 %v4809_v32  ;;  %v4808_v13 = vld [vmem:[%s7240_s30 + $0x370] sm:$0xff]  ;;  %v5166_v53 = vunpack.c.l.s8.bf16 %v4806_v24 }
 0x897   : > { %6011 = vmatprep.subr.bf16.mxu1 %v5105_v2  ;;  %v5168_v2 = vunpack.c.l.s8.bf16 %v4808_v13  ;;  %v5176_v3 = vunpack.c.h.s8.bf16 %v4808_v13 }
 0x899   : > { %5848 = vmatpush1.bf16.msra.mxu0 %v5102_v30  ;;  %v5177_v30 = vunpack.c.h.s8.bf16 %v4809_v32 }
 0x89a   : > { %6012 = vmatpush1.bf16.msra.mxu1 %v5104_v43  ;;  %5849 = vmatprep.subr.bf16.mxu0 %v5111_v28  ;;  %v4815_v43 = vld [vmem:[%s7240_s30 + $0x3a8] sm:$0xff]  ;;  %v4817_v28 = vld [vmem:[%s7240_s30 + $0x3b8] sm:$0xff] }
 0x89b   : > { %6013 = vmatprep.subr.bf16.mxu1 %v5113_v41  ;;  %v5174_v41 = vunpack.c.h.s8.bf16 %v4806_v24  ;;  %v5183_v12 = vunpack.c.l.s8.bf16 %v4815_v43  ;;  %v5191_v9 = vunpack.c.h.s8.bf16 %v4815_v43  ;;  %v4846_v43 = vld [vmem:[%s7240_s30 + $0x4a0] sm:$0xff] }
 0x89d   : > { %5850 = vmatpush1.bf16.msra.mxu0 %v5110_v38  ;;  %v4814_v38 = vld [vmem:[%s7240_s30 + $0x3a0] sm:$0xff] }
 0x89e   : > { %6014 = vmatpush1.bf16.msra.mxu1 %v5112_v22  ;;  %5851 = vmatprep.subr.bf16.mxu0 %v5119_v4  ;;  %v5185_v22 = vunpack.c.l.s8.bf16 %v4817_v28  ;;  %v4816_v4 = vld [vmem:[%s7240_s30 + $0x3b0] sm:$0xff]  ;;  %v5182_v60 = vunpack.c.l.s8.bf16 %v4814_v38 }
 0x89f   : > { %6015 = vmatprep.subr.bf16.mxu1 %v5121_v34  ;;  %v5184_v34 = vunpack.c.l.s8.bf16 %v4816_v4  ;;  %v5192_v58 = vunpack.c.h.s8.bf16 %v4816_v4  ;;  %v4855_v4 = vld [vmem:[%s7240_s30 + $0x4e8] sm:$0xff] }
 0x8a1   : > { %5852 = vmatpush1.bf16.msra.mxu0 %v5118_v14  ;;  %v5193_v14 = vunpack.c.h.s8.bf16 %v4817_v28 }
 0x8a2   : > { %6016 = vmatpush1.bf16.msra.mxu1 %v5120_v19  ;;  %5853 = vmatprep.subr.bf16.mxu0 %v5127_v54  ;;  %v4823_v19 = vld [vmem:[%s7240_s30 + $0x3e8] sm:$0xff]  ;;  %v4825_v54 = vld [vmem:[%s7240_s30 + $0x3f8] sm:$0xff] }
 0x8a3   : > { %6017 = vmatprep.subr.bf16.mxu1 %v5129_v59  ;;  %v5190_v59 = vunpack.c.h.s8.bf16 %v4814_v38  ;;  %v5199_v56 = vunpack.c.l.s8.bf16 %v4823_v19  ;;  %v5207_v33 = vunpack.c.h.s8.bf16 %v4823_v19  ;;  %v4854_v19 = vld [vmem:[%s7240_s30 + $0x4e0] sm:$0xff] }
 0x8a5   : > { %5854 = vmatpush1.bf16.msra.mxu0 %v5126_v62  ;;  %v4822_v62 = vld [vmem:[%s7240_s30 + $0x3e0] sm:$0xff] }
 0x8a6   : > { %6018 = vmatpush1.bf16.msra.mxu1 %v5128_v26  ;;  %5855 = vmatprep.subr.bf16.mxu0 %v5135_v61  ;;  %v5201_v26 = vunpack.c.l.s8.bf16 %v4825_v54  ;;  %v4824_v61 = vld [vmem:[%s7240_s30 + $0x3f0] sm:$0xff]  ;;  %v5198_v17 = vunpack.c.l.s8.bf16 %v4822_v62 }
 0x8a7   : > { %6019 = vmatprep.subr.bf16.mxu1 %v5137_v6  ;;  %v5200_v6 = vunpack.c.l.s8.bf16 %v4824_v61  ;;  %v5208_v39 = vunpack.c.h.s8.bf16 %v4824_v61  ;;  %v4863_v61 = vld [vmem:[%s7240_s30 + $0x528] sm:$0xff] }
 0x8a9   : > { %5856 = vmatpush1.bf16.msra.mxu0 %v5134_v55  ;;  %v5209_v55 = vunpack.c.h.s8.bf16 %v4825_v54 }
 0x8aa   : > { %6020 = vmatpush1.bf16.msra.mxu1 %v5136_v35  ;;  %5857 = vmatprep.subr.bf16.mxu0 %v5143_v42  ;;  %v4831_v35 = vld [vmem:[%s7240_s30 + $0x428] sm:$0xff]  ;;  %v4833_v42 = vld [vmem:[%s7240_s30 + $0x438] sm:$0xff] }
 0x8ab   : > { %6021 = vmatprep.subr.bf16.mxu1 %v5145_v23  ;;  %v5206_v23 = vunpack.c.h.s8.bf16 %v4822_v62  ;;  %v5215_v37 = vunpack.c.l.s8.bf16 %v4831_v35  ;;  %v5223_v44 = vunpack.c.h.s8.bf16 %v4831_v35  ;;  %v5271_v62 = vunpack.c.h.s8.bf16 %v4855_v4  ;;  %v4862_v35 = vld [vmem:[%s7240_s30 + $0x520] sm:$0xff] }
 0x8ad   : > { %5858 = vmatpush1.bf16.msra.mxu0 %v5142_v36  ;;  %v4830_v36 = vld [vmem:[%s7240_s30 + $0x420] sm:$0xff] }
 0x8ae   : > { %6022 = vmatpush1.bf16.msra.mxu1 %v5144_v16  ;;  %5859 = vmatprep.subr.bf16.mxu0 %v5151_v31  ;;  %v5217_v16 = vunpack.c.l.s8.bf16 %v4833_v42  ;;  %v4832_v31 = vld [vmem:[%s7240_s30 + $0x430] sm:$0xff]  ;;  %v5214_v29 = vunpack.c.l.s8.bf16 %v4830_v36 }
 0x8af   : > { %6023 = vmatprep.subr.bf16.mxu1 %v5153_v1  ;;  %v5216_v1 = vunpack.c.l.s8.bf16 %v4832_v31  ;;  %v5224_v0 = vunpack.c.h.s8.bf16 %v4832_v31  ;;  %v4871_v31 = vld [vmem:[%s7240_s30 + $0x568] sm:$0xff] }
 0x8b1   : > { %5860 = vmatpush1.bf16.msra.mxu0 %v5150_v47  ;;  %v4839_v47 = vld [vmem:[%s7240_s30 + $0x468] sm:$0xff] }
 0x8b2   : > { %6024 = vmatpush1.bf16.msra.mxu1 %v5152_v11  ;;  %5861 = vmatprep.subr.bf16.mxu0 %v5159_v27  ;;  %v5225_v11 = vunpack.c.h.s8.bf16 %v4833_v42  ;;  %v4841_v27 = vld [vmem:[%s7240_s30 + $0x478] sm:$0xff]  ;;  %v5231_v32 = vunpack.c.l.s8.bf16 %v4839_v47 }
 0x8b3   : > { %6025 = vmatprep.subr.bf16.mxu1 %v5161_v10  ;;  %v5222_v10 = vunpack.c.h.s8.bf16 %v4830_v36  ;;  %v5241_v13 = vunpack.c.h.s8.bf16 %v4841_v27  ;;  %v5287_v36 = vunpack.c.h.s8.bf16 %v4863_v61 }
 0x8b5   : > { %5862 = vmatpush1.bf16.msra.mxu0 %v5158_v52  ;;  %v4838_v52 = vld [vmem:[%s7240_s30 + $0x460] sm:$0xff] }
 0x8b6   : > { %6026 = vmatpush1.bf16.msra.mxu1 %v5160_v49  ;;  %5863 = vmatprep.subr.bf16.mxu0 %v5167_v40  ;;  %v5233_v49 = vunpack.c.l.s8.bf16 %v4841_v27  ;;  %v4840_v40 = vld [vmem:[%s7240_s30 + $0x470] sm:$0xff]  ;;  %v5230_v24 = vunpack.c.l.s8.bf16 %v4838_v52 }
 0x8b7   : > { %6027 = vmatprep.subr.bf16.mxu1 %v5169_v5  ;;  %v5239_v5 = vunpack.c.h.s8.bf16 %v4839_v47  ;;  %v5295_v47 = vunpack.c.l.s8.bf16 %v4871_v31 }
 0x8b9   : > { %5864 = vmatpush1.bf16.msra.mxu0 %v5166_v53  ;;  %v4847_v53 = vld [vmem:[%s7240_s30 + $0x4a8] sm:$0xff] }
 0x8ba   : > { %6028 = vmatpush1.bf16.msra.mxu1 %v5168_v2  ;;  %5865 = vmatprep.subr.bf16.mxu0 %v5175_v57  ;;  %v4849_v2 = vld [vmem:[%s7240_s30 + $0x4b8] sm:$0xff]  ;;  %v5238_v57 = vunpack.c.h.s8.bf16 %v4838_v52  ;;  %v5255_v38 = vunpack.c.h.s8.bf16 %v4847_v53  ;;  %v5303_v52 = vunpack.c.h.s8.bf16 %v4871_v31  ;;  %v4902_v31 = vld [vmem:[%s7240_s30 + $0x660] sm:$0xff] }
 0x8bb   : > { %6029 = vmatprep.subr.bf16.mxu1 %v5177_v30  ;;  %v5247_v30 = vunpack.c.l.s8.bf16 %v4847_v53  ;;  %v5249_v28 = vunpack.c.l.s8.bf16 %v4849_v2  ;;  %v4878_v53 = vld [vmem:[%s7240_s30 + $0x5a0] sm:$0xff] }
 0x8bd   : > { %5866 = vmatpush1.bf16.msra.mxu0 %v5174_v41  ;;  %v4848_v41 = vld [vmem:[%s7240_s30 + $0x4b0] sm:$0xff] }
 0x8be   : > { %6030 = vmatpush1.bf16.msra.mxu1 %v5176_v3  ;;  %5867 = vmatprep.subr.bf16.mxu0 %v5183_v12  ;;  %v5246_v3 = vunpack.c.l.s8.bf16 %v4846_v43  ;;  %v5248_v12 = vunpack.c.l.s8.bf16 %v4848_v41 }
 0x8bf   : > { %6031 = vmatprep.subr.bf16.mxu1 %v5185_v22  ;;  %v5257_v22 = vunpack.c.h.s8.bf16 %v4849_v2 }
 0x8c1   : > { %5868 = vmatpush1.bf16.msra.mxu0 %v5182_v60  ;;  %v4857_v60 = vld [vmem:[%s7240_s30 + $0x4f8] sm:$0xff] }
 0x8c2   : > { %6032 = vmatpush1.bf16.msra.mxu1 %v5184_v34  ;;  %5869 = vmatprep.subr.bf16.mxu0 %v5191_v9  ;;  %v5254_v34 = vunpack.c.h.s8.bf16 %v4846_v43  ;;  %v5256_v9 = vunpack.c.h.s8.bf16 %v4848_v41  ;;  %v5265_v54 = vunpack.c.l.s8.bf16 %v4857_v60  ;;  %v4887_v41 = vld [vmem:[%s7240_s30 + $0x5e8] sm:$0xff] }
 0x8c3   : > { %6033 = vmatprep.subr.bf16.mxu1 %v5193_v14  ;;  %v5263_v14 = vunpack.c.l.s8.bf16 %v4855_v4  ;;  %v4886_v4 = vld [vmem:[%s7240_s30 + $0x5e0] sm:$0xff] }
 0x8c5   : > { %5870 = vmatpush1.bf16.msra.mxu0 %v5190_v59  ;;  %v4856_v59 = vld [vmem:[%s7240_s30 + $0x4f0] sm:$0xff] }
 0x8c6   : > { %6034 = vmatpush1.bf16.msra.mxu1 %v5192_v58  ;;  %5871 = vmatprep.subr.bf16.mxu0 %v5199_v56  ;;  %v5262_v58 = vunpack.c.l.s8.bf16 %v4854_v19  ;;  %v5264_v56 = vunpack.c.l.s8.bf16 %v4856_v59 }
 0x8c7   : > { %6035 = vmatprep.subr.bf16.mxu1 %v5201_v26  ;;  %v5273_v26 = vunpack.c.h.s8.bf16 %v4857_v60 }
 0x8c9   : > { %5872 = vmatpush1.bf16.msra.mxu0 %v5198_v17  ;;  %v4865_v17 = vld [vmem:[%s7240_s30 + $0x538] sm:$0xff] }
 0x8ca   : > { %6036 = vmatpush1.bf16.msra.mxu1 %v5200_v6  ;;  %5873 = vmatprep.subr.bf16.mxu0 %v5207_v33  ;;  %v5270_v6 = vunpack.c.h.s8.bf16 %v4854_v19  ;;  %v5272_v33 = vunpack.c.h.s8.bf16 %v4856_v59  ;;  %v5281_v42 = vunpack.c.l.s8.bf16 %v4865_v17  ;;  %v5335_v19 = vunpack.c.h.s8.bf16 %v4887_v41  ;;  %v4895_v59 = vld [vmem:[%s7240_s30 + $0x628] sm:$0xff] }
 0x8cb   : > { %6037 = vmatprep.subr.bf16.mxu1 %v5209_v55  ;;  %v5279_v55 = vunpack.c.l.s8.bf16 %v4863_v61  ;;  %v4894_v61 = vld [vmem:[%s7240_s30 + $0x620] sm:$0xff] }
 0x8cd   : > { %5874 = vmatpush1.bf16.msra.mxu0 %v5206_v23  ;;  %v4864_v23 = vld [vmem:[%s7240_s30 + $0x530] sm:$0xff] }
 0x8ce   : > { %6038 = vmatpush1.bf16.msra.mxu1 %v5208_v39  ;;  %5884 = vmatprep.subr.bf16.mxu0 %v5215_v37  ;;  %v5278_v39 = vunpack.c.l.s8.bf16 %v4862_v35  ;;  %v5280_v37 = vunpack.c.l.s8.bf16 %v4864_v23 }
 0x8cf   : > { %6048 = vmatprep.subr.bf16.mxu1 %v5217_v16  ;;  %v5289_v16 = vunpack.c.h.s8.bf16 %v4865_v17 }
 0x8d0   : > { %5876 = vmatmul.mubr.bf16.vlgmr.msra.gmra.mrb[20].mxu0 %v9182_v63 }
 0x8d1   : > { %6040 = vmatmul.mubr.bf16.vlgmr.msra.gmra.mrb[20].mxu1 %v9182_v63  ;;  %5885 = vmatpush1.bf16.msra.mxu0 %v5214_v29  ;;  %v5232_v63 = vunpack.c.l.s8.bf16 %v4840_v40  ;;  %v4873_v29 = vld [vmem:[%s7240_s30 + $0x578] sm:$0xff] }
 0x8d2   : > { %5916 = vmatprep.mubr.bf16.mxu0 %v9184_v8  ;;  %6049 = vmatpush1.bf16.msra.mxu1 %v5216_v1  ;;  %v5286_v1 = vunpack.c.h.s8.bf16 %v4862_v35  ;;  %v5297_v27 = vunpack.c.l.s8.bf16 %v4873_v29  ;;  %v5351_v35 = vunpack.c.h.s8.bf16 %v4895_v59 }
 0x8d3   : > { %6080 = vmatprep.mubr.bf16.mxu1 %v9184_v8  ;;  %5886 = vmatprep.subr.bf16.mxu0 %v5223_v44  ;;  %v5240_v8 = vunpack.c.h.s8.bf16 %v4840_v40  ;;  %v5288_v44 = vunpack.c.h.s8.bf16 %v4864_v23  ;;  %v4879_v40 = vld [vmem:[%s7240_s30 + $0x5a8] sm:$0xff] }
 0x8d4   : > { %6050 = vmatprep.subr.bf16.mxu1 %v5225_v11  ;;  %v4870_v11 = vld [vmem:[%s7240_s30 + $0x560] sm:$0xff]  ;;  %v5319_v43 = vunpack.c.h.s8.bf16 %v4879_v40 }
 0x8d5   : > { %5887 = vmatpush1.bf16.msra.mxu0 %v5222_v10  ;;  %v4872_v10 = vld [vmem:[%s7240_s30 + $0x570] sm:$0xff] }
 0x8d6   : > { %6051 = vmatpush1.bf16.msra.mxu1 %v5224_v0  ;;  %5888 = vmatprep.subr.bf16.mxu0 %v5231_v32  ;;  %v5294_v0 = vunpack.c.l.s8.bf16 %v4870_v11  ;;  %v5296_v32 = vunpack.c.l.s8.bf16 %v4872_v10 }
 0x8d7   : > { %6052 = vmatprep.subr.bf16.mxu1 %v5233_v49  ;;  %v5305_v49 = vunpack.c.h.s8.bf16 %v4873_v29 }
 0x8d9   : > { %5889 = vmatpush1.bf16.msra.mxu0 %v5230_v24  ;;  %v4881_v24 = vld [vmem:[%s7240_s30 + $0x5b8] sm:$0xff] }
 0x8da   : > { %6053 = vmatpush1.bf16.msra.mxu1 %v5232_v63  ;;  %5890 = vmatprep.subr.bf16.mxu0 %v5239_v5  ;;  %v5302_v63 = vunpack.c.h.s8.bf16 %v4870_v11  ;;  %v5304_v5 = vunpack.c.h.s8.bf16 %v4872_v10  ;;  %v5313_v2 = vunpack.c.l.s8.bf16 %v4881_v24  ;;  %v4913_v10 = vld [vmem:[%s7240_s30 + $0x6b8] sm:$0xff] }
 0x8db   : > { %6054 = vmatprep.subr.bf16.mxu1 %v5241_v13  ;;  %v5311_v13 = vunpack.c.l.s8.bf16 %v4879_v40  ;;  %v5377_v40 = vunpack.c.l.s8.bf16 %v4913_v10 }
 0x8dd   : > { %5891 = vmatpush1.bf16.msra.mxu0 %v5238_v57  ;;  %v4880_v57 = vld [vmem:[%s7240_s30 + $0x5b0] sm:$0xff] }
 0x8de   : > { %6055 = vmatpush1.bf16.msra.mxu1 %v5240_v8  ;;  %5892 = vmatprep.subr.bf16.mxu0 %v5247_v30  ;;  %v5310_v8 = vunpack.c.l.s8.bf16 %v4878_v53  ;;  %v5312_v30 = vunpack.c.l.s8.bf16 %v4880_v57 }
 0x8df   : > { %6056 = vmatprep.subr.bf16.mxu1 %v5249_v28  ;;  %v5321_v28 = vunpack.c.h.s8.bf16 %v4881_v24  ;;  %v4912_v24 = vld [vmem:[%s7240_s30 + $0x6b0] sm:$0xff] }
 0x8e1   : > { %5893 = vmatpush1.bf16.msra.mxu0 %v5246_v3  ;;  %v4889_v3 = vld [vmem:[%s7240_s30 + $0x5f8] sm:$0xff] }
 0x8e2   : > { %6057 = vmatpush1.bf16.msra.mxu1 %v5248_v12  ;;  %5894 = vmatprep.subr.bf16.mxu0 %v5255_v38  ;;  %v5318_v12 = vunpack.c.h.s8.bf16 %v4878_v53  ;;  %v5320_v38 = vunpack.c.h.s8.bf16 %v4880_v57  ;;  %v5329_v60 = vunpack.c.l.s8.bf16 %v4889_v3  ;;  %v5376_v53 = vunpack.c.l.s8.bf16 %v4912_v24 }
 0x8e3   : > { %6058 = vmatprep.subr.bf16.mxu1 %v5257_v22  ;;  %v5327_v22 = vunpack.c.l.s8.bf16 %v4887_v41  ;;  %v9417_v41 = vld [vmem:[%s7240_s30 + $0x6f8] sm:$0xff] }
 0x8e5   : > { %5895 = vmatpush1.bf16.msra.mxu0 %v5254_v34  ;;  %v4888_v34 = vld [vmem:[%s7240_s30 + $0x5f0] sm:$0xff] }
 0x8e6   : > { %6059 = vmatpush1.bf16.msra.mxu1 %v5256_v9  ;;  %5896 = vmatprep.subr.bf16.mxu0 %v5263_v14  ;;  %v5326_v9 = vunpack.c.l.s8.bf16 %v4886_v4  ;;  %v5328_v14 = vunpack.c.l.s8.bf16 %v4888_v34 }
 0x8e7   : > { %6060 = vmatprep.subr.bf16.mxu1 %v5265_v54  ;;  %v5337_v54 = vunpack.c.h.s8.bf16 %v4889_v3 }
 0x8e9   : > { %5897 = vmatpush1.bf16.msra.mxu0 %v5262_v58  ;;  %v4897_v58 = vld [vmem:[%s7240_s30 + $0x638] sm:$0xff] }
 0x8ea   : > { %6061 = vmatpush1.bf16.msra.mxu1 %v5264_v56  ;;  %5898 = vmatprep.subr.bf16.mxu0 %v5271_v62  ;;  %v5334_v56 = vunpack.c.h.s8.bf16 %v4886_v4  ;;  %v5336_v62 = vunpack.c.h.s8.bf16 %v4888_v34  ;;  %v5345_v17 = vunpack.c.l.s8.bf16 %v4897_v58  ;;  %v5353_v23 = vunpack.c.h.s8.bf16 %v4897_v58  ;;  %v9426_v4 = vld [vmem:[%s7240_s30 + $0x6e0] sm:$0xff] }
 0x8eb   : > { %6062 = vmatprep.subr.bf16.mxu1 %v5273_v26  ;;  %v5343_v26 = vunpack.c.l.s8.bf16 %v4895_v59 }
 0x8ed   : > { %5899 = vmatpush1.bf16.msra.mxu0 %v5270_v6  ;;  %v4896_v6 = vld [vmem:[%s7240_s30 + $0x630] sm:$0xff] }
 0x8ee   : > { %6063 = vmatpush1.bf16.msra.mxu1 %v5272_v33  ;;  %5900 = vmatprep.subr.bf16.mxu0 %v5279_v55  ;;  %v5342_v33 = vunpack.c.l.s8.bf16 %v4894_v61  ;;  %v5344_v55 = vunpack.c.l.s8.bf16 %v4896_v6 }
 0x8ef   : > { %6064 = vmatprep.subr.bf16.mxu1 %v5281_v42  ;;  %v4903_v42 = vld [vmem:[%s7240_s30 + $0x668] sm:$0xff] }
 0x8f1   : > { %5901 = vmatpush1.bf16.msra.mxu0 %v5278_v39  ;;  %v4905_v39 = vld [vmem:[%s7240_s30 + $0x678] sm:$0xff] }
 0x8f2   : > { %6065 = vmatpush1.bf16.msra.mxu1 %v5280_v37  ;;  %5902 = vmatprep.subr.bf16.mxu0 %v5287_v36  ;;  %v5350_v37 = vunpack.c.h.s8.bf16 %v4894_v61  ;;  %v5352_v36 = vunpack.c.h.s8.bf16 %v4896_v6  ;;  %v5361_v29 = vunpack.c.l.s8.bf16 %v4905_v39  ;;  %v5369_v11 = vunpack.c.h.s8.bf16 %v4905_v39 }
 0x8f3   : > { %6066 = vmatprep.subr.bf16.mxu1 %v5289_v16  ;;  %v5359_v16 = vunpack.c.l.s8.bf16 %v4903_v42 }
 0x8f5   : > { %5903 = vmatpush1.bf16.msra.mxu0 %v5286_v1  ;;  %v4904_v1 = vld [vmem:[%s7240_s30 + $0x670] sm:$0xff] }
 0x8f6   : > { %6067 = vmatpush1.bf16.msra.mxu1 %v5288_v44  ;;  %5904 = vmatprep.subr.bf16.mxu0 %v5295_v47  ;;  %v5358_v44 = vunpack.c.l.s8.bf16 %v4902_v31  ;;  %v5367_v47 = vunpack.c.h.s8.bf16 %v4903_v42 }
 0x8f7   : > { %6068 = vmatprep.subr.bf16.mxu1 %v5297_v27  ;;  %v4911_v27 = vld [vmem:[%s7240_s30 + $0x6a8] sm:$0xff] }
 0x8f8   : > { %v5383_v57 = vunpack.c.h.s8.bf16 %v4911_v27 }
 0x8f9   : > { %5905 = vmatpush1.bf16.msra.mxu0 %v5294_v0  ;;  %v5368_v0 = vunpack.c.h.s8.bf16 %v4904_v1 }
 0x8fa   : > { %6069 = vmatpush1.bf16.msra.mxu1 %v5296_v32  ;;  %5906 = vmatprep.subr.bf16.mxu0 %v5303_v52  ;;  %v5375_v32 = vunpack.c.l.s8.bf16 %v4911_v27  ;;  %v4910_v52 = vld [vmem:[%s7240_s30 + $0x6a0] sm:$0xff]  ;;  %v5401_v27 = vunpack.c.h.s8.bf16 %v9417_v41 }
 0x8fb   : > { %6070 = vmatprep.subr.bf16.mxu1 %v5305_v49  ;;  %v9391_v49 = vld [vmem:[%s796_s12] sm:$0xff] }
 0x8fd   : > { %5907 = vmatpush1.bf16.msra.mxu0 %v5302_v63  ;;  %v5374_v63 = vunpack.c.l.s8.bf16 %v4910_v52 }
 0x8fe   : > { %6071 = vmatpush1.bf16.msra.mxu1 %v5304_v5  ;;  %5908 = vmatprep.subr.bf16.mxu0 %v5311_v13  ;;  %v9399_v5 = vld [vmem:[%s9593_s4] sm:$0xff]  ;;  %v9402_v13 = vunpack.c.l.bf16 %v9391_v49 }
 0x8ff   : > { %6072 = vmatprep.subr.bf16.mxu1 %v5313_v2  ;;  %v9409_v2 = vld [vmem:[%s9594_s26] sm:$0xff]  ;;  %v6147_v34 = vrot.slane %v9399_v5, %v9090_v7 }
 0x900   : > { %v6185_v3 = vrot.slane %v9409_v2, %v9072_v21  ;;  %v6193_v59 = vrot.slane %v9409_v2, %v9087_v45  ;;  %v6189_v58 = vrot.slane %v9409_v2, %v9084_v20  ;;  %v6197_v6 = vrot.slane %v9409_v2, %v9090_v7 }
 0x901   : > { %5909 = vmatpush1.bf16.msra.mxu0 %v5310_v8  ;;  %v5385_v8 = vunpack.c.h.s8.bf16 %v4913_v10  ;;  %v4927_v10 = vld [vmem:[%s7240_s30 + $0x728] sm:$0xff] }
 0x902   : > { %6073 = vmatpush1.bf16.msra.mxu1 %v5312_v30  ;;  %5910 = vmatprep.subr.bf16.mxu0 %v5319_v43  ;;  %v4919_v30 = vld [vmem:[%s7240_s30 + $0x6e8] sm:$0xff]  ;;  %v6135_v43 = vrot.slane %v9399_v5, %v9072_v21 }
 0x903   : > { %6074 = vmatprep.subr.bf16.mxu1 %v5321_v28  ;;  %v6143_v28 = vrot.slane %v9399_v5, %v9087_v45 }
 0x905   : > { %5911 = vmatpush1.bf16.msra.mxu0 %v5318_v12  ;;  %v6246_v12 = vrot.slane %v9402_v13, %v9072_v21 }
 0x906   : > { %6075 = vmatpush1.bf16.msra.mxu1 %v5320_v38  ;;  %5912 = vmatprep.subr.bf16.mxu0 %v5327_v22  ;;  %v6139_v38 = vrot.slane %v9399_v5, %v9084_v20  ;;  %v5382_v22 = vunpack.c.h.s8.bf16 %v4910_v52 }
 0x907   : > { %6076 = vmatprep.subr.bf16.mxu1 %v5329_v60  ;;  %v6254_v60 = vrot.slane %v9402_v13, %v9101_v18 }
 0x909   : > { %5913 = vmatpush1.bf16.msra.mxu0 %v5326_v9  ;;  %v5384_v9 = vunpack.c.h.s8.bf16 %v4912_v24 }
 0x90a   : > { %6077 = vmatpush1.bf16.msra.mxu1 %v5328_v14  ;;  %5914 = vmatprep.subr.bf16.mxu0 %v5335_v19  ;;  %v5391_v14 = vunpack.c.l.s8.bf16 %v4919_v30  ;;  %v4920_v19 = vld [vmem:[%s7240_s30 + $0x6f0] sm:$0xff] }
 0x90b   : > { %6078 = vmatprep.subr.bf16.mxu1 %v5337_v54 }
 0x90d   : > { %5915 = vmatpush1.bf16.msra.mxu0 %v5334_v56  ;;  %v6250_v56 = vrot.slane %v9402_v13, %v9087_v45 }
 0x90e   : > { %6079 = vmatpush1.bf16.msra.mxu1 %v5336_v62  ;;  %5925 = vmatprep.subr.bf16.mxu0 %v5343_v26  ;;  %v5393_v62 = vunpack.c.l.s8.bf16 %v9417_v41 }
 0x90f   : > { %6089 = vmatprep.subr.bf16.mxu1 %v5345_v17 }
 0x910   : > { %5917 = vmatmul.mubr.bf16.vlgmr.msra.gmra.mrb[20].mxu0 %v9224_v50 }
 0x911   : > { %6081 = vmatmul.mubr.bf16.vlgmr.msra.gmra.mrb[20].mxu1 %v9224_v50  ;;  %5926 = vmatpush1.bf16.msra.mxu0 %v5342_v33  ;;  %v5360_v50 = vunpack.c.l.s8.bf16 %v4904_v1  ;;  %v6258_v33 = vrot.slane %v9402_v13, %v9111_v51  ;;  %v5399_v1 = vunpack.c.h.s8.bf16 %v4919_v30  ;;  %v4926_v30 = vld [vmem:[%s7240_s30 + $0x720] sm:$0xff] }
 0x912   : > { %5957 = vmatprep.mubr.bf16.mxu0 %v9227_v25  ;;  %6090 = vmatpush1.bf16.msra.mxu1 %v5344_v55  ;;  %v5390_v55 = vunpack.c.l.s8.bf16 %v9426_v4 }
 0x913   : > { %6121 = vmatprep.mubr.bf16.mxu1 %v9227_v25  ;;  %5927 = vmatprep.subr.bf16.mxu0 %v5351_v35  ;;  %v5366_v25 = vunpack.c.h.s8.bf16 %v4902_v31  ;;  %v6286_v35 = vrot.slane %v6246_v12, %v9072_v21  ;;  %v6298_v24 = vrot.slane %v6258_v33, %v9072_v21 }
 0x914   : > { %6091 = vmatprep.subr.bf16.mxu1 %v5353_v23 }
 0x915   : > { %5928 = vmatpush1.bf16.msra.mxu0 %v5350_v37  ;;  %v5392_v37 = vunpack.c.l.s8.bf16 %v4920_v19 }
 0x916   : > { %6092 = vmatpush1.bf16.msra.mxu1 %v5352_v36  ;;  %5929 = vmatprep.subr.bf16.mxu0 %v5359_v16  ;;  %v6294_v16 = vrot.slane %v6254_v60, %v9072_v21 }
 0x917   : > { %6093 = vmatprep.subr.bf16.mxu1 %v5361_v29 }
 0x919   : > { %5930 = vmatpush1.bf16.msra.mxu0 %v5358_v44 }
 0x91a   : > { %6094 = vmatpush1.bf16.msra.mxu1 %v5360_v50  ;;  %5931 = vmatprep.subr.bf16.mxu0 %v5367_v47  ;;  %v6290_v47 = vrot.slane %v6250_v56, %v9072_v21 }
 0x91b   : > { %6095 = vmatprep.subr.bf16.mxu1 %v5369_v11 }
 0x91d   : > { %5932 = vmatpush1.bf16.msra.mxu0 %v5366_v25 }
 0x91e   : > { %6096 = vmatpush1.bf16.msra.mxu1 %v5368_v0  ;;  %5933 = vmatprep.subr.bf16.mxu0 %v5375_v32  ;;  %v4929_v32 = vld [vmem:[%s7240_s30 + $0x738] sm:$0xff] }
 0x91f   : > { %6097 = vmatprep.subr.bf16.mxu1 %v5377_v40  ;;  %v5409_v41 = vunpack.c.l.s8.bf16 %v4929_v32 }
 0x921   : > { %5934 = vmatpush1.bf16.msra.mxu0 %v5374_v63  ;;  %v5398_v63 = vunpack.c.h.s8.bf16 %v9426_v4  ;;  %v5406_v4 = vunpack.c.l.s8.bf16 %v4926_v30 }
 0x922   : > { %6098 = vmatpush1.bf16.msra.mxu1 %v5376_v53  ;;  %5935 = vmatprep.subr.bf16.mxu0 %v5383_v57  ;;  %v5400_v57 = vunpack.c.h.s8.bf16 %v4920_v19  ;;  %v5417_v19 = vunpack.c.h.s8.bf16 %v4929_v32 }
 0x923   : > { %v5631_v54 = vpop.f32.mrb[16].mxu0  ;;  %6099 = vmatprep.subr.bf16.mxu1 %v5385_v8  ;;  %v5407_v8 = vunpack.c.l.s8.bf16 %v4927_v10 }
 0x924   : > { %v6172_v26 = vmul.f32 %v6135_v43, %v5631_v54  ;;  %v5795_v61 = vpop.f32.mrb[16].mxu1  ;;  %v5633_v17 = vpop.f32.mrb[17].mxu0  ;;  %v4935_v54 = vld [vmem:[%s7240_s30 + $0x768] sm:$0xff] }
 0x925   : > { %v6174_v20 = vmul.f32 %v6143_v28, %v5795_v61  ;;  %v6173_v42 = vmul.f32 %v6139_v38, %v5633_v17  ;;  %v5797_v23 = vpop.f32.mrb[17].mxu1  ;;  %v5635_v39 = vpop.f32.mrb[18].mxu0  ;;  %5936 = vmatpush1.bf16.msra.mxu0 %v5382_v22  ;;  %v5423_v61 = vunpack.c.l.s8.bf16 %v4935_v54  ;;  %v4934_v17 = vld [vmem:[%s7240_s30 + $0x760] sm:$0xff] }
 0x926   : > { %v6222_v36 = vadd.f32 %v6185_v3, %v6172_v26  ;;  %v6175_v31 = vmul.f32 %v6147_v34, %v5797_v23  ;;  %v5799_v7 = vpop.f32.mrb[18].mxu1  ;;  %6100 = vmatpush1.bf16.msra.mxu1 %v5384_v9  ;;  %v5636_v29 = vpop.f32.mrb[19].mxu0  ;;  %5937 = vmatprep.subr.bf16.mxu0 %v5391_v14  ;;  %v4928_v3 = vld [vmem:[%s7240_s30 + $0x730] sm:$0xff]  ;;  %v5415_v9 = vunpack.c.h.s8.bf16 %v4927_v10  ;;  %v4943_v39 = vld [vmem:[%s7240_s30 + $0x7a8] sm:$0xff]  ;;  %v4953_v10 = vld [vmem:[%s7240_s30 + $0x7f8] sm:$0xff] }
 0x927   : > { %v6224_v44 = vadd.f32 %v6193_v59, %v6174_v20  ;;  %v6223_v50 = vadd.f32 %v6189_v58, %v6173_v42  ;;  %v5800_v11 = vpop.f32.mrb[19].mxu1  ;;  %6101 = vmatprep.subr.bf16.mxu1 %v5393_v62  ;;  %v5408_v34 = vunpack.c.l.s8.bf16 %v4928_v3  ;;  %v4937_v59 = vld [vmem:[%s7240_s30 + $0x778] sm:$0xff]  ;;  %v5414_v62 = vunpack.c.h.s8.bf16 %v4926_v30  ;;  %v4942_v7 = vld [vmem:[%s7240_s30 + $0x7a0] sm:$0xff] }
 0x928   : > { %v6230_v25 = vmax.f32 %v6222_v36, 0.0  ;;  %v6225_v0 = vadd.f32 %v6197_v6, %v6175_v31  ;;  %v5416_v26 = vunpack.c.h.s8.bf16 %v4928_v3  ;;  %v5425_v33 = vunpack.c.l.s8.bf16 %v4937_v59 }
 0x929   : > { %v6232_v52 = vmax.f32 %v6224_v44, 0.0  ;;  %v6231_v40 = vmax.f32 %v6223_v50, 0.0  ;;  %5938 = vmatpush1.bf16.msra.mxu0 %v5390_v55  ;;  %v4936_v55 = vld [vmem:[%s7240_s30 + $0x770] sm:$0xff]  ;;  %v5431_v42 = vunpack.c.h.s8.bf16 %v4935_v54  ;;  %v5433_v23 = vunpack.c.h.s8.bf16 %v4937_v59 }
 0x92a   : > { %v6315_v13 = vmul.f32 %v6286_v35, %v6230_v25  ;;  %v6233_v53 = vmax.f32 %v6225_v0, 0.0  ;;  %6102 = vmatpush1.bf16.msra.mxu1 %v5392_v37  ;;  %5939 = vmatprep.subr.bf16.mxu0 %v5399_v1  ;;  %v5422_v35 = vunpack.c.l.s8.bf16 %v4934_v17  ;;  %v5424_v20 = vunpack.c.l.s8.bf16 %v4936_v55  ;;  %v4945_v37 = vld [vmem:[%s7240_s30 + $0x7b8] sm:$0xff]  ;;  %v4944_v1 = vld [vmem:[%s7240_s30 + $0x7b0] sm:$0xff] }
 0x92b   : > { %v6317_v43 = vmul.f32 %v6294_v16, %v6232_v52  ;;  %v6316_v28 = vmul.f32 %v6290_v47, %v6231_v40  ;;  %6103 = vmatprep.subr.bf16.mxu1 %v5401_v27  ;;  %v5430_v36 = vunpack.c.h.s8.bf16 %v4934_v17  ;;  %v5432_v16 = vunpack.c.h.s8.bf16 %v4936_v55  ;;  %v4951_v27 = vld [vmem:[%s7240_s30 + $0x7e8] sm:$0xff]  ;;  %v4950_v52 = vld [vmem:[%s7240_s30 + $0x7e0] sm:$0xff] }
 0x92c   : > { %v6323_v12 = vsel %vm4203_vm2, %v6315_v13, 0.0  ;;  %v6318_v22 = vmul.f32 %v6298_v24, %v6233_v53  ;;  %v5439_v31 = vunpack.c.l.s8.bf16 %v4943_v39  ;;  %v5441_v29 = vunpack.c.l.s8.bf16 %v4945_v37  ;;  %v4952_v24 = vld [vmem:[%s7240_s30 + $0x7f0] sm:$0xff] }
 0x92d   : > { %v6324_v38 = vsel %vm4203_vm2, %v6316_v28, 0.0  ;;  %5940 = vmatpush1.bf16.msra.mxu0 %v5398_v63  ;;  %v6326_v14 = vsel %vm4203_vm2, %v6317_v43, 0.0  ;;  %v5438_v44 = vunpack.c.l.s8.bf16 %v4942_v7  ;;  %v5440_v50 = vunpack.c.l.s8.bf16 %v4944_v1 }
 0x92e   : > { %v6325_v60 = vadd.f32 %v6324_v38, %v6323_v12  ;;  %6104 = vmatpush1.bf16.msra.mxu1 %v5400_v57  ;;  %5941 = vmatprep.subr.bf16.mxu0 %v5407_v8  ;;  %v6328_v56 = vsel %vm4203_vm2, %v6318_v22, 0.0  ;;  %v5447_v47 = vunpack.c.h.s8.bf16 %v4943_v39  ;;  %v5449_v11 = vunpack.c.h.s8.bf16 %v4945_v37 }
 0x92f   : > { %6105 = vmatprep.subr.bf16.mxu1 %v5409_v41  ;;  %v5446_v25 = vunpack.c.h.s8.bf16 %v4942_v7  ;;  %v5448_v0 = vunpack.c.h.s8.bf16 %v4944_v1  ;;  %v5455_v32 = vunpack.c.l.s8.bf16 %v4951_v27  ;;  %v5457_v40 = vunpack.c.l.s8.bf16 %v4953_v10 }
 0x930   : > { %v6327_v58 = vadd.f32 %v6326_v14, %v6325_v60  ;;  %v5454_v63 = vunpack.c.l.s8.bf16 %v4950_v52  ;;  %v5456_v13 = vunpack.c.l.s8.bf16 %v4952_v24  ;;  %v5463_v53 = vunpack.c.h.s8.bf16 %v4951_v27 }
 0x931   : > { %5942 = vmatpush1.bf16.msra.mxu0 %v5406_v4  ;;  %v5465_v57 = vunpack.c.h.s8.bf16 %v4953_v10  ;;  %v5462_v8 = vunpack.c.h.s8.bf16 %v4950_v52  ;;  %v5464_v30 = vunpack.c.h.s8.bf16 %v4952_v24  ;;  %v6240_v43 = vunpack.c.h.bf16 %v9391_v49 }
 0x932   : > { %6106 = vmatpush1.bf16.msra.mxu1 %v5408_v34  ;;  %5943 = vmatprep.subr.bf16.mxu0 %v5415_v9  ;;  %v9462_v6 = vadd.f32 %v6328_v56, %v6327_v58  ;;  %v6151_v28 = vrot.slane %v9399_v5, %v9101_v18  ;;  %v6159_v41 = vrot.slane %v9399_v5, %v9111_v51 }
 0x933   : > { %6107 = vmatprep.subr.bf16.mxu1 %v5417_v19  ;;  %v6155_v3 = vrot.slane %v9399_v5, %v9104_v46  ;;  %v6201_v12 = vrot.slane %v9409_v2, %v9101_v18  ;;  %v6262_v38 = vrot.slane %v6240_v43, %v9072_v21  ;;  %v6163_v22 = vrot.slane %v9399_v5, %v9114_v48 }
 0x934   : > { %v6209_v49 = vrot.slane %v9409_v2, %v9111_v51  ;;  %v6205_v4 = vrot.slane %v9409_v2, %v9104_v46  ;;  %v6266_v60 = vrot.slane %v6240_v43, %v9087_v45  ;;  %v6213_v19 = vrot.slane %v9409_v2, %v9114_v48 }
 0x935   : > { %5944 = vmatpush1.bf16.msra.mxu0 %v5414_v62  ;;  %v6270_v54 = vrot.slane %v6240_v43, %v9101_v18  ;;  %v6274_v45 = vrot.slane %v6240_v43, %v9111_v51 }
 0x936   : > { %6108 = vmatpush1.bf16.msra.mxu1 %v5416_v26  ;;  %5945 = vmatprep.subr.bf16.mxu0 %v5423_v61  ;;  %v6302_v26 = vrot.slane %v6262_v38, %v9072_v21 }
 0x937   : > { %6109 = vmatprep.subr.bf16.mxu1 %v5425_v33  ;;  %v6310_v18 = vrot.slane %v6270_v54, %v9072_v21 }
 0x939   : > { %5946 = vmatpush1.bf16.msra.mxu0 %v5422_v35  ;;  %v6306_v35 = vrot.slane %v6266_v60, %v9072_v21 }
 0x93a   : > { %6110 = vmatpush1.bf16.msra.mxu1 %v5424_v20  ;;  %5947 = vmatprep.subr.bf16.mxu0 %v5431_v42 }
 0x93b   : > { %6111 = vmatprep.subr.bf16.mxu1 %v5433_v23 }
 0x93d   : > { %5948 = vmatpush1.bf16.msra.mxu0 %v5430_v36  ;;  %v6314_v36 = vrot.slane %v6274_v45, %v9072_v21  ;;  %v6783_v21 = vld [vmem:[%s9595_s23] ss:$0 sm:$0xff] }
 0x93e   : > { %6112 = vmatpush1.bf16.msra.mxu1 %v5432_v16  ;;  %5949 = vmatprep.subr.bf16.mxu0 %v5439_v31 }
 0x93f   : > { %6113 = vmatprep.subr.bf16.mxu1 %v5441_v29 }
 0x941   : > { %5950 = vmatpush1.bf16.msra.mxu0 %v5438_v44 }
 0x942   : > { %6114 = vmatpush1.bf16.msra.mxu1 %v5440_v50  ;;  %5951 = vmatprep.subr.bf16.mxu0 %v5447_v47 }
 0x943   : > { %6115 = vmatprep.subr.bf16.mxu1 %v5449_v11 }
 0x945   : > { %5952 = vmatpush1.bf16.msra.mxu0 %v5446_v25 }
 0x946   : > { %6116 = vmatpush1.bf16.msra.mxu1 %v5448_v0  ;;  %5953 = vmatprep.subr.bf16.mxu0 %v5455_v32 }
 0x947   : > { %6117 = vmatprep.subr.bf16.mxu1 %v5457_v40 }
 0x949   : > { %5954 = vmatpush1.bf16.msra.mxu0 %v5454_v63 }
 0x94a   : > { %6118 = vmatpush1.bf16.msra.mxu1 %v5456_v13  ;;  %5955 = vmatprep.subr.bf16.mxu0 %v5463_v53 }
 0x94b   : > { %6119 = vmatprep.subr.bf16.mxu1 %v5465_v57 }
 0x94d   : > { %5956 = vmatpush1.bf16.msra.mxu0 %v5462_v8 }
 0x94e   : > { %6120 = vmatpush1.bf16.msra.mxu1 %v5464_v30 }
 0x950   : > { %5958 = vmatmul.mubr.bf16.vlgmr.msra.gmra.mrb[20].mxu0 %v9265_v15 }
 0x951   : > { %6122 = vmatmul.mubr.bf16.vlgmr.msra.gmra.mrb[20].mxu1 %v9265_v15 }
 0xa23   : > { %v5959_v15 = vpop.f32.mrb[20].mxu0 }
 0xa24   : > { %v6176_v34 = vmul.f32 %v6151_v28, %v5959_v15  ;;  %v6123_v9 = vpop.f32.mrb[20].mxu1  ;;  %v5961_v14 = vpop.f32.mrb[21].mxu0 }
 0xa25   : > { %v6178_v59 = vmul.f32 %v6159_v41, %v6123_v9  ;;  %v6177_v58 = vmul.f32 %v6155_v3, %v5961_v14  ;;  %v6125_v5 = vpop.f32.mrb[21].mxu1  ;;  %v5963_v56 = vpop.f32.mrb[22].mxu0 }
 0xa26   : > { %v6226_v62 = vadd.f32 %v6201_v12, %v6176_v34  ;;  %v6179_v61 = vmul.f32 %v6163_v22, %v6125_v5  ;;  %v6127_v17 = vpop.f32.mrb[22].mxu1  ;;  %v5964_v46 = vpop.f32.mrb[23].mxu0 }
 0xa27   : > { %v6228_v33 = vadd.f32 %v6209_v49, %v6178_v59  ;;  %v6227_v55 = vadd.f32 %v6205_v4, %v6177_v58  ;;  %v6128_v20 = vpop.f32.mrb[23].mxu1 }
 0xa28   : > { %v6234_v48 = vmax.f32 %v6226_v62, 0.0  ;;  %v6229_v2 = vadd.f32 %v6213_v19, %v6179_v61 }
 0xa29   : > { %v6236_v42 = vmax.f32 %v6228_v33, 0.0  ;;  %v6235_v23 = vmax.f32 %v6227_v55, 0.0 }
 0xa2a   : > { %v6319_v39 = vmul.f32 %v6302_v26, %v6234_v48  ;;  %v6237_v37 = vmax.f32 %v6229_v2, 0.0 }
 0xa2b   : > { %v6320_v16 = vmul.f32 %v6306_v35, %v6235_v23  ;;  %v6321_v31 = vmul.f32 %v6310_v18, %v6236_v42 }
 0xa2c   : > { %v6330_v51 = vsel %vm4203_vm2, %v6319_v39, 0.0  ;;  %v6322_v1 = vmul.f32 %v6314_v36, %v6237_v37 }
 0xa2d   : > { %v6331_v7 = vadd.f32 %v6330_v51, %v9462_v6  ;;  %v6332_v29 = vsel %vm4203_vm2, %v6320_v16, 0.0  ;;  %v6334_v50 = vsel %vm4203_vm2, %v6321_v31, 0.0 }
 0xa2e   : > { %v6336_v11 = vsel %vm4203_vm2, %v6322_v1, 0.0 }
 0xa2f   : > { %v6333_v44 = vadd.f32 %v6332_v29, %v6331_v7 }
 0xa31   : > { %v6335_v47 = vadd.f32 %v6334_v50, %v6333_v44 }
 0xa33   : > { %v6337_v27 = vadd.f32 %v6336_v11, %v6335_v47 }
 0xa35   : > { %6338 = vadd.xlane.f32.xlu0 %v6337_v27 }
 0xac2   : > { %v6339_v10 = vpop.xlane.xlu0 %6338 }
 0xac3   : > { %v6347_v25 = vadd.f32 %v6783_v21, %v6339_v10 }
 0xac5   : > { %6349 = vst.msk [vmem:[%s7262_s0] sm:$0x3] %vm6348_vm5, %v6347_v25 }
 0xac6 PF: > { %s9596_s5 = sld [smem:[#allocation3_spill]] }
 0xacc   : > { %s32_s3 = sadd.s32 1, %s9596_s5  }
 0xacd   : > { %p29_p5 = scmp.ge.s32.totalorder %s32_s3, 4  }
 0xacf   :  { %31 = sbr.rel (!%p29_p5) target bundleno = 13 (0xd), region = 163 }

</bundles_post_ra>
